<compile_context>
chip_gen: v6e
topology: v6e:2x2x1
jax: 0.10.0
libtpu: 0.0.40
codegen_flags: <defaults>
</compile_context>

<pallas_src>
import functools

import jax
import jax.numpy as jnp
from jax.experimental import pallas as pl
from jax.experimental.pallas import tpu as pltpu

HEADS = 4
EPS = 1e-5  # nn.LayerNorm default eps


def _layernorm(x, gamma, beta):
    mu = jnp.mean(x, axis=-1, keepdims=True)
    var = jnp.mean((x - mu) ** 2, axis=-1, keepdims=True)
    return (x - mu) * jax.lax.rsqrt(var + EPS) * gamma + beta


def index_mlp_kernel(
    x_ref, part_ref,
    w_in_ref, b_in_ref, w_inp_ref, b_inp_ref,
    wq_ref, bq_ref, wkv_ref, bkv_ref,
    wc_ref, bc_ref, wf1_ref, bf1_ref, wf2_ref, bf2_ref,
    g1_ref, be1_ref, g2_ref, be2_ref,
    w_out_ref, b_out_ref,
    o_ref,
    h_scr, p_scr,
    *, heads, bt, seq_l, seq_l2,
):
    f32 = jnp.float32
    bf16 = jnp.bfloat16
    hidden = w_in_ref.shape[1]
    dh = hidden // heads
    layer = pl.program_id(1)

    # --- first layer step of this batch block: input projections -> scratch
    @pl.when(layer == 0)
    def _():
        x = x_ref[...].reshape(bt * seq_l, x_ref.shape[-1])
        part = part_ref[...].reshape(bt * seq_l2, part_ref.shape[-1])
        h0 = jnp.dot(x.astype(bf16), w_in_ref[...],
                     preferred_element_type=f32) + b_in_ref[...]
        p0 = jnp.dot(part.astype(bf16), w_inp_ref[...],
                     preferred_element_type=f32) + b_inp_ref[...]
        h_scr[...] = h0
        p_scr[...] = p0.astype(bf16)

    h = h_scr[...]        # fp32 residual stream carried across layer steps
    p_bf = p_scr[...]     # bf16 part features (identical for every layer)
    h_bf = h.astype(bf16)

    # ---- one CrossAttLayer (weights of layer == pl.program_id(1)) ----
    # Q projection (attention scale folded into wq/bq); fused K|V projection.
    q = jnp.dot(h_bf, wq_ref[...], preferred_element_type=f32) + bq_ref[...]
    kv = jnp.dot(p_bf, wkv_ref[...], preferred_element_type=f32) + bkv_ref[...]

    q3 = q.reshape(bt, seq_l, hidden).astype(bf16)
    kv3 = kv.reshape(bt, seq_l2, 2 * hidden)
    k3 = kv3[:, :, :hidden].astype(bf16)
    v3 = kv3[:, :, hidden:].astype(bf16)

    # TODO(synk): replace per-head lane slices with a head-batched einsum once Mosaic dot_general with two batch dims is confirmed; for production configs pick heads so dh is a 128-multiple (slices/concat become free).
    head_outs = []
    for hd in range(heads):
        qh = q3[:, :, hd * dh:(hd + 1) * dh]     # (bt, L,  dh)
        kh = k3[:, :, hd * dh:(hd + 1) * dh]     # (bt, L2, dh)
        vh = v3[:, :, hd * dh:(hd + 1) * dh]     # (bt, L2, dh)
        att = jnp.einsum('bqd,bkd->bqk', qh, kh,
                         preferred_element_type=f32)          # fp32 scores
        att = jnp.exp(att - jnp.max(att, axis=-1, keepdims=True))
        att = att * pl.reciprocal(jnp.sum(att, axis=-1, keepdims=True),
                                  approx=True)
        head_outs.append(jnp.einsum('bqk,bkd->bqd', att.astype(bf16), vh,
                                    preferred_element_type=f32))
    # TODO(synk): KV tiling + online-softmax accumulator for production L/L2.
    o_all = jnp.concatenate(head_outs, axis=-1).reshape(bt * seq_l, hidden)
    attn = jnp.dot(o_all.astype(bf16), wc_ref[...],
                   preferred_element_type=f32) + bc_ref[...]

    # residual + norm1 (fp32 elementwise path; v5e VPU/EUP have no bf16)
    h = _layernorm(h + attn, g1_ref[...], be1_ref[...])

    # FFN (dropout p=0.0 == identity) + residual + norm2
    f = jnp.dot(h.astype(bf16), wf1_ref[...],
                preferred_element_type=f32) + bf1_ref[...]
    f = jnp.maximum(f, 0.0)
    f = jnp.dot(f.astype(bf16), wf2_ref[...],
                preferred_element_type=f32) + bf2_ref[...]
    h = _layernorm(h + f, g2_ref[...], be2_ref[...])

    h_scr[...] = h

    # --- last layer step: out_layer(ReLU(h)) -> lane-dense padded slab ---
    @pl.when(layer == pl.num_programs(1) - 1)
    def _():
        out = jnp.dot(jnp.maximum(h, 0.0).astype(bf16), w_out_ref[...],
                      preferred_element_type=f32) + b_out_ref[...]
        o_ref[...] = out.reshape(bt, seq_l, -1).astype(o_ref.dtype)


def _round_up(x, m):
    return ((x + m - 1) // m) * m


def _num_tensorcores():
    """Best-effort TensorCores-per-device (v4 / v5p / v7x megacore => 2)."""
    try:
        kind = jax.devices()[0].device_kind.lower()
    except Exception:
        return 1
    if "lite" in kind or "v5e" in kind or "v6e" in kind:
        return 1
    if "v4" in kind or "v5p" in kind or "v7" in kind:
        return 2
    return 1


def _vmem_capacity_bytes():
    try:
        return int(pltpu.get_tpu_info().vmem_capacity_bytes)
    except Exception:
        return 64 * 1024 * 1024   # conservative default (v7x per-core VMEM)


def _act_bytes_per_batch_elem(L, L2, in_dim, part_dim, hidden, ffn, out_pad,
                              heads):
    """Rough fp32 working-set (activations + attention scores) per batch row."""
    return 4 * (L * (in_dim + 8 * hidden + 2 * ffn + out_pad)
                + L2 * (part_dim + 4 * hidden)
                + heads * L * L2)


def _pick_batch_block(B, per_elem_bytes, act_budget_bytes, num_cores):
    """Largest bt | B whose activations fit the budget.  On megacore parts,
    prefer bt values whose grid-step count is a multiple of the TC count so
    no TensorCore idles on the tail step."""
    divisors = [d for d in range(1, B + 1) if B % d == 0]
    fitting = [d for d in divisors if d * per_elem_bytes <= act_budget_bytes] or [1]
    if num_cores >= 2:
        even = [d for d in fitting if (B // d) % num_cores == 0]
        if even:
            return max(even)
    return max(fitting)


def index_mlp_forward(x, part_fea, params, *, n_cross=2, heads=HEADS,
                      batch_block=None, out_store_dtype=jnp.bfloat16):
    assert n_cross >= 1, "IndexMLP with n_layers < 3 has no CrossAttLayer"
    B, L, in_dim = x.shape
    _, L2, part_dim = part_fea.shape
    hidden = params["w_in"].shape[1]
    ffn = params["wf1"].shape[-1]
    out_dim = params["w_out"].shape[1]
    ffn_pad = _round_up(ffn, 128)      # zero-padded FFN: algebraically exact
    out_pad = _round_up(out_dim, 128)  # lane-dense output slab
    dh = hidden // heads
    scale = dh ** (-0.5)

    f32, bf16 = jnp.float32, jnp.bfloat16
    num_cores = _num_tensorcores()

    per_elem = _act_bytes_per_batch_elem(L, L2, in_dim, part_dim, hidden,
                                         ffn_pad, out_pad, heads)
    if batch_block is None:
        bt = _pick_batch_block(B, per_elem, act_budget_bytes=12 * 2 ** 20,
                               num_cores=num_cores)
    else:
        bt = batch_block
    assert B % bt == 0, "batch block must divide B"

    # Weight preprocessing (trace-time / XLA side, outside the kernel):
    #   * fold attention scale into wq/bq; fuse K and V into one matmul,
    #   * zero-pad FFN width to a 128 multiple (exact) and out_layer to a
    #     lane-dense 128-wide slab,
    #   * cast matmul weights to bf16 (fp32 accumulation inside the kernel).
    # TODO(synk): int8 (v6e) / fp8 (v7x) weight storage for production sizes.
    wf1, bf1, wf2 = params["wf1"], params["bf1"], params["wf2"]
    if ffn_pad != ffn:
        wf1 = jnp.zeros((n_cross, hidden, ffn_pad), f32).at[:, :, :ffn].set(wf1)
        bf1 = jnp.zeros((n_cross, 1, ffn_pad), f32).at[:, :, :ffn].set(bf1)
        wf2 = jnp.zeros((n_cross, ffn_pad, hidden), f32).at[:, :ffn, :].set(wf2)
    w_out_p = jnp.zeros((hidden, out_pad), f32).at[:, :out_dim].set(params["w_out"])
    b_out_p = jnp.zeros((1, out_pad), f32).at[:, :out_dim].set(params["b_out"])

    global_w = [params["w_in"].astype(bf16), params["b_in"].astype(f32),
                params["w_inp"].astype(bf16), params["b_inp"].astype(f32)]
    layer_w = [
        (params["wq"] * scale).astype(bf16), (params["bq"] * scale).astype(f32),
        jnp.concatenate([params["wk"], params["wv"]], axis=-1).astype(bf16),
        jnp.concatenate([params["bk"], params["bv"]], axis=-1).astype(f32),
        params["wc"].astype(bf16), params["bc"].astype(f32),
        wf1.astype(bf16), bf1.astype(f32),
        wf2.astype(bf16), params["bf2"].astype(f32),
        params["g1"].astype(f32), params["be1"].astype(f32),
        params["g2"].astype(f32), params["be2"].astype(f32),
    ]
    out_w = [w_out_p.astype(bf16), b_out_p]
    weights = global_w + layer_w + out_w

    def global_spec(a):
        rank = a.ndim
        return pl.BlockSpec(a.shape, lambda i, l, _r=rank: (0,) * _r)

    def layer_spec(a):
        # Leading n_cross axis squeezed; one layer's slab streamed per step.
        rest = a.shape[1:]
        return pl.BlockSpec((None,) + rest,
                            lambda i, l, _n=len(rest): (l,) + (0,) * _n)

    in_specs = ([pl.BlockSpec((bt, L, in_dim), lambda i, l: (i, 0, 0)),
                 pl.BlockSpec((bt, L2, part_dim), lambda i, l: (i, 0, 0))]
                + [global_spec(w) for w in global_w]
                + [layer_spec(w) for w in layer_w]
                + [global_spec(w) for w in out_w])
    out_spec = pl.BlockSpec((bt, L, out_pad), lambda i, l: (i, 0, 0))

    scratch_shapes = [pltpu.VMEM((bt * L, hidden), f32),    # residual stream h
                      pltpu.VMEM((bt * L2, hidden), bf16)]  # projected part_fea

    # Explicit scoped-VMEM budget: double-buffered IO + weight blocks
    # (per-layer slabs only ~2 layers resident thanks to the layer grid axis)
    # + persistent scratch + activation working set, with headroom.
    out_itemsize = jnp.dtype(out_store_dtype).itemsize
    io_bytes = 2 * (bt * L * in_dim * 4 + bt * L2 * part_dim * 4
                    + bt * L * out_pad * out_itemsize)
    w_bytes = 0
    for w in global_w + out_w:
        w_bytes += 2 * w.size * w.dtype.itemsize
    for w in layer_w:
        w_bytes += 2 * (w.size // n_cross) * w.dtype.itemsize
    scratch_bytes = bt * L * hidden * 4 + bt * L2 * hidden * 2
    need = io_bytes + w_bytes + scratch_bytes + bt * per_elem
    vmem_limit = int(min(max(int(need * 1.5), 32 * 2 ** 20),
                         int(0.9 * _vmem_capacity_bytes())))

    kernel = functools.partial(index_mlp_kernel, heads=heads, bt=bt,
                               seq_l=L, seq_l2=L2)

    out_padded = pl.pallas_call(
        kernel,
        out_shape=jax.ShapeDtypeStruct((B, L, out_pad), out_store_dtype),
        grid=(B // bt, n_cross),
        in_specs=in_specs,
        out_specs=out_spec,
        scratch_shapes=scratch_shapes,
        compiler_params=pltpu.CompilerParams(
            dimension_semantics=("parallel", "arbitrary"),
            vmem_limit_bytes=vmem_limit),
    )(x, part_fea, *weights)

    # Slice the lane-padded slab back to out_dim; return fp32 like the module.
    return out_padded[..., :out_dim].astype(jnp.float32)


def init_params(key, in_dim, part_dim, hidden, out_dim, n_cross, ffn_mul=2):
    ffn = ffn_mul * hidden
    keys = iter(jax.random.split(key, 40))

    def w(shape):
        return jax.random.normal(next(keys), shape, jnp.float32) * 0.05

    return dict(
        w_in=w((in_dim, hidden)), b_in=w((1, hidden)),
        w_inp=w((part_dim, hidden)), b_inp=w((1, hidden)),
        wq=w((n_cross, hidden, hidden)), bq=w((n_cross, 1, hidden)),
        wk=w((n_cross, hidden, hidden)), bk=w((n_cross, 1, hidden)),
        wv=w((n_cross, hidden, hidden)), bv=w((n_cross, 1, hidden)),
        wc=w((n_cross, hidden, hidden)), bc=w((n_cross, 1, hidden)),
        wf1=w((n_cross, hidden, ffn)), bf1=w((n_cross, 1, ffn)),
        wf2=w((n_cross, ffn, hidden)), bf2=w((n_cross, 1, hidden)),
        g1=jnp.ones((n_cross, 1, hidden), jnp.float32),
        be1=jnp.zeros((n_cross, 1, hidden), jnp.float32),
        g2=jnp.ones((n_cross, 1, hidden), jnp.float32),
        be2=jnp.zeros((n_cross, 1, hidden), jnp.float32),
        w_out=w((hidden, out_dim)), b_out=w((1, out_dim)),
    )


def reference_forward(x, part, P, *, n_cross=2, heads=HEADS):
    """Pure-JAX fp32 reference mirroring the PyTorch IndexMLP forward."""
    B, L, _ = x.shape
    L2 = part.shape[1]
    h = x @ P["w_in"] + P["b_in"]
    p = part @ P["w_inp"] + P["b_inp"]
    dim = h.shape[-1]
    dh = dim // heads
    scale = dh ** (-0.5)
    for i in range(n_cross):
        q = (h @ P["wq"][i] + P["bq"][i]).reshape(B, L, heads, dh).transpose(0, 2, 1, 3)
        k = (p @ P["wk"][i] + P["bk"][i]).reshape(B, L2, heads, dh).transpose(0, 2, 1, 3)
        v = (p @ P["wv"][i] + P["bv"][i]).reshape(B, L2, heads, dh).transpose(0, 2, 1, 3)
        att = jax.nn.softmax((q * scale) @ k.transpose(0, 1, 3, 2), axis=-1)
        o = (att @ v).transpose(0, 2, 1, 3).reshape(B, L, dim)
        h = _layernorm(h + o @ P["wc"][i] + P["bc"][i], P["g1"][i], P["be1"][i])
        f = jnp.maximum(h @ P["wf1"][i] + P["bf1"][i], 0.0) @ P["wf2"][i] + P["bf2"][i]
        h = _layernorm(h + f, P["g2"][i], P["be2"][i])
    return jnp.maximum(h, 0.0) @ P["w_out"] + P["b_out"]


if __name__ == "__main__":
    # Small shapes consistent with IndexMLP(in_dim, out_dim, hidden_dim,
    # part_dim, n_layers=4) -> n_layers-2 = 2 CrossAttLayers.
    B, L, L2 = 4, 16, 8
    IN_DIM, PART_DIM, HIDDEN, OUT_DIM = 8, 8, 32, 4
    N_LAYERS = 4
    N_CROSS = N_LAYERS - 2

    key = jax.random.PRNGKey(0)
    kx, kp, kw = jax.random.split(key, 3)
    x = jax.random.normal(kx, (B, L, IN_DIM), jnp.float32)
    part_fea = jax.random.normal(kp, (B, L2, PART_DIM), jnp.float32)
    params = init_params(kw, IN_DIM, PART_DIM, HIDDEN, OUT_DIM, N_CROSS)

    ref = jax.block_until_ready(
        reference_forward(x, part_fea, params, n_cross=N_CROSS, heads=HEADS))

    # Default device-aware batch-block picker.
    out = jax.block_until_ready(
        index_mlp_forward(x, part_fea, params, n_cross=N_CROSS, heads=HEADS))
    # Explicit 2-step batch grid (exercises the multi-block / megacore path).
    out2 = jax.block_until_ready(
        index_mlp_forward(x, part_fea, params, n_cross=N_CROSS, heads=HEADS,
                          batch_block=2))

    assert out.shape == (B, L, OUT_DIM)
    assert out2.shape == (B, L, OUT_DIM)
    # bf16 matmul inputs / bf16 output store (fp32 accumulation) vs fp32
    # reference -> loosened tolerance.
    assert jnp.allclose(out, ref, rtol=3e-2, atol=3e-2), (
        f"max abs diff {jnp.max(jnp.abs(out - ref))}")
    assert jnp.allclose(out2, ref, rtol=3e-2, atol=3e-2), (
        f"max abs diff {jnp.max(jnp.abs(out2 - ref))}")
    print("KERNEL_OK")
</pallas_src>

<mosaic_0001>
module attributes {stable_mosaic.version = 11 : i64} {
  func.func @index_mlp_kernel(%arg0: i32, %arg1: i32, %arg2: memref<4x16x8xf32, #tpu.memory_space<vmem>>, %arg3: memref<4x8x8xf32, #tpu.memory_space<vmem>>, %arg4: memref<8x32xbf16, #tpu.memory_space<vmem>>, %arg5: memref<1x32xf32, #tpu.memory_space<vmem>>, %arg6: memref<8x32xbf16, #tpu.memory_space<vmem>>, %arg7: memref<1x32xf32, #tpu.memory_space<vmem>>, %arg8: memref<1x32x32xbf16, #tpu.memory_space<vmem>>, %arg9: memref<1x1x32xf32, #tpu.memory_space<vmem>>, %arg10: memref<1x32x64xbf16, #tpu.memory_space<vmem>>, %arg11: memref<1x1x64xf32, #tpu.memory_space<vmem>>, %arg12: memref<1x32x32xbf16, #tpu.memory_space<vmem>>, %arg13: memref<1x1x32xf32, #tpu.memory_space<vmem>>, %arg14: memref<1x32x128xbf16, #tpu.memory_space<vmem>>, %arg15: memref<1x1x128xf32, #tpu.memory_space<vmem>>, %arg16: memref<1x128x32xbf16, #tpu.memory_space<vmem>>, %arg17: memref<1x1x32xf32, #tpu.memory_space<vmem>>, %arg18: memref<1x1x32xf32, #tpu.memory_space<vmem>>, %arg19: memref<1x1x32xf32, #tpu.memory_space<vmem>>, %arg20: memref<1x1x32xf32, #tpu.memory_space<vmem>>, %arg21: memref<1x1x32xf32, #tpu.memory_space<vmem>>, %arg22: memref<32x128xbf16, #tpu.memory_space<vmem>>, %arg23: memref<1x128xf32, #tpu.memory_space<vmem>>, %arg24: memref<4x16x128xbf16, #tpu.memory_space<vmem>>, %arg25: memref<64x32xf32, #tpu.memory_space<vmem>>, %arg26: memref<32x32xbf16, #tpu.memory_space<vmem>>) attributes {dimension_semantics = [#tpu.dimension_semantics<parallel>, #tpu.dimension_semantics<arbitrary>], iteration_bounds = array<i64: 1, 2>, scalar_prefetch = 0 : i64, scratch_operands = 2 : i64, tpu.core_type = #tpu.core_type<tc>, window_params = [{transform_indices = @transform_0, window_bounds = array<i64: 4, 16, 8>}, {transform_indices = @transform_1, window_bounds = array<i64: 4, 8, 8>}, {pipeline_mode = #tpu.pipeline_mode<synchronous>, transform_indices = @transform_2, window_bounds = array<i64: 8, 32>}, {pipeline_mode = #tpu.pipeline_mode<synchronous>, transform_indices = @transform_3, window_bounds = array<i64: 1, 32>}, {pipeline_mode = #tpu.pipeline_mode<synchronous>, transform_indices = @transform_4, window_bounds = array<i64: 8, 32>}, {pipeline_mode = #tpu.pipeline_mode<synchronous>, transform_indices = @transform_5, window_bounds = array<i64: 1, 32>}, {transform_indices = @transform_6, window_bounds = array<i64: 1, 32, 32>}, {transform_indices = @transform_7, window_bounds = array<i64: 1, 1, 32>}, {transform_indices = @transform_8, window_bounds = array<i64: 1, 32, 64>}, {transform_indices = @transform_9, window_bounds = array<i64: 1, 1, 64>}, {transform_indices = @transform_10, window_bounds = array<i64: 1, 32, 32>}, {transform_indices = @transform_11, window_bounds = array<i64: 1, 1, 32>}, {transform_indices = @transform_12, window_bounds = array<i64: 1, 32, 128>}, {transform_indices = @transform_13, window_bounds = array<i64: 1, 1, 128>}, {transform_indices = @transform_14, window_bounds = array<i64: 1, 128, 32>}, {transform_indices = @transform_15, window_bounds = array<i64: 1, 1, 32>}, {transform_indices = @transform_16, window_bounds = array<i64: 1, 1, 32>}, {transform_indices = @transform_17, window_bounds = array<i64: 1, 1, 32>}, {transform_indices = @transform_18, window_bounds = array<i64: 1, 1, 32>}, {transform_indices = @transform_19, window_bounds = array<i64: 1, 1, 32>}, {pipeline_mode = #tpu.pipeline_mode<synchronous>, transform_indices = @transform_20, window_bounds = array<i64: 32, 128>}, {pipeline_mode = #tpu.pipeline_mode<synchronous>, transform_indices = @transform_21, window_bounds = array<i64: 1, 128>}, {transform_indices = @transform_22, window_bounds = array<i64: 4, 16, 128>}]} {
    %c0_i32 = arith.constant 0 : i32
    %0 = arith.cmpi eq, %arg1, %c0_i32 : i32
    %1 = arith.extui %0 : i1 to i32
    %c0_i32_0 = arith.constant 0 : i32
    %2 = arith.cmpi ne, %1, %c0_i32_0 : i32
    scf.if %2 {
      %c0_80 = arith.constant 0 : index
      %c0_81 = arith.constant 0 : index
      %c0_82 = arith.constant 0 : index
      %177 = vector.load %arg2[%c0_80, %c0_81, %c0_82] : memref<4x16x8xf32, #tpu.memory_space<vmem>>, vector<4x16x8xf32>
      %178 = vector.shape_cast %177 : vector<4x16x8xf32> to vector<64x8xf32>
      %c0_83 = arith.constant 0 : index
      %c0_84 = arith.constant 0 : index
      %c0_85 = arith.constant 0 : index
      %179 = vector.load %arg3[%c0_83, %c0_84, %c0_85] : memref<4x8x8xf32, #tpu.memory_space<vmem>>, vector<4x8x8xf32>
      %180 = vector.shape_cast %179 : vector<4x8x8xf32> to vector<32x8xf32>
      %181 = arith.truncf %178 : vector<64x8xf32> to vector<64x8xbf16>
      %c0_86 = arith.constant 0 : index
      %c0_87 = arith.constant 0 : index
      %182 = vector.load %arg4[%c0_86, %c0_87] : memref<8x32xbf16, #tpu.memory_space<vmem>>, vector<8x32xbf16>
      %cst_88 = arith.constant dense<0.000000e+00> : vector<64x32xf32>
      %183 = tpu.matmul %181, %182, %cst_88 {dimension_numbers = #tpu.dot_dimension_numbers<[1], [0], [0], [1], [0, 0, 1, 1], [], []>} : vector<64x8xbf16>, vector<8x32xbf16>, vector<64x32xf32> -> vector<64x32xf32>
      %c0_89 = arith.constant 0 : index
      %c0_90 = arith.constant 0 : index
      %184 = vector.load %arg5[%c0_89, %c0_90] : memref<1x32xf32, #tpu.memory_space<vmem>>, vector<1x32xf32>
      %185 = vector.broadcast %184 : vector<1x32xf32> to vector<64x32xf32>
      %186 = arith.addf %183, %185 : vector<64x32xf32>
      %187 = arith.truncf %180 : vector<32x8xf32> to vector<32x8xbf16>
      %c0_91 = arith.constant 0 : index
      %c0_92 = arith.constant 0 : index
      %188 = vector.load %arg6[%c0_91, %c0_92] : memref<8x32xbf16, #tpu.memory_space<vmem>>, vector<8x32xbf16>
      %cst_93 = arith.constant dense<0.000000e+00> : vector<32x32xf32>
      %189 = tpu.matmul %187, %188, %cst_93 {dimension_numbers = #tpu.dot_dimension_numbers<[1], [0], [0], [1], [0, 0, 1, 1], [], []>} : vector<32x8xbf16>, vector<8x32xbf16>, vector<32x32xf32> -> vector<32x32xf32>
      %c0_94 = arith.constant 0 : index
      %c0_95 = arith.constant 0 : index
      %190 = vector.load %arg7[%c0_94, %c0_95] : memref<1x32xf32, #tpu.memory_space<vmem>>, vector<1x32xf32>
      %191 = vector.broadcast %190 : vector<1x32xf32> to vector<32x32xf32>
      %192 = arith.addf %189, %191 : vector<32x32xf32>
      %c0_96 = arith.constant 0 : index
      %c0_97 = arith.constant 0 : index
      %193 = vector.load %arg25[%c0_96, %c0_97] : memref<64x32xf32, #tpu.memory_space<vmem>>, vector<64x32xf32>
      tpu.vector_store %arg25[%c0_96, %c0_97], %186 {strides = array<i32>} : memref<64x32xf32, #tpu.memory_space<vmem>>, vector<64x32xf32>,
      %194 = arith.truncf %192 : vector<32x32xf32> to vector<32x32xbf16>
      %c0_98 = arith.constant 0 : index
      %c0_99 = arith.constant 0 : index
      %195 = vector.load %arg26[%c0_98, %c0_99] : memref<32x32xbf16, #tpu.memory_space<vmem>>, vector<32x32xbf16>
      tpu.vector_store %arg26[%c0_98, %c0_99], %194 {strides = array<i32>} : memref<32x32xbf16, #tpu.memory_space<vmem>>, vector<32x32xbf16>,
    } else {
    }
    %c0 = arith.constant 0 : index
    %c0_1 = arith.constant 0 : index
    %3 = vector.load %arg25[%c0, %c0_1] : memref<64x32xf32, #tpu.memory_space<vmem>>, vector<64x32xf32>
    %c0_2 = arith.constant 0 : index
    %c0_3 = arith.constant 0 : index
    %4 = vector.load %arg26[%c0_2, %c0_3] : memref<32x32xbf16, #tpu.memory_space<vmem>>, vector<32x32xbf16>
    %5 = arith.truncf %3 : vector<64x32xf32> to vector<64x32xbf16>
    %c0_4 = arith.constant 0 : index
    %c0_5 = arith.constant 0 : index
    %c0_6 = arith.constant 0 : index
    %6 = vector.load %arg8[%c0_4, %c0_5, %c0_6] : memref<1x32x32xbf16, #tpu.memory_space<vmem>>, vector<1x32x32xbf16>
    %7 = vector.shape_cast %6 : vector<1x32x32xbf16> to vector<32x32xbf16>
    %cst = arith.constant dense<0.000000e+00> : vector<64x32xf32>
    %8 = tpu.matmul %5, %7, %cst {dimension_numbers = #tpu.dot_dimension_numbers<[1], [0], [0], [1], [0, 0, 1, 1], [], []>} : vector<64x32xbf16>, vector<32x32xbf16>, vector<64x32xf32> -> vector<64x32xf32>
    %c0_7 = arith.constant 0 : index
    %c0_8 = arith.constant 0 : index
    %c0_9 = arith.constant 0 : index
    %9 = vector.load %arg9[%c0_7, %c0_8, %c0_9] : memref<1x1x32xf32, #tpu.memory_space<vmem>>, vector<1x1x32xf32>
    %10 = vector.shape_cast %9 : vector<1x1x32xf32> to vector<1x32xf32>
    %11 = vector.broadcast %10 : vector<1x32xf32> to vector<64x32xf32>
    %12 = arith.addf %8, %11 : vector<64x32xf32>
    %c0_10 = arith.constant 0 : index
    %c0_11 = arith.constant 0 : index
    %c0_12 = arith.constant 0 : index
    %13 = vector.load %arg10[%c0_10, %c0_11, %c0_12] : memref<1x32x64xbf16, #tpu.memory_space<vmem>>, vector<1x32x64xbf16>
    %14 = vector.shape_cast %13 : vector<1x32x64xbf16> to vector<32x64xbf16>
    %cst_13 = arith.constant dense<0.000000e+00> : vector<32x64xf32>
    %15 = tpu.matmul %4, %14, %cst_13 {dimension_numbers = #tpu.dot_dimension_numbers<[1], [0], [0], [1], [0, 0, 1, 1], [], []>} : vector<32x32xbf16>, vector<32x64xbf16>, vector<32x64xf32> -> vector<32x64xf32>
    %c0_14 = arith.constant 0 : index
    %c0_15 = arith.constant 0 : index
    %c0_16 = arith.constant 0 : index
    %16 = vector.load %arg11[%c0_14, %c0_15, %c0_16] : memref<1x1x64xf32, #tpu.memory_space<vmem>>, vector<1x1x64xf32>
    %17 = vector.shape_cast %16 : vector<1x1x64xf32> to vector<1x64xf32>
    %18 = vector.broadcast %17 : vector<1x64xf32> to vector<32x64xf32>
    %19 = arith.addf %15, %18 : vector<32x64xf32>
    %20 = vector.shape_cast %12 : vector<64x32xf32> to vector<4x16x32xf32>
    %21 = arith.truncf %20 : vector<4x16x32xf32> to vector<4x16x32xbf16>
    %22 = vector.shape_cast %19 : vector<32x64xf32> to vector<4x8x64xf32>
    %23 = vector.extract_strided_slice %22 {offsets = [0, 0, 0], sizes = [4, 8, 32], strides = [1, 1, 1]} : vector<4x8x64xf32> to vector<4x8x32xf32>
    %24 = arith.truncf %23 : vector<4x8x32xf32> to vector<4x8x32xbf16>
    %25 = vector.extract_strided_slice %22 {offsets = [0, 0, 32], sizes = [4, 8, 32], strides = [1, 1, 1]} : vector<4x8x64xf32> to vector<4x8x32xf32>
    %26 = arith.truncf %25 : vector<4x8x32xf32> to vector<4x8x32xbf16>
    %27 = vector.extract_strided_slice %21 {offsets = [0, 0, 0], sizes = [4, 16, 8], strides = [1, 1, 1]} : vector<4x16x32xbf16> to vector<4x16x8xbf16>
    %28 = vector.extract_strided_slice %24 {offsets = [0, 0, 0], sizes = [4, 8, 8], strides = [1, 1, 1]} : vector<4x8x32xbf16> to vector<4x8x8xbf16>
    %29 = vector.extract_strided_slice %26 {offsets = [0, 0, 0], sizes = [4, 8, 8], strides = [1, 1, 1]} : vector<4x8x32xbf16> to vector<4x8x8xbf16>
    "tpu.trace_start"() <{level = 10 : i32, message = "bqd,bkd->bqk"}> : () -> ()
    %cst_17 = arith.constant dense<0.000000e+00> : vector<4x16x8xf32>
    %30 = tpu.matmul %27, %28, %cst_17 {dimension_numbers = #tpu.dot_dimension_numbers<[2], [2], [1], [1], [0, 0, 0, 1, 1, 1], [0], [0]>} : vector<4x16x8xbf16>, vector<4x8x8xbf16>, vector<4x16x8xf32> -> vector<4x16x8xf32>
    "tpu.trace_stop"() : () -> ()
    %cst_18 = arith.constant dense<0xFF800000> : vector<4x16xf32>
    %31 = vector.multi_reduction <maximumf>, %30, %cst_18 [2] : vector<4x16x8xf32> to vector<4x16xf32>
    %32 = vector.shape_cast %31 : vector<4x16xf32> to vector<4x16x1xf32>
    %33 = vector.broadcast %32 : vector<4x16x1xf32> to vector<4x16x8xf32>
    %34 = arith.subf %30, %33 : vector<4x16x8xf32>
    %35 = math.exp %34 : vector<4x16x8xf32>
    %cst_19 = arith.constant dense<0.000000e+00> : vector<4x16xf32>
    %36 = vector.multi_reduction <add>, %35, %cst_19 [2] : vector<4x16x8xf32> to vector<4x16xf32>
    %37 = vector.shape_cast %36 : vector<4x16xf32> to vector<4x16x1xf32>
    %38 = tpu.reciprocal %37 {approx = true} : vector<4x16x1xf32> -> vector<4x16x1xf32>
    %39 = vector.broadcast %38 : vector<4x16x1xf32> to vector<4x16x8xf32>
    %40 = arith.mulf %35, %39 : vector<4x16x8xf32>
    %41 = arith.truncf %40 : vector<4x16x8xf32> to vector<4x16x8xbf16>
    "tpu.trace_start"() <{level = 10 : i32, message = "bqk,bkd->bqd"}> : () -> ()
    %cst_20 = arith.constant dense<0.000000e+00> : vector<4x16x8xf32>
    %42 = tpu.matmul %41, %29, %cst_20 {dimension_numbers = #tpu.dot_dimension_numbers<[2], [1], [1], [2], [0, 0, 0, 1, 1, 2], [0], [0]>} : vector<4x16x8xbf16>, vector<4x8x8xbf16>, vector<4x16x8xf32> -> vector<4x16x8xf32>
    "tpu.trace_stop"() : () -> ()
    %43 = vector.extract_strided_slice %21 {offsets = [0, 0, 8], sizes = [4, 16, 8], strides = [1, 1, 1]} : vector<4x16x32xbf16> to vector<4x16x8xbf16>
    %44 = vector.extract_strided_slice %24 {offsets = [0, 0, 8], sizes = [4, 8, 8], strides = [1, 1, 1]} : vector<4x8x32xbf16> to vector<4x8x8xbf16>
    %45 = vector.extract_strided_slice %26 {offsets = [0, 0, 8], sizes = [4, 8, 8], strides = [1, 1, 1]} : vector<4x8x32xbf16> to vector<4x8x8xbf16>
    "tpu.trace_start"() <{level = 10 : i32, message = "bqd,bkd->bqk"}> : () -> ()
    %cst_21 = arith.constant dense<0.000000e+00> : vector<4x16x8xf32>
    %46 = tpu.matmul %43, %44, %cst_21 {dimension_numbers = #tpu.dot_dimension_numbers<[2], [2], [1], [1], [0, 0, 0, 1, 1, 1], [0], [0]>} : vector<4x16x8xbf16>, vector<4x8x8xbf16>, vector<4x16x8xf32> -> vector<4x16x8xf32>
    "tpu.trace_stop"() : () -> ()
    %cst_22 = arith.constant dense<0xFF800000> : vector<4x16xf32>
    %47 = vector.multi_reduction <maximumf>, %46, %cst_22 [2] : vector<4x16x8xf32> to vector<4x16xf32>
    %48 = vector.shape_cast %47 : vector<4x16xf32> to vector<4x16x1xf32>
    %49 = vector.broadcast %48 : vector<4x16x1xf32> to vector<4x16x8xf32>
    %50 = arith.subf %46, %49 : vector<4x16x8xf32>
    %51 = math.exp %50 : vector<4x16x8xf32>
    %cst_23 = arith.constant dense<0.000000e+00> : vector<4x16xf32>
    %52 = vector.multi_reduction <add>, %51, %cst_23 [2] : vector<4x16x8xf32> to vector<4x16xf32>
    %53 = vector.shape_cast %52 : vector<4x16xf32> to vector<4x16x1xf32>
    %54 = tpu.reciprocal %53 {approx = true} : vector<4x16x1xf32> -> vector<4x16x1xf32>
    %55 = vector.broadcast %54 : vector<4x16x1xf32> to vector<4x16x8xf32>
    %56 = arith.mulf %51, %55 : vector<4x16x8xf32>
    %57 = arith.truncf %56 : vector<4x16x8xf32> to vector<4x16x8xbf16>
    "tpu.trace_start"() <{level = 10 : i32, message = "bqk,bkd->bqd"}> : () -> ()
    %cst_24 = arith.constant dense<0.000000e+00> : vector<4x16x8xf32>
    %58 = tpu.matmul %57, %45, %cst_24 {dimension_numbers = #tpu.dot_dimension_numbers<[2], [1], [1], [2], [0, 0, 0, 1, 1, 2], [0], [0]>} : vector<4x16x8xbf16>, vector<4x8x8xbf16>, vector<4x16x8xf32> -> vector<4x16x8xf32>
    "tpu.trace_stop"() : () -> ()
    %59 = vector.extract_strided_slice %21 {offsets = [0, 0, 16], sizes = [4, 16, 8], strides = [1, 1, 1]} : vector<4x16x32xbf16> to vector<4x16x8xbf16>
    %60 = vector.extract_strided_slice %24 {offsets = [0, 0, 16], sizes = [4, 8, 8], strides = [1, 1, 1]} : vector<4x8x32xbf16> to vector<4x8x8xbf16>
    %61 = vector.extract_strided_slice %26 {offsets = [0, 0, 16], sizes = [4, 8, 8], strides = [1, 1, 1]} : vector<4x8x32xbf16> to vector<4x8x8xbf16>
    "tpu.trace_start"() <{level = 10 : i32, message = "bqd,bkd->bqk"}> : () -> ()
    %cst_25 = arith.constant dense<0.000000e+00> : vector<4x16x8xf32>
    %62 = tpu.matmul %59, %60, %cst_25 {dimension_numbers = #tpu.dot_dimension_numbers<[2], [2], [1], [1], [0, 0, 0, 1, 1, 1], [0], [0]>} : vector<4x16x8xbf16>, vector<4x8x8xbf16>, vector<4x16x8xf32> -> vector<4x16x8xf32>
    "tpu.trace_stop"() : () -> ()
    %cst_26 = arith.constant dense<0xFF800000> : vector<4x16xf32>
    %63 = vector.multi_reduction <maximumf>, %62, %cst_26 [2] : vector<4x16x8xf32> to vector<4x16xf32>
    %64 = vector.shape_cast %63 : vector<4x16xf32> to vector<4x16x1xf32>
    %65 = vector.broadcast %64 : vector<4x16x1xf32> to vector<4x16x8xf32>
    %66 = arith.subf %62, %65 : vector<4x16x8xf32>
    %67 = math.exp %66 : vector<4x16x8xf32>
    %cst_27 = arith.constant dense<0.000000e+00> : vector<4x16xf32>
    %68 = vector.multi_reduction <add>, %67, %cst_27 [2] : vector<4x16x8xf32> to vector<4x16xf32>
    %69 = vector.shape_cast %68 : vector<4x16xf32> to vector<4x16x1xf32>
    %70 = tpu.reciprocal %69 {approx = true} : vector<4x16x1xf32> -> vector<4x16x1xf32>
    %71 = vector.broadcast %70 : vector<4x16x1xf32> to vector<4x16x8xf32>
    %72 = arith.mulf %67, %71 : vector<4x16x8xf32>
    %73 = arith.truncf %72 : vector<4x16x8xf32> to vector<4x16x8xbf16>
    "tpu.trace_start"() <{level = 10 : i32, message = "bqk,bkd->bqd"}> : () -> ()
    %cst_28 = arith.constant dense<0.000000e+00> : vector<4x16x8xf32>
    %74 = tpu.matmul %73, %61, %cst_28 {dimension_numbers = #tpu.dot_dimension_numbers<[2], [1], [1], [2], [0, 0, 0, 1, 1, 2], [0], [0]>} : vector<4x16x8xbf16>, vector<4x8x8xbf16>, vector<4x16x8xf32> -> vector<4x16x8xf32>
    "tpu.trace_stop"() : () -> ()
    %75 = vector.extract_strided_slice %21 {offsets = [0, 0, 24], sizes = [4, 16, 8], strides = [1, 1, 1]} : vector<4x16x32xbf16> to vector<4x16x8xbf16>
    %76 = vector.extract_strided_slice %24 {offsets = [0, 0, 24], sizes = [4, 8, 8], strides = [1, 1, 1]} : vector<4x8x32xbf16> to vector<4x8x8xbf16>
    %77 = vector.extract_strided_slice %26 {offsets = [0, 0, 24], sizes = [4, 8, 8], strides = [1, 1, 1]} : vector<4x8x32xbf16> to vector<4x8x8xbf16>
    "tpu.trace_start"() <{level = 10 : i32, message = "bqd,bkd->bqk"}> : () -> ()
    %cst_29 = arith.constant dense<0.000000e+00> : vector<4x16x8xf32>
    %78 = tpu.matmul %75, %76, %cst_29 {dimension_numbers = #tpu.dot_dimension_numbers<[2], [2], [1], [1], [0, 0, 0, 1, 1, 1], [0], [0]>} : vector<4x16x8xbf16>, vector<4x8x8xbf16>, vector<4x16x8xf32> -> vector<4x16x8xf32>
    "tpu.trace_stop"() : () -> ()
    %cst_30 = arith.constant dense<0xFF800000> : vector<4x16xf32>
    %79 = vector.multi_reduction <maximumf>, %78, %cst_30 [2] : vector<4x16x8xf32> to vector<4x16xf32>
    %80 = vector.shape_cast %79 : vector<4x16xf32> to vector<4x16x1xf32>
    %81 = vector.broadcast %80 : vector<4x16x1xf32> to vector<4x16x8xf32>
    %82 = arith.subf %78, %81 : vector<4x16x8xf32>
    %83 = math.exp %82 : vector<4x16x8xf32>
    %cst_31 = arith.constant dense<0.000000e+00> : vector<4x16xf32>
    %84 = vector.multi_reduction <add>, %83, %cst_31 [2] : vector<4x16x8xf32> to vector<4x16xf32>
    %85 = vector.shape_cast %84 : vector<4x16xf32> to vector<4x16x1xf32>
    %86 = tpu.reciprocal %85 {approx = true} : vector<4x16x1xf32> -> vector<4x16x1xf32>
    %87 = vector.broadcast %86 : vector<4x16x1xf32> to vector<4x16x8xf32>
    %88 = arith.mulf %83, %87 : vector<4x16x8xf32>
    %89 = arith.truncf %88 : vector<4x16x8xf32> to vector<4x16x8xbf16>
    "tpu.trace_start"() <{level = 10 : i32, message = "bqk,bkd->bqd"}> : () -> ()
    %cst_32 = arith.constant dense<0.000000e+00> : vector<4x16x8xf32>
    %90 = tpu.matmul %89, %77, %cst_32 {dimension_numbers = #tpu.dot_dimension_numbers<[2], [1], [1], [2], [0, 0, 0, 1, 1, 2], [0], [0]>} : vector<4x16x8xbf16>, vector<4x8x8xbf16>, vector<4x16x8xf32> -> vector<4x16x8xf32>
    "tpu.trace_stop"() : () -> ()
    %91 = tpu.concatenate %42, %58, %74, %90 in 2 : vector<4x16x8xf32>, vector<4x16x8xf32>, vector<4x16x8xf32>, vector<4x16x8xf32> -> vector<4x16x32xf32>
    %92 = vector.shape_cast %91 : vector<4x16x32xf32> to vector<64x32xf32>
    %93 = arith.truncf %92 : vector<64x32xf32> to vector<64x32xbf16>
    %c0_33 = arith.constant 0 : index
    %c0_34 = arith.constant 0 : index
    %c0_35 = arith.constant 0 : index
    %94 = vector.load %arg12[%c0_33, %c0_34, %c0_35] : memref<1x32x32xbf16, #tpu.memory_space<vmem>>, vector<1x32x32xbf16>
    %95 = vector.shape_cast %94 : vector<1x32x32xbf16> to vector<32x32xbf16>
    %cst_36 = arith.constant dense<0.000000e+00> : vector<64x32xf32>
    %96 = tpu.matmul %93, %95, %cst_36 {dimension_numbers = #tpu.dot_dimension_numbers<[1], [0], [0], [1], [0, 0, 1, 1], [], []>} : vector<64x32xbf16>, vector<32x32xbf16>, vector<64x32xf32> -> vector<64x32xf32>
    %c0_37 = arith.constant 0 : index
    %c0_38 = arith.constant 0 : index
    %c0_39 = arith.constant 0 : index
    %97 = vector.load %arg13[%c0_37, %c0_38, %c0_39] : memref<1x1x32xf32, #tpu.memory_space<vmem>>, vector<1x1x32xf32>
    %98 = vector.shape_cast %97 : vector<1x1x32xf32> to vector<1x32xf32>
    %99 = vector.broadcast %98 : vector<1x32xf32> to vector<64x32xf32>
    %100 = arith.addf %96, %99 : vector<64x32xf32>
    %101 = arith.addf %3, %100 : vector<64x32xf32>
    %c0_40 = arith.constant 0 : index
    %c0_41 = arith.constant 0 : index
    %c0_42 = arith.constant 0 : index
    %102 = vector.load %arg18[%c0_40, %c0_41, %c0_42] : memref<1x1x32xf32, #tpu.memory_space<vmem>>, vector<1x1x32xf32>
    %103 = vector.shape_cast %102 : vector<1x1x32xf32> to vector<1x32xf32>
    %c0_43 = arith.constant 0 : index
    %c0_44 = arith.constant 0 : index
    %c0_45 = arith.constant 0 : index
    %104 = vector.load %arg19[%c0_43, %c0_44, %c0_45] : memref<1x1x32xf32, #tpu.memory_space<vmem>>, vector<1x1x32xf32>
    %105 = vector.shape_cast %104 : vector<1x1x32xf32> to vector<1x32xf32>
    %cst_46 = arith.constant dense<0.000000e+00> : vector<64xf32>
    %106 = vector.multi_reduction <add>, %101, %cst_46 [1] : vector<64x32xf32> to vector<64xf32>
    %107 = vector.shape_cast %106 : vector<64xf32> to vector<64x1xf32>
    %cst_47 = arith.constant 3.200000e+01 : f32
    %108 = vector.broadcast %cst_47 : f32 to vector<64x1xf32>
    %109 = arith.divf %107, %108 : vector<64x1xf32>
    %110 = vector.broadcast %109 : vector<64x1xf32> to vector<64x32xf32>
    %111 = arith.subf %101, %110 : vector<64x32xf32>
    %112 = arith.mulf %111, %111 : vector<64x32xf32>
    %cst_48 = arith.constant dense<0.000000e+00> : vector<64xf32>
    %113 = vector.multi_reduction <add>, %112, %cst_48 [1] : vector<64x32xf32> to vector<64xf32>
    %114 = vector.shape_cast %113 : vector<64xf32> to vector<64x1xf32>
    %cst_49 = arith.constant 3.200000e+01 : f32
    %115 = vector.broadcast %cst_49 : f32 to vector<64x1xf32>
    %116 = arith.divf %114, %115 : vector<64x1xf32>
    %117 = vector.broadcast %109 : vector<64x1xf32> to vector<64x32xf32>
    %118 = arith.subf %101, %117 : vector<64x32xf32>
    %cst_50 = arith.constant 9.99999974E-6 : f32
    %119 = vector.broadcast %cst_50 : f32 to vector<64x1xf32>
    %120 = arith.addf %116, %119 : vector<64x1xf32>
    %121 = math.rsqrt %120 : vector<64x1xf32>
    %122 = vector.broadcast %121 : vector<64x1xf32> to vector<64x32xf32>
    %123 = arith.mulf %118, %122 : vector<64x32xf32>
    %124 = vector.broadcast %103 : vector<1x32xf32> to vector<64x32xf32>
    %125 = arith.mulf %123, %124 : vector<64x32xf32>
    %126 = vector.broadcast %105 : vector<1x32xf32> to vector<64x32xf32>
    %127 = arith.addf %125, %126 : vector<64x32xf32>
    %128 = arith.truncf %127 : vector<64x32xf32> to vector<64x32xbf16>
    %c0_51 = arith.constant 0 : index
    %c0_52 = arith.constant 0 : index
    %c0_53 = arith.constant 0 : index
    %129 = vector.load %arg14[%c0_51, %c0_52, %c0_53] : memref<1x32x128xbf16, #tpu.memory_space<vmem>>, vector<1x32x128xbf16>
    %130 = vector.shape_cast %129 : vector<1x32x128xbf16> to vector<32x128xbf16>
    %cst_54 = arith.constant dense<0.000000e+00> : vector<64x128xf32>
    %131 = tpu.matmul %128, %130, %cst_54 {dimension_numbers = #tpu.dot_dimension_numbers<[1], [0], [0], [1], [0, 0, 1, 1], [], []>} : vector<64x32xbf16>, vector<32x128xbf16>, vector<64x128xf32> -> vector<64x128xf32>
    %c0_55 = arith.constant 0 : index
    %c0_56 = arith.constant 0 : index
    %c0_57 = arith.constant 0 : index
    %132 = vector.load %arg15[%c0_55, %c0_56, %c0_57] : memref<1x1x128xf32, #tpu.memory_space<vmem>>, vector<1x1x128xf32>
    %133 = vector.shape_cast %132 : vector<1x1x128xf32> to vector<1x128xf32>
    %134 = vector.broadcast %133 : vector<1x128xf32> to vector<64x128xf32>
    %135 = arith.addf %131, %134 : vector<64x128xf32>
    %cst_58 = arith.constant 0.000000e+00 : f32
    %136 = vector.broadcast %cst_58 : f32 to vector<64x128xf32>
    %137 = arith.maximumf %135, %136 : vector<64x128xf32>
    %138 = arith.truncf %137 : vector<64x128xf32> to vector<64x128xbf16>
    %c0_59 = arith.constant 0 : index
    %c0_60 = arith.constant 0 : index
    %c0_61 = arith.constant 0 : index
    %139 = vector.load %arg16[%c0_59, %c0_60, %c0_61] : memref<1x128x32xbf16, #tpu.memory_space<vmem>>, vector<1x128x32xbf16>
    %140 = vector.shape_cast %139 : vector<1x128x32xbf16> to vector<128x32xbf16>
    %cst_62 = arith.constant dense<0.000000e+00> : vector<64x32xf32>
    %141 = tpu.matmul %138, %140, %cst_62 {dimension_numbers = #tpu.dot_dimension_numbers<[1], [0], [0], [1], [0, 0, 1, 1], [], []>} : vector<64x128xbf16>, vector<128x32xbf16>, vector<64x32xf32> -> vector<64x32xf32>
    %c0_63 = arith.constant 0 : index
    %c0_64 = arith.constant 0 : index
    %c0_65 = arith.constant 0 : index
    %142 = vector.load %arg17[%c0_63, %c0_64, %c0_65] : memref<1x1x32xf32, #tpu.memory_space<vmem>>, vector<1x1x32xf32>
    %143 = vector.shape_cast %142 : vector<1x1x32xf32> to vector<1x32xf32>
    %144 = vector.broadcast %143 : vector<1x32xf32> to vector<64x32xf32>
    %145 = arith.addf %141, %144 : vector<64x32xf32>
    %146 = arith.addf %127, %145 : vector<64x32xf32>
    %c0_66 = arith.constant 0 : index
    %c0_67 = arith.constant 0 : index
    %c0_68 = arith.constant 0 : index
    %147 = vector.load %arg20[%c0_66, %c0_67, %c0_68] : memref<1x1x32xf32, #tpu.memory_space<vmem>>, vector<1x1x32xf32>
    %148 = vector.shape_cast %147 : vector<1x1x32xf32> to vector<1x32xf32>
    %c0_69 = arith.constant 0 : index
    %c0_70 = arith.constant 0 : index
    %c0_71 = arith.constant 0 : index
    %149 = vector.load %arg21[%c0_69, %c0_70, %c0_71] : memref<1x1x32xf32, #tpu.memory_space<vmem>>, vector<1x1x32xf32>
    %150 = vector.shape_cast %149 : vector<1x1x32xf32> to vector<1x32xf32>
    %cst_72 = arith.constant dense<0.000000e+00> : vector<64xf32>
    %151 = vector.multi_reduction <add>, %146, %cst_72 [1] : vector<64x32xf32> to vector<64xf32>
    %152 = vector.shape_cast %151 : vector<64xf32> to vector<64x1xf32>
    %cst_73 = arith.constant 3.200000e+01 : f32
    %153 = vector.broadcast %cst_73 : f32 to vector<64x1xf32>
    %154 = arith.divf %152, %153 : vector<64x1xf32>
    %155 = vector.broadcast %154 : vector<64x1xf32> to vector<64x32xf32>
    %156 = arith.subf %146, %155 : vector<64x32xf32>
    %157 = arith.mulf %156, %156 : vector<64x32xf32>
    %cst_74 = arith.constant dense<0.000000e+00> : vector<64xf32>
    %158 = vector.multi_reduction <add>, %157, %cst_74 [1] : vector<64x32xf32> to vector<64xf32>
    %159 = vector.shape_cast %158 : vector<64xf32> to vector<64x1xf32>
    %cst_75 = arith.constant 3.200000e+01 : f32
    %160 = vector.broadcast %cst_75 : f32 to vector<64x1xf32>
    %161 = arith.divf %159, %160 : vector<64x1xf32>
    %162 = vector.broadcast %154 : vector<64x1xf32> to vector<64x32xf32>
    %163 = arith.subf %146, %162 : vector<64x32xf32>
    %cst_76 = arith.constant 9.99999974E-6 : f32
    %164 = vector.broadcast %cst_76 : f32 to vector<64x1xf32>
    %165 = arith.addf %161, %164 : vector<64x1xf32>
    %166 = math.rsqrt %165 : vector<64x1xf32>
    %167 = vector.broadcast %166 : vector<64x1xf32> to vector<64x32xf32>
    %168 = arith.mulf %163, %167 : vector<64x32xf32>
    %169 = vector.broadcast %148 : vector<1x32xf32> to vector<64x32xf32>
    %170 = arith.mulf %168, %169 : vector<64x32xf32>
    %171 = vector.broadcast %150 : vector<1x32xf32> to vector<64x32xf32>
    %172 = arith.addf %170, %171 : vector<64x32xf32>
    %c0_77 = arith.constant 0 : index
    %c0_78 = arith.constant 0 : index
    %173 = vector.load %arg25[%c0_77, %c0_78] : memref<64x32xf32, #tpu.memory_space<vmem>>, vector<64x32xf32>
    tpu.vector_store %arg25[%c0_77, %c0_78], %172 {strides = array<i32>} : memref<64x32xf32, #tpu.memory_space<vmem>>, vector<64x32xf32>,
    %c1_i32 = arith.constant 1 : i32
    %174 = arith.cmpi eq, %arg1, %c1_i32 : i32
    %175 = arith.extui %174 : i1 to i32
    %c0_i32_79 = arith.constant 0 : i32
    %176 = arith.cmpi ne, %175, %c0_i32_79 : i32
    scf.if %176 {
      %cst_80 = arith.constant 0.000000e+00 : f32
      %177 = vector.broadcast %cst_80 : f32 to vector<64x32xf32>
      %178 = arith.maximumf %172, %177 : vector<64x32xf32>
      %179 = arith.truncf %178 : vector<64x32xf32> to vector<64x32xbf16>
      %c0_81 = arith.constant 0 : index
      %c0_82 = arith.constant 0 : index
      %180 = vector.load %arg22[%c0_81, %c0_82] : memref<32x128xbf16, #tpu.memory_space<vmem>>, vector<32x128xbf16>
      %cst_83 = arith.constant dense<0.000000e+00> : vector<64x128xf32>
      %181 = tpu.matmul %179, %180, %cst_83 {dimension_numbers = #tpu.dot_dimension_numbers<[1], [0], [0], [1], [0, 0, 1, 1], [], []>} : vector<64x32xbf16>, vector<32x128xbf16>, vector<64x128xf32> -> vector<64x128xf32>
      %c0_84 = arith.constant 0 : index
      %c0_85 = arith.constant 0 : index
      %182 = vector.load %arg23[%c0_84, %c0_85] : memref<1x128xf32, #tpu.memory_space<vmem>>, vector<1x128xf32>
      %183 = vector.broadcast %182 : vector<1x128xf32> to vector<64x128xf32>
      %184 = arith.addf %181, %183 : vector<64x128xf32>
      %185 = vector.shape_cast %184 : vector<64x128xf32> to vector<4x16x128xf32>
      %186 = arith.truncf %185 : vector<4x16x128xf32> to vector<4x16x128xbf16>
      %c0_86 = arith.constant 0 : index
      %c0_87 = arith.constant 0 : index
      %c0_88 = arith.constant 0 : index
      %187 = vector.load %arg24[%c0_86, %c0_87, %c0_88] : memref<4x16x128xbf16, #tpu.memory_space<vmem>>, vector<4x16x128xbf16>
      tpu.vector_store %arg24[%c0_86, %c0_87, %c0_88], %186 {strides = array<i32>} : memref<4x16x128xbf16, #tpu.memory_space<vmem>>, vector<4x16x128xbf16>,
    } else {
    }
    return
  }
  func.func @transform_0(%arg0: i32, %arg1: i32) -> (i32, i32, i32) {
    %c0_i32 = arith.constant 0 : i32
    %c0_i32_0 = arith.constant 0 : i32
    %c0_i32_1 = arith.constant 0 : i32
    return %arg0, %c0_i32, %c0_i32_0 : i32, i32, i32
  }
  func.func @transform_1(%arg0: i32, %arg1: i32) -> (i32, i32, i32) {
    %c0_i32 = arith.constant 0 : i32
    %c0_i32_0 = arith.constant 0 : i32
    %c0_i32_1 = arith.constant 0 : i32
    return %arg0, %c0_i32, %c0_i32_0 : i32, i32, i32
  }
  func.func @transform_2(%arg0: i32, %arg1: i32) -> (i32, i32) {
    %c0_i32 = arith.constant 0 : i32
    %c0_i32_0 = arith.constant 0 : i32
    %c0_i32_1 = arith.constant 0 : i32
    return %c0_i32, %c0_i32_0 : i32, i32
  }
  func.func @transform_3(%arg0: i32, %arg1: i32) -> (i32, i32) {
    %c0_i32 = arith.constant 0 : i32
    %c0_i32_0 = arith.constant 0 : i32
    %c0_i32_1 = arith.constant 0 : i32
    return %c0_i32, %c0_i32_0 : i32, i32
  }
  func.func @transform_4(%arg0: i32, %arg1: i32) -> (i32, i32) {
    %c0_i32 = arith.constant 0 : i32
    %c0_i32_0 = arith.constant 0 : i32
    %c0_i32_1 = arith.constant 0 : i32
    return %c0_i32, %c0_i32_0 : i32, i32
  }
  func.func @transform_5(%arg0: i32, %arg1: i32) -> (i32, i32) {
    %c0_i32 = arith.constant 0 : i32
    %c0_i32_0 = arith.constant 0 : i32
    %c0_i32_1 = arith.constant 0 : i32
    return %c0_i32, %c0_i32_0 : i32, i32
  }
  func.func @transform_6(%arg0: i32, %arg1: i32) -> (i32, i32, i32) {
    %c0_i32 = arith.constant 0 : i32
    %c0_i32_0 = arith.constant 0 : i32
    %c0_i32_1 = arith.constant 0 : i32
    return %arg1, %c0_i32, %c0_i32_0 : i32, i32, i32
  }
  func.func @transform_7(%arg0: i32, %arg1: i32) -> (i32, i32, i32) {
    %c0_i32 = arith.constant 0 : i32
    %c0_i32_0 = arith.constant 0 : i32
    %c0_i32_1 = arith.constant 0 : i32
    return %arg1, %c0_i32, %c0_i32_0 : i32, i32, i32
  }
  func.func @transform_8(%arg0: i32, %arg1: i32) -> (i32, i32, i32) {
    %c0_i32 = arith.constant 0 : i32
    %c0_i32_0 = arith.constant 0 : i32
    %c0_i32_1 = arith.constant 0 : i32
    return %arg1, %c0_i32, %c0_i32_0 : i32, i32, i32
  }
  func.func @transform_9(%arg0: i32, %arg1: i32) -> (i32, i32, i32) {
    %c0_i32 = arith.constant 0 : i32
    %c0_i32_0 = arith.constant 0 : i32
    %c0_i32_1 = arith.constant 0 : i32
    return %arg1, %c0_i32, %c0_i32_0 : i32, i32, i32
  }
  func.func @transform_10(%arg0: i32, %arg1: i32) -> (i32, i32, i32) {
    %c0_i32 = arith.constant 0 : i32
    %c0_i32_0 = arith.constant 0 : i32
    %c0_i32_1 = arith.constant 0 : i32
    return %arg1, %c0_i32, %c0_i32_0 : i32, i32, i32
  }
  func.func @transform_11(%arg0: i32, %arg1: i32) -> (i32, i32, i32) {
    %c0_i32 = arith.constant 0 : i32
    %c0_i32_0 = arith.constant 0 : i32
    %c0_i32_1 = arith.constant 0 : i32
    return %arg1, %c0_i32, %c0_i32_0 : i32, i32, i32
  }
  func.func @transform_12(%arg0: i32, %arg1: i32) -> (i32, i32, i32) {
    %c0_i32 = arith.constant 0 : i32
    %c0_i32_0 = arith.constant 0 : i32
    %c0_i32_1 = arith.constant 0 : i32
    return %arg1, %c0_i32, %c0_i32_0 : i32, i32, i32
  }
  func.func @transform_13(%arg0: i32, %arg1: i32) -> (i32, i32, i32) {
    %c0_i32 = arith.constant 0 : i32
    %c0_i32_0 = arith.constant 0 : i32
    %c0_i32_1 = arith.constant 0 : i32
    return %arg1, %c0_i32, %c0_i32_0 : i32, i32, i32
  }
  func.func @transform_14(%arg0: i32, %arg1: i32) -> (i32, i32, i32) {
    %c0_i32 = arith.constant 0 : i32
    %c0_i32_0 = arith.constant 0 : i32
    %c0_i32_1 = arith.constant 0 : i32
    return %arg1, %c0_i32, %c0_i32_0 : i32, i32, i32
  }
  func.func @transform_15(%arg0: i32, %arg1: i32) -> (i32, i32, i32) {
    %c0_i32 = arith.constant 0 : i32
    %c0_i32_0 = arith.constant 0 : i32
    %c0_i32_1 = arith.constant 0 : i32
    return %arg1, %c0_i32, %c0_i32_0 : i32, i32, i32
  }
  func.func @transform_16(%arg0: i32, %arg1: i32) -> (i32, i32, i32) {
    %c0_i32 = arith.constant 0 : i32
    %c0_i32_0 = arith.constant 0 : i32
    %c0_i32_1 = arith.constant 0 : i32
    return %arg1, %c0_i32, %c0_i32_0 : i32, i32, i32
  }
  func.func @transform_17(%arg0: i32, %arg1: i32) -> (i32, i32, i32) {
    %c0_i32 = arith.constant 0 : i32
    %c0_i32_0 = arith.constant 0 : i32
    %c0_i32_1 = arith.constant 0 : i32
    return %arg1, %c0_i32, %c0_i32_0 : i32, i32, i32
  }
  func.func @transform_18(%arg0: i32, %arg1: i32) -> (i32, i32, i32) {
    %c0_i32 = arith.constant 0 : i32
    %c0_i32_0 = arith.constant 0 : i32
    %c0_i32_1 = arith.constant 0 : i32
    return %arg1, %c0_i32, %c0_i32_0 : i32, i32, i32
  }
  func.func @transform_19(%arg0: i32, %arg1: i32) -> (i32, i32, i32) {
    %c0_i32 = arith.constant 0 : i32
    %c0_i32_0 = arith.constant 0 : i32
    %c0_i32_1 = arith.constant 0 : i32
    return %arg1, %c0_i32, %c0_i32_0 : i32, i32, i32
  }
  func.func @transform_20(%arg0: i32, %arg1: i32) -> (i32, i32) {
    %c0_i32 = arith.constant 0 : i32
    %c0_i32_0 = arith.constant 0 : i32
    %c0_i32_1 = arith.constant 0 : i32
    return %c0_i32, %c0_i32_0 : i32, i32
  }
  func.func @transform_21(%arg0: i32, %arg1: i32) -> (i32, i32) {
    %c0_i32 = arith.constant 0 : i32
    %c0_i32_0 = arith.constant 0 : i32
    %c0_i32_1 = arith.constant 0 : i32
    return %c0_i32, %c0_i32_0 : i32, i32
  }
  func.func @transform_22(%arg0: i32, %arg1: i32) -> (i32, i32, i32) {
    %c0_i32 = arith.constant 0 : i32
    %c0_i32_0 = arith.constant 0 : i32
    %c0_i32_1 = arith.constant 0 : i32
    return %arg0, %c0_i32, %c0_i32_0 : i32, i32, i32
  }
}

</mosaic_0001>

<bundles_post_ra>
// kernel: tpu_custom_call.1
= control target key start
LH: loop header
LB: loop body
LE: loop exit
PB: predicated region body
PF: predicated region fallthrough
CT: control target
= control target key end

     0   :  { %s6447_s0 = inlined_call_operand.vmem [shape: f32[4,16,8], index: 0, kind: input, shape index: {}]   ;;  %s6448_s1 = inlined_call_operand.vmem [shape: f32[4,8,8], index: 1, kind: input, shape index: {}]   ;;  %s6449_s2 = inlined_call_operand.vmem [shape: bf16[8,32], index: 2, kind: input, shape index: {}]   ;;  %s6450_s3 = inlined_call_operand.vmem [shape: f32[1,32], index: 3, kind: input, shape index: {}]   ;;  %s6451_s4 = inlined_call_operand.vmem [shape: bf16[8,32], index: 4, kind: input, shape index: {}]   ;;  %s6452_s5 = inlined_call_operand.vmem [shape: f32[1,32], index: 5, kind: input, shape index: {}]   ;;  %s6453_s6 = inlined_call_operand.vmem [shape: bf16[2,32,32], index: 6, kind: input, shape index: {}]   ;;  %s6454_s7 = inlined_call_operand.vmem [shape: f32[2,1,32], index: 7, kind: input, shape index: {}]   ;;  %s6455_s8 = inlined_call_operand.vmem [shape: bf16[2,32,64], index: 8, kind: input, shape index: {}]   ;;  %s6456_s9 = inlined_call_operand.vmem [shape: f32[2,1,64], index: 9, kind: input, shape index: {}]   ;;  %s6457_s10 = inlined_call_operand.vmem [shape: bf16[2,32,32], index: 10, kind: input, shape index: {}]   ;;  %s6458_s11 = inlined_call_operand.vmem [shape: f32[2,1,32], index: 11, kind: input, shape index: {}]   ;;  %s6459_s12 = inlined_call_operand.vmem [shape: bf16[2,32,128], index: 12, kind: input, shape index: {}]   ;;  %s6460_s13 = inlined_call_operand.vmem [shape: f32[2,1,128], index: 13, kind: input, shape index: {}]   ;;  %s6461_s14 = inlined_call_operand.vmem [shape: bf16[2,128,32], index: 14, kind: input, shape index: {}]   ;;  %s6462_s15 = inlined_call_operand.vmem [shape: f32[2,1,32], index: 15, kind: input, shape index: {}]   ;;  %s6463_s16 = inlined_call_operand.vmem [shape: f32[2,1,32], index: 16, kind: input, shape index: {}]   ;;  %s6464_s17 = inlined_call_operand.vmem [shape: f32[2,1,32], index: 17, kind: input, shape index: {}]   ;;  %s6465_s18 = inlined_call_operand.vmem [shape: f32[2,1,32], index: 18, kind: input, shape index: {}]   ;;  %s6466_s19 = inlined_call_operand.vmem [shape: f32[2,1,32], index: 19, kind: input, shape index: {}]   ;;  %s6467_s20 = inlined_call_operand.vmem [shape: bf16[32,128], index: 20, kind: input, shape index: {}]   ;;  %s6468_s21 = inlined_call_operand.vmem [shape: f32[1,128], index: 21, kind: input, shape index: {}]   ;;  %s6469_s22 = inlined_call_operand.hbm [shape: bf16[4,16,128], index: 22, kind: output, shape index: {}]  }
   0x1   :  { %6476 = sst [smem:[#allocation11_spill]] %s6447_s0 }
   0x2   :  { %6477 = sst [smem:[#allocation12_spill]] %s6448_s1 }
   0x3   :  { %6478 = sst [smem:[#allocation13_spill]] %s6449_s2 }
   0x4   :  { %6479 = sst [smem:[#allocation14_spill]] %s6450_s3 }
   0x5   :  { %6480 = sst [smem:[#allocation15_spill]] %s6451_s4 }
   0x6   :  { %6481 = sst [smem:[#allocation16_spill]] %s6452_s5 }
   0x7   :  { %6482 = sst [smem:[#allocation17_spill]] %s6453_s6 }
   0x8   :  { %6483 = sst [smem:[#allocation18_spill]] %s6455_s8 }
   0x9   :  { %6484 = sst [smem:[#allocation19_spill]] %s6457_s10 }
   0xa   :  { %6485 = sst [smem:[#allocation20_spill]] %s6459_s12 }
   0xb   :  { %6486 = sst [smem:[#allocation21_spill]] %s6460_s13 }
   0xc   :  { %6487 = sst [smem:[#allocation22_spill]] %s6467_s20 }
   0xd   :  { %6488 = sst [smem:[#allocation23_spill]] %s6468_s21 }
   0xe   :  { %6489 = sst [smem:[#allocation24_spill]] %s6469_s22 }
   0xf   :  { %27 = vsyncpa [#allocation5], 0  ;;  %s5517_s3 = smov 0   ;;  %s5519_s28 = smov 0  }
  0x10   :  { %s5521_s29 = smov 0  }
  0x11 LB: > { %6490 = sst [smem:[#allocation7_spill]] %s5377_s3  ;;  %s42_s4 = sadd.s32 1, %s5381_s28  ;;  %s5385_s29 = sphi %s5521_s29, %s33_s29   ;;  %s5381_s28 = sphi %s5519_s28, %s6523_s28   ;;  %s5377_s3 = sphi %s5517_s3, %s6522_s3  }
  0x12   : > { %6491 = sst [smem:[#allocation8_spill]] %s5381_s28  ;;  %p43_p0 = scmp.ge.s32.totalorder %s42_s4, 2 }
  0x13   : > { %6492 = sst [smem:[#allocation9_spill]] %s5385_s29  ;;  %p4479_p1 = scmp.ge.s32.totalorder %s5385_s29, 1 }
  0x14   : > { %p760_p2 = scmp.lt.s32.totalorder %s5385_s29, 3  ;;  %s6525_s4 = smov (%p43_p0, %s42_s4), 0 }
  0x15   : > { %6493 = sst [smem:[#allocation10_spill]] %s6525_s4 }
  0x16   : > { %p761_p3 = pnand %p4479_p1, %p760_p2 }
  0x17   : > { %p888_p4 = scmp.lt.s32.totalorder (!%p761_p3), %s5377_s3, 1  ;;  %s6494_s26 = sld [smem:[#allocation17_spill]] (!%p761_p3) }
  0x18   : > { %764 = sbr.rel (%p761_p3) target bundleno = 4596 (0x11f4), region = 108  ;;  %s6495_s8 = sld [smem:[#allocation18_spill]] (!%p761_p3) }
  0x19   : > { %s6496_s10 = sld [smem:[#allocation19_spill]] (!%p761_p3) }
  0x1a   : > { %s6497_s12 = sld [smem:[#allocation20_spill]] (!%p761_p3) }
  0x1b   : > { %s6499_s28 = sld [smem:[#allocation7_spill]] (!%p761_p3) }
  0x1d   : > { %s5540_s0 = scalar_select %p888_p4, %s5377_s3, 1 }
  0x1f   : > { %s4596_s23 = sshll.u32 %s5540_s0, 4  ;;  %s4600_s22 = sshll.u32 %s5540_s0, 6 }
  0x20   : > { %s5550_s2 = scalar_lea.vmem %s6494_s26, %s4596_s23  ;;  %s5555_s4 = scalar_lea.vmem %s6495_s8, %s4596_s23 }
  0x21   : > { %s5564_s3 = scalar_lea.vmem %s6496_s10, %s4596_s23  ;;  %s5573_s24 = scalar_lea.vmem %s6497_s12, %s4596_s23 }
  0x22   : > { %s5583_s20 = scalar_lea.vmem %s6461_s14, %s4600_s22  ;;  %s930_s25 = scalar_lea.vmem %s6463_s16, %s5540_s0 }
  0x23   : > { %s936_s8 = scalar_lea.vmem %s6465_s18, %s5540_s0  ;;  %s939_s22 = scalar_lea.vmem %s6466_s19, %s5540_s0 }
  0x24   : > { %p4490_p5 = scmp.ne.s32.totalorder %s6499_s28, 0 }
  0x25   : > { %s6500_s1 = sld [smem:[#allocation13_spill]] (!%p4490_p5) }
  0x26   : > { %945 = sbr.rel (%p4490_p5) target bundleno = 259 (0x103), region = 112  ;;  %s6501_s23 = sld [smem:[#allocation15_spill]] (!%p4490_p5) }
  0x27   : > { %s6502_s30 = sld [smem:[#allocation11_spill]] (!%p4490_p5) }
  0x28   : > { %s6503_s28 = sld [smem:[#allocation12_spill]] (!%p4490_p5) }
  0x29   : > { %s6506_s6 = sld [smem:[#allocation16_spill]] (!%p4490_p5) }
  0x2b   : > { %v962_v0 = vld [vmem:[%s6500_s1] sm:$0xf]  ;;  %vm983_vm0 = vcmask 1043456   ;;  %vm970_vm1 = vcmask 64512   ;;  %s6505_s1 = sld [smem:[#allocation14_spill]]  ;;  %vm1120_vm2 = vcmask 261120  }
  0x2c   : > { %v1054_v1 = vld [vmem:[%s6501_s23] sm:$0xf]  ;;  %5040 = vmatprep.subr.msk.bf16.mxu0 %vm983_vm0, %v962_v0  ;;  %v985_v3 = vsel %vm983_vm0, %v962_v0, 0  ;;  %vm1145_vm3 = vcmask 257024  }
  0x2d   : > { %v946_v2 = vld [vmem:[%s6502_s30] sm:$0xff]  ;;  %5041 = vmatprep.subr.msk.bf16.mxu1 %vm983_vm0, %v1054_v1  ;;  %v1069_v4 = vsel %vm983_vm0, %v1054_v1, 0  ;;  %v947_v5 = vld [vmem:[%s6502_s30 + $0x8] sm:$0xff]  ;;  %4749 = vmatpush3.bf16.msra.mxu0 %v985_v3  ;;  %v948_v10 = vld [vmem:[%s6502_s30 + $0x10] sm:$0xff] }
  0x2e   : > { %s6504_s10 = smov %s6503_s28  ;;  %v954_v6 = vld [vmem:[%s6503_s28] sm:$0xff]  ;;  %4759 = vmatpush3.bf16.msra.mxu1 %v1069_v4  ;;  %v958_v8 = vpack.c.bf16 %v947_v5, %v946_v2  ;;  %v949_v11 = vld [vmem:[%s6502_s30 + $0x18] sm:$0xff]  ;;  %v951_v16 = vld [vmem:[%s6502_s30 + $0x28] sm:$0xff] }
  0x2f   : > { %v955_v7 = vld [vmem:[%s6504_s10 + $0x8] sm:$0xff]  ;;  %v956_v12 = vld [vmem:[%s6504_s10 + $0x10] sm:$0xff]  ;;  %v959_v13 = vpack.c.bf16 %v949_v11, %v948_v10  ;;  %v957_v14 = vld [vmem:[%s6504_s10 + $0x18] sm:$0xff] }
  0x30   : > { %v1052_v9 = vpack.c.bf16 %v955_v7, %v954_v6  ;;  %v950_v15 = vld [vmem:[%s6502_s30 + $0x20] sm:$0xff]  ;;  %4750 = vmatprep.mubr.msk.bf16.mxu0 %vm970_vm1, %v958_v8  ;;  %v1053_v17 = vpack.c.bf16 %v957_v14, %v956_v12  ;;  %v952_v19 = vld [vmem:[%s6502_s30 + $0x30] sm:$0xff]  ;;  %v953_v20 = vld [vmem:[%s6502_s30 + $0x38] sm:$0xff] }
  0x31   : > { %v960_v18 = vpack.c.bf16 %v951_v16, %v950_v15  ;;  %4751 = vmatmul.mubr.msk.bf16.vlgmr.msra.gmra.mxu0 %vm970_vm1, %v959_v13  ;;  %v961_v21 = vpack.c.bf16 %v953_v20, %v952_v19  ;;  %v4491_v22 = vld [vmem:[%s6505_s1] ss:$0 sm:$0xff] }
  0x32   : > { %4760 = vmatprep.mubr.msk.bf16.mxu1 %vm970_vm1, %v1052_v9  ;;  %v4496_v23 = vld [vmem:[%s6506_s6] ss:$0 sm:$0xff] }
  0x33   : > { %4761 = vmatmul.mubr.msk.bf16.vlgmr.msra.gmra.mxu1 %vm970_vm1, %v1053_v17  ;;  %4754 = vmatprep.mubr.msk.bf16.mxu0 %vm970_vm1, %v960_v18 }
  0x39   : > { %4755 = vmatmul.mubr.msk.bf16.gmra.mxu0 %vm970_vm1, %v961_v21 }
  0xf1   : > { %v4752_v24 = vpop.f32.mrf.mxu0 }
  0xf2   : > { %v1030_v25 = vadd.f32 %v4752_v24, %v4491_v22 }
  0xf3   : > { %v4762_v26 = vpop.f32.mrf.mxu1  ;;  %v1021_v28 = vpop.f32.mrf.mxu0 }
  0xf4   : > { %v1114_v27 = vadd.f32 %v4762_v26, %v4496_v23  ;;  %1123 = vst.msk [vmem:[#allocation2 + $0x10] sm:$0xff] %vm1120_vm2, %v1030_v25  ;;  %v1022_v29 = vadd.f32 %v4491_v22, %v1021_v28 }
  0xf5   : > { %v1105_v30 = vpop.f32.mrf.mxu1  ;;  %v4753_v33 = vpop.f32.mrf.mxu0 }
  0xf6   : > { %v4603_v31 = vpack.c.bf16 %v1114_v27, %v1114_v27  ;;  %v1106_v32 = vadd.f32 %v4496_v23, %v1105_v30  ;;  %1121 = vst.msk [vmem:[#allocation2] sm:$0xff] %vm1120_vm2, %v1022_v29  ;;  %v1033_v34 = vadd.f32 %v4753_v33, %v4491_v22 }
  0xf7   : > { %v4763_v35 = vpop.f32.mrf.mxu1  ;;  %v1024_v38 = vpop.f32.mrf.mxu0 }
  0xf8   : > { %1148 = vst.msk [vmem:[#allocation3 + $0x8] sm:$0xf] %vm1145_vm3, %v4603_v31  ;;  %v4601_v36 = vpack.c.bf16 %v1106_v32, %v1106_v32  ;;  %v1117_v37 = vadd.f32 %v4763_v35, %v4496_v23  ;;  %v1025_v39 = vadd.f32 %v4491_v22, %v1024_v38 }
  0xf9   : > { %1124 = vst.msk [vmem:[#allocation2 + $0x18] sm:$0xff] %vm1120_vm2, %v1033_v34  ;;  %v1108_v40 = vpop.f32.mrf.mxu1  ;;  %v4756_v43 = vpop.f32.mrf.mxu0 }
  0xfa   : > { %1146 = vst.msk [vmem:[#allocation3] sm:$0xf] %vm1145_vm3, %v4601_v36  ;;  %v4604_v41 = vpack.c.bf16 %v1117_v37, %v1117_v37  ;;  %v1109_v42 = vadd.f32 %v4496_v23, %v1108_v40  ;;  %v1046_v44 = vadd.f32 %v4756_v43, %v4491_v22 }
  0xfb   : > { %1122 = vst.msk [vmem:[#allocation2 + $0x8] sm:$0xff] %vm1120_vm2, %v1025_v39  ;;  %v1037_v46 = vpop.f32.mrf.mxu0 }
  0xfc   : > { %1149 = vst.msk [vmem:[#allocation3 + $0xc] sm:$0xf] %vm1145_vm3, %v4604_v41  ;;  %v4602_v45 = vpack.c.bf16 %v1109_v42, %v1109_v42  ;;  %v1038_v47 = vadd.f32 %v4491_v22, %v1037_v46 }
  0xfd   : > { %1127 = vst.msk [vmem:[#allocation2 + $0x30] sm:$0xff] %vm1120_vm2, %v1046_v44  ;;  %v4757_v48 = vpop.f32.mrf.mxu0 }
  0xfe   : > { %1147 = vst.msk [vmem:[#allocation3 + $0x4] sm:$0xf] %vm1145_vm3, %v4602_v45  ;;  %v1049_v49 = vadd.f32 %v4757_v48, %v4491_v22 }
  0xff   : > { %1125 = vst.msk [vmem:[#allocation2 + $0x20] sm:$0xff] %vm1120_vm2, %v1038_v47  ;;  %v1040_v50 = vpop.f32.mrf.mxu0 }
 0x100   : > { %1128 = vst.msk [vmem:[#allocation2 + $0x38] sm:$0xff] %vm1120_vm2, %v1049_v49  ;;  %v1041_v51 = vadd.f32 %v4491_v22, %v1040_v50 }
 0x102   : > { %1126 = vst.msk [vmem:[#allocation2 + $0x28] sm:$0xff] %vm1120_vm2, %v1041_v51 }
 0x103 PF: > { %v5147_v52 = vld [vmem:[%s5550_s2 + $0x8] sm:$0xff]   ;;  %v5148_v53 = vld [vmem:[%s5550_s2] sm:$0xff]   ;;  %vm1189_vm4 = vcmask 261120   ;;  %v1152_v56 = vld [vmem:[#allocation2 + $0x10] sm:$0xff]  ;;  %v5387_v6 = vmov 0.0   ;;  %vm5388_vm5 = vmmov 0   ;;  %s6507_s12 = scalar_lea.vmem %s6456_s9, %s5540_s0  ;;  %s6508_s26 = scalar_lea.vmem %s6454_s7, %s5540_s0 }
 0x104   : > { %4764 = vmatprep.subr.bf16.mxu0 %v5147_v52  ;;  %v1150_v54 = vld [vmem:[#allocation2] sm:$0xff]  ;;  %v1151_v55 = vld [vmem:[#allocation2 + $0x8] sm:$0xff]  ;;  %v1153_v58 = vld [vmem:[#allocation2 + $0x18] sm:$0xff]  ;;  %4784 = vmatprep.subr.bf16.mxu1 %v5387_v6  ;;  %vm1363_vm6 = vcmask 64512   ;;  %s5389_s13 = smov 96   ;;  %vm1650_vm7 = vcmask 1043456   ;;  %s6509_s23 = scalar_lea.vmem %s6458_s11, %s5540_s0 }
 0x105   : > { %4765 = vmatpush3.bf16.msra.mxu0 %v5147_v52  ;;  %v1162_v57 = vpack.c.bf16 %v1151_v55, %v1150_v54  ;;  %v5149_v59 = vld [vmem:[%s5555_s4 + $0x8] sm:$0xff]   ;;  %v1163_v62 = vpack.c.bf16 %v1153_v58, %v1152_v56  ;;  %v5150_v0 = vld [vmem:[%s5555_s4] sm:$0xff]   ;;  %v1156_v1 = vld [vmem:[#allocation2 + $0x30] sm:$0xff]  ;;  %4786 = vmatprep.mubr.msk.bf16.mxu1 %vm5388_vm5, %v5387_v6  ;;  %s5390_s27 = smov 120   ;;  %s5391_s29 = smov 88   ;;  %vm3429_vm8 = vcmask 130048  }
 0x106   : > { %4766 = vmatprep.subr.bf16.mxu0 %v5148_v53  ;;  %v1154_v60 = vld [vmem:[#allocation2 + $0x20] sm:$0xff]  ;;  %v5152_v5 = vld [vmem:[#allocation3 + $0x8] sm:$0xff]   ;;  %s5392_s1 = smov 112   ;;  %s5393_s28 = smov 80   ;;  %vm3438_vm9 = vcmask 195584  }
 0x107   : > { %4768 = vmatprep.mubr.msk.bf16.mxu0 %vm1189_vm4, %v1162_v57  ;;  %v1157_v2 = vld [vmem:[#allocation2 + $0x38] sm:$0xff]  ;;  %v5151_v3 = vld [vmem:[#allocation3] sm:$0xff]   ;;  %s5394_s21 = smov 104   ;;  %s5395_s6 = smov 72  }
 0x108   : > { %v1165_v4 = vpack.c.bf16 %v1157_v2, %v1156_v1  ;;  %v4510_v16 = vld [vmem:[%s6507_s12] ss:$0 sm:$0xff]  ;;  %s5396_s4 = smov 8   ;;  %s5397_s2 = smov 16  }
 0x109   : > { %v1155_v61 = vld [vmem:[#allocation2 + $0x28] sm:$0xff]  ;;  %4767 = vmatpush3.bf16.msra.mxu0 %v5148_v53  ;;  %v4503_v25 = vld [vmem:[%s6508_s26] ss:$0 sm:$0xff]  ;;  %s5398_s12 = smov 24  }
 0x10a   : > { %v1164_v63 = vpack.c.bf16 %v1155_v61, %v1154_v60  ;;  %4776 = vmatprep.subr.bf16.mxu0 %v5149_v59 }
 0x10c   : > { %4769 = vmatmul.mubr.msk.bf16.vlgmr.msra.gmra.mxu0 %vm1189_vm4, %v1163_v62 }
 0x10d   : > { %4777 = vmatpush3.bf16.msra.mxu0 %v5149_v59  ;;  %4772 = vmatprep.mubr.msk.bf16.mxu0 %vm1189_vm4, %v1164_v63 }
 0x10e   : > { %4778 = vmatprep.subr.bf16.mxu0 %v5150_v0 }
 0x111   : > { %4779 = vmatpush3.bf16.msra.mxu0 %v5150_v0 }
 0x112   : > { %4790 = vmatprep.subr.bf16.mxu0 %v5387_v6 }
 0x114   : > { %4773 = vmatmul.mubr.msk.bf16.gmra.mxu0 %vm1189_vm4, %v1165_v4 }
 0x115   : > { %4780 = vmatprep.mubr.msk.bf16.mxu0 %vm1189_vm4, %v5151_v3 }
 0x11c   : > { %4781 = vmatmul.mubr.msk.bf16.vlgmr.msra.gmra.mxu0 %vm1189_vm4, %v5152_v5 }
 0x11d   : > { %4792 = vmatprep.mubr.msk.bf16.mxu0 %vm5388_vm5, %v5387_v6 }
 0x1cc   : > { %v4770_v7 = vpop.f32.mrf.mxu0 }
 0x1cd   : > { %v1245_v34 = vadd.f32 %v4770_v7, %v4503_v25 }
 0x1ce   : > { %v1236_v8 = vpop.f32.mrf.mxu0 }
 0x1cf   : > { %v1237_v28 = vadd.f32 %v4503_v25, %v1236_v8 }
 0x1d0   : > { %v4771_v9 = vpop.f32.mrf.mxu0 }
 0x1d1   : > { %v1248_v32 = vadd.f32 %v4771_v9, %v4503_v25 }
 0x1d2   : > { %v1239_v10 = vpop.f32.mrf.mxu0 }
 0x1d3   : > { %v1240_v26 = vadd.f32 %v4503_v25, %v1239_v10  ;;  %v5720_v37 = vpack.c.bf16 %v1248_v32, %v1245_v34 }
 0x1d4   : > { %v4774_v11 = vpop.f32.mrf.mxu0 }
 0x1d5   : > { %v5709_v33 = vpack.c.bf16 %v1240_v26, %v1237_v28  ;;  %v1261_v43 = vadd.f32 %v4774_v11, %v4503_v25 }
 0x1d6   : > { %v1252_v12 = vpop.f32.mrf.mxu0 }
 0x1d7   : > { %v1253_v39 = vadd.f32 %v4503_v25, %v1252_v12 }
 0x1d8   : > { %v4775_v13 = vpop.f32.mrf.mxu0 }
 0x1d9   : > { %v1264_v41 = vadd.f32 %v4775_v13, %v4503_v25 }
 0x1da   : > { %v1255_v14 = vpop.f32.mrf.mxu0 }
 0x1db   : > { %v1256_v38 = vadd.f32 %v4503_v25, %v1255_v14  ;;  %v5736_v44 = vpack.c.bf16 %v1264_v41, %v1261_v43 }
 0x1dc   : > { %v4782_v15 = vpop.f32.mrf.mxu0 }
 0x1dd   : > { %v1349_v22 = vadd.f32 %v4782_v15, %v4510_v16  ;;  %v5729_v42 = vpack.c.bf16 %v1256_v38, %v1253_v39 }
 0x1de   : > { %v1340_v17 = vpop.f32.mrf.mxu0 }
 0x1df   : > { %v1341_v18 = vadd.f32 %v4510_v16, %v1340_v17  ;;  %v5705_v29 = vpack.c.bf16 %v1349_v22, %v1349_v22 }
 0x1e0   : > { %v4783_v19 = vpop.f32.mrf.mxu0 }
 0x1e1   : > { %v5693_v20 = vpack.c.bf16 %v1341_v18, %v1341_v18  ;;  %v1352_v30 = vadd.f32 %v4783_v19, %v4510_v16  ;;  %v1462_v36 = vsel %vm1363_vm6, %v5705_v29, 0 }
 0x1e2   : > { %v1343_v21 = vpop.f32.mrf.mxu0 }
 0x1e3   : > { %v1344_v23 = vadd.f32 %v4510_v16, %v1343_v21  ;;  %v1368_v24 = vsel %vm1363_vm6, %v5693_v20, 0  ;;  %v5712_v35 = vpack.c.bf16 %v1352_v30, %v1352_v30 }
 0x1e4   : > { %4785 = vmatpush3.bf16.xpose.msra.mxu1 %v1368_v24 }
 0x1e5   : > { %v5702_v27 = vpack.c.bf16 %v1344_v23, %v1344_v23  ;;  %4796 = vmatprep.subr.bf16.mxu1 %v5387_v6  ;;  %v1509_v40 = vsel %vm1363_vm6, %v5712_v35, 0 }
 0x1e7   : > { %v1415_v31 = vsel %vm1363_vm6, %v5702_v27, 0 }
 0x1e8   : > { %4791 = vmatpush3.bf16.xpose.msra.mxu0 %v1415_v31 }
 0x1e9   : > { %4802 = vmatprep.subr.bf16.mxu0 %v5387_v6 }
 0x1eb   : > { %4787 = vmatmul.mubr.msk.bf16.vlgmr.msra.gmra.mxu1 %vm1363_vm6, %v5709_v33 }
 0x1ec   : > { %4797 = vmatpush3.bf16.xpose.msra.mxu1 %v1462_v36  ;;  %4798 = vmatprep.mubr.msk.bf16.mxu1 %vm5388_vm5, %v5387_v6 }
 0x1ed   : > { %4808 = vmatprep.subr.bf16.mxu1 %v5387_v6 }
 0x1ef   : > { %4793 = vmatmul.mubr.msk.bf16.vlgmr.msra.gmra.mxu0 %vm1363_vm6, %v5720_v37 }
 0x1f0   : > { %4803 = vmatpush3.bf16.xpose.msra.mxu0 %v1509_v40  ;;  %4804 = vmatprep.mubr.msk.bf16.mxu0 %vm5388_vm5, %v5387_v6 }
 0x1f1   : > { %4814 = vmatprep.subr.bf16.mxu0 %v5387_v6 }
 0x1f3   : > { %4799 = vmatmul.mubr.msk.bf16.vlgmr.msra.gmra.mxu1 %vm1363_vm6, %v5729_v42 }
 0x1f4   : > { %4810 = vmatprep.mubr.msk.bf16.mxu1 %vm5388_vm5, %v5387_v6 }
 0x1f7   : > { %4805 = vmatmul.mubr.msk.bf16.vlgmr.msra.gmra.mxu0 %vm1363_vm6, %v5736_v44 }
 0x1f8   : > { %4816 = vmatprep.mubr.msk.bf16.mxu0 %vm5388_vm5, %v5387_v6 }
 0x2ab   : > { %v1404_v45 = vpop.f32.mrf.mxu1 }
 0x2ac   : > { %v1552_v46 = vsel %vm1363_vm6, %v1404_v45, -inf }
 0x2ad   : > { %1553 = vmax.xlane.f32.xlu0 %v1552_v46  ;;  %v4788_v47 = vpop.f32.mrf.mxu1 }
 0x2af   : > { %v1407_v48 = vpop.f32.mrf.mxu1  ;;  %v1451_v49 = vpop.f32.mrf.mxu0 }
 0x2b0   : > { %v1558_v50 = vsel %vm1363_vm6, %v1451_v49, -inf  ;;  %v1555_v51 = vsel %vm1363_vm6, %v1407_v48, -inf }
 0x2b1   : > { %1559 = vmax.xlane.f32.xlu1 %v1558_v50  ;;  %v4794_v52 = vpop.f32.mrf.mxu0  ;;  %1556 = vmax.xlane.f32.xlu0 %v1555_v51  ;;  %v4789_v53 = vpop.f32.mrf.mxu1 }
 0x2b3   : > { %v1454_v54 = vpop.f32.mrf.mxu0  ;;  %v1498_v55 = vpop.f32.mrf.mxu1 }
 0x2b4   : > { %v1561_v56 = vsel %vm1363_vm6, %v1454_v54, -inf  ;;  %v1564_v57 = vsel %vm1363_vm6, %v1498_v55, -inf }
 0x2b5   : > { %1562 = vmax.xlane.f32.xlu1 %v1561_v56  ;;  %v4795_v58 = vpop.f32.mrf.mxu0  ;;  %1565 = vmax.xlane.f32.xlu0 %v1564_v57  ;;  %v4800_v59 = vpop.f32.mrf.mxu1 }
 0x2b7   : > { %v1501_v60 = vpop.f32.mrf.mxu1  ;;  %v1545_v61 = vpop.f32.mrf.mxu0 }
 0x2b8   : > { %v1570_v62 = vsel %vm1363_vm6, %v1545_v61, -inf  ;;  %v1567_v63 = vsel %vm1363_vm6, %v1501_v60, -inf }
 0x2b9   : > { %v4806_v0 = vpop.f32.mrf.mxu0  ;;  %1571 = vmax.xlane.f32.xlu0 %v1570_v62  ;;  %1568 = vmax.xlane.f32.xlu1 %v1567_v63  ;;  %v4801_v1 = vpop.f32.mrf.mxu1 }
 0x2bb   : > { %v5749_v2 = vpop.f32.mrf.mxu0 }
 0x2bc   : > { %v1573_v4 = vsel %vm1363_vm6, %v5749_v2, -inf }
 0x2bd   : > { %v4807_v3 = vpop.f32.mrf.mxu0 }
 0x2ca   : > { %1696 = vrot.lane.b32.xlu1 %v5702_v27, %s5389_s13 }
 0x2ce   : > { %1746 = vrot.lane.b32.xlu1 %v5705_v29, %s5389_s13 }
 0x2cf   : > { %1645 = vrot.lane.b32.xlu0 %v5693_v20, %s5389_s13 }
 0x2f2   : > { %1574 = vmax.xlane.f32.xlu1 %v1573_v4 }
 0x303   : > { %1796 = vrot.lane.b32.xlu1 %v5712_v35, %s5389_s13 }
 0x336   : > { %v1554_v5 = vpop.xlane.xlu0 %1553 }
 0x337   : > { %v1576_v7 = vsub.f32 %v1404_v45, %v1554_v5 }
 0x339   : > { %v1584_v8 = vmul.f32 1.442695, %v1576_v7 }
 0x33a   : > { %v1560_v9 = vpop.xlane.xlu1 %1559  ;;  %v1557_v10 = vpop.xlane.xlu0 %1556 }
 0x33b   : > { %5165 = vpow2.f32 %v1584_v8  ;;  %v1578_v11 = vsub.f32 %v1451_v49, %v1560_v9  ;;  %v1577_v12 = vsub.f32 %v1407_v48, %v1557_v10 }
 0x33d   : > { %v1588_v13 = vmul.f32 1.442695, %v1578_v11  ;;  %v1586_v14 = vmul.f32 1.442695, %v1577_v12 }
 0x33e   : > { %v1563_v15 = vpop.xlane.xlu1 %1562  ;;  %v1566_v16 = vpop.xlane.xlu0 %1565 }
 0x33f   : > { %5167 = vpow2.f32 %v1588_v13  ;;  %v1579_v17 = vsub.f32 %v1454_v54, %v1563_v15  ;;  %v1580_v18 = vsub.f32 %v1498_v55, %v1566_v16 }
 0x340   : > { %5169 = vpow2.f32 %v1586_v14 }
 0x341   : > { %v1590_v19 = vmul.f32 1.442695, %v1579_v17  ;;  %v1592_v21 = vmul.f32 1.442695, %v1580_v18 }
 0x342   : > { %v1572_v22 = vpop.xlane.xlu0 %1571  ;;  %v1569_v23 = vpop.xlane.xlu1 %1568 }
 0x343   : > { %5171 = vpow2.f32 %v1590_v19  ;;  %v1582_v24 = vsub.f32 %v1545_v61, %v1572_v22  ;;  %v1581_v25 = vsub.f32 %v1501_v60, %v1569_v23 }
 0x344   : > { %5173 = vpow2.f32 %v1592_v21 }
 0x345   : > { %v1596_v26 = vmul.f32 1.442695, %v1582_v24  ;;  %v1594_v28 = vmul.f32 1.442695, %v1581_v25 }
 0x346   : > { %v1646_v30 = vpop.permute.xlu0 %1645  ;;  %v1697_v31 = vpop.permute.xlu1 %1696 }
 0x347   : > { %5175 = vpow2.f32 %v1596_v26  ;;  %v1652_v32 = vsel %vm1650_vm7, %v1646_v30, 0  ;;  %v1702_v34 = vsel %vm1650_vm7, %v1697_v31, 0 }
 0x348   : > { %v5166_v36 = vpop.eup %5165  ;;  %5177 = vpow2.f32 %v1594_v28  ;;  %4809 = vmatpush3.bf16.msra.mxu1 %v1652_v32  ;;  %4815 = vmatpush3.bf16.msra.mxu0 %v1702_v34 }
 0x349   : > { %v1600_v38 = vsel %vm1363_vm6, %v5166_v36, 0.0  ;;  %4820 = vmatprep.subr.bf16.mxu1 %v5387_v6  ;;  %4826 = vmatprep.subr.bf16.mxu0 %v5387_v6 }
 0x34a   : > { %1601 = vadd.xlane.f32.xlu0 %v1600_v38  ;;  %v1747_v53 = vpop.permute.xlu1 %1746 }
 0x34b   : > { %v1752_v10 = vsel %vm1650_vm7, %v1747_v53, 0 }
 0x34c   : > { %v5168_v39 = vpop.eup %5167 }
 0x34d   : > { %v5170_v40 = vpop.eup %5169  ;;  %v1606_v41 = vsel %vm1363_vm6, %v5168_v39, 0.0 }
 0x34e   : > { %1607 = vadd.xlane.f32.xlu0 %v1606_v41  ;;  %v1603_v43 = vsel %vm1363_vm6, %v5170_v40, 0.0 }
 0x34f   : > { %1604 = vadd.xlane.f32.xlu1 %v1603_v43 }
 0x350   : > { %v5172_v45 = vpop.eup %5171 }
 0x351   : > { %v5174_v46 = vpop.eup %5173  ;;  %v1609_v47 = vsel %vm1363_vm6, %v5172_v45, 0.0 }
 0x352   : > { %v1612_v48 = vsel %vm1363_vm6, %v5174_v46, 0.0 }
 0x353   : > { %1613 = vadd.xlane.f32.xlu0 %v1612_v48  ;;  %1610 = vadd.xlane.f32.xlu1 %v1609_v47 }
 0x354   : > { %v5766_v49 = vpop.eup %5175 }
 0x355   : > { %v5178_v50 = vpop.eup %5177  ;;  %v1618_v51 = vsel %vm1363_vm6, %v5766_v49, 0.0 }
 0x356   : > { %v1615_v52 = vsel %vm1363_vm6, %v5178_v50, 0.0 }
 0x357   : > { %1619 = vadd.xlane.f32.xlu0 %v1618_v51  ;;  %1616 = vadd.xlane.f32.xlu1 %v1615_v52 }
 0x368   : > { %1900 = vrot.lane.b32.xlu1 %v5702_v27, %s5390_s27 }
 0x36d   : > { %1848 = vrot.lane.b32.xlu0 %v5693_v20, %s5390_s27 }
 0x371   : > { %1846 = vrot.lane.b32.xlu0 %v5709_v33, %s5390_s27 }
 0x375   : > { %1898 = vrot.lane.b32.xlu0 %v5720_v37, %s5390_s27 }
 0x379   : > { %1950 = vrot.lane.b32.xlu0 %v5729_v42, %s5390_s27 }
 0x37b   : > { %v1575_v54 = vpop.xlane.xlu1 %1574 }
 0x37c   : > { %v1583_v55 = vsub.f32 %v5749_v2, %v1575_v54 }
 0x37e   : > { %v1598_v56 = vmul.f32 1.442695, %v1583_v55 }
 0x37f   : > { %v1797_v60 = vpop.permute.xlu1 %1796 }
 0x380   : > { %5179 = vpow2.f32 %v1598_v56  ;;  %v1802_v17 = vsel %vm1650_vm7, %v1797_v60, 0 }
 0x38d   : > { %v5777_v57 = vpop.eup %5179 }
 0x38e   : > { %v1621_v58 = vsel %vm1363_vm6, %v5777_v57, 0.0 }
 0x38f   : > { %1622 = vadd.xlane.f32.xlu1 %v1621_v58 }
 0x3a0   : > { %1952 = vrot.lane.b32.xlu1 %v5705_v29, %s5390_s27 }
 0x3a4   : > { %2004 = vrot.lane.b32.xlu1 %v5712_v35, %s5390_s27 }
 0x3a8   : > { %2002 = vrot.lane.b32.xlu1 %v5736_v44, %s5390_s27 }
 0x3d3   : > { %v1602_v59 = vpop.xlane.xlu0 %1601 }
 0x3d4   : > { %5181 = vrcp.f32 %v1602_v59 }
 0x3d7   : > { %v1608_v61 = vpop.xlane.xlu0 %1607 }
 0x3d8   : > { %v1605_v62 = vpop.xlane.xlu1 %1604 }
 0x3d9   : > { %5183 = vrcp.f32 %v1605_v62 }
 0x3da   : > { %5185 = vrcp.f32 %v1608_v61 }
 0x3dc   : > { %v1611_v63 = vpop.xlane.xlu1 %1610  ;;  %v1614_v0 = vpop.xlane.xlu0 %1613 }
 0x3dd   : > { %5187 = vrcp.f32 %v1611_v63 }
 0x3de   : > { %5189 = vrcp.f32 %v1614_v0 }
 0x3e0   : > { %v1617_v1 = vpop.xlane.xlu1 %1616  ;;  %v1620_v11 = vpop.xlane.xlu0 %1619 }
 0x3e1   : > { %5191 = vrcp.f32 %v1617_v1  ;;  %v5182_v2 = vpop.eup %5181 }
 0x3e2   : > { %v1632_v4 = vmul.f32 %v5182_v2, %v5166_v36  ;;  %5193 = vrcp.f32 %v1620_v11 }
 0x3e4   : > { %v1849_v21 = vpop.permute.xlu0 %1848  ;;  %v1901_v25 = vpop.permute.xlu1 %1900 }
 0x3e5   : > { %v1854_v23 = vsel %vm1363_vm6, %v1849_v21, 0  ;;  %v1906_v41 = vsel %vm1363_vm6, %v1901_v25, 0 }
 0x3e6   : > { %v5184_v3 = vpop.eup %5183 }
 0x3e7   : > { %v1633_v5 = vmul.f32 %v5184_v3, %v5170_v40  ;;  %v5186_v7 = vpop.eup %5185 }
 0x3e8   : > { %v1634_v12 = vmul.f32 %v5186_v7, %v5168_v39  ;;  %v1847_v24 = vpop.permute.xlu0 %1846 }
 0x3e9   : > { %v1640_v8 = vpack.c.bf16 %v1633_v5, %v1632_v4 }
 0x3ea   : > { %v5188_v9 = vpop.eup %5187 }
 0x3eb   : > { %4811 = vmatmul.mubr.msk.bf16.vlgmr.msra.gmra.mxu1 %vm1363_vm6, %v1640_v8  ;;  %v1635_v13 = vmul.f32 %v5188_v9, %v5172_v45  ;;  %v5190_v14 = vpop.eup %5189 }
 0x3ec   : > { %4821 = vmatpush3.bf16.msra.mxu1 %v1752_v10  ;;  %4822 = vmatprep.mubr.msk.bf16.mxu1 %vm5388_vm5, %v5387_v6  ;;  %v1636_v18 = vmul.f32 %v5190_v14, %v5174_v46  ;;  %v1899_v31 = vpop.permute.xlu0 %1898 }
 0x3ed   : > { %4832 = vmatprep.subr.bf16.mxu1 %v5387_v6  ;;  %v1641_v15 = vpack.c.bf16 %v1635_v13, %v1634_v12 }
 0x3ee   : > { %v5192_v16 = vpop.eup %5191 }
 0x3ef   : > { %4817 = vmatmul.mubr.msk.bf16.vlgmr.msra.gmra.mxu0 %vm1363_vm6, %v1641_v15  ;;  %v1637_v19 = vmul.f32 %v5192_v16, %v5178_v50  ;;  %v5194_v32 = vpop.eup %5193 }
 0x3f0   : > { %4827 = vmatpush3.bf16.msra.mxu0 %v1802_v17  ;;  %4828 = vmatprep.mubr.msk.bf16.mxu0 %vm5388_vm5, %v5387_v6  ;;  %v1951_v34 = vpop.permute.xlu0 %1950  ;;  %v1638_v38 = vmul.f32 %v5194_v32, %v5766_v49 }
 0x3f1   : > { %v1642_v22 = vpack.c.bf16 %v1637_v19, %v1636_v18  ;;  %4838 = vmatprep.subr.bf16.mxu0 %v5387_v6 }
 0x3f3   : > { %4823 = vmatmul.mubr.msk.bf16.vlgmr.msra.gmra.mxu1 %vm1363_vm6, %v1642_v22 }
 0x3f4   : > { %4833 = vmatpush3.bf16.xpose.msra.mxu1 %v1854_v23  ;;  %4834 = vmatprep.mubr.msk.bf16.mxu1 %vm5388_vm5, %v5387_v6 }
 0x3f5   : > { %4844 = vmatprep.subr.bf16.mxu1 %v5387_v6 }
 0x3fb   : > { %4835 = vmatmul.mubr.msk.bf16.vlgmr.msra.gmra.mxu1 %vm1363_vm6, %v1847_v24 }
 0x3fc   : > { %4846 = vmatprep.mubr.msk.bf16.mxu1 %vm5388_vm5, %v5387_v6 }
 0x418   : > { %v1623_v26 = vpop.xlane.xlu1 %1622 }
 0x419   : > { %5195 = vrcp.f32 %v1623_v26 }
 0x41c   : > { %v1953_v28 = vpop.permute.xlu1 %1952 }
 0x41d   : > { %v1958_v30 = vsel %vm1363_vm6, %v1953_v28, 0 }
 0x41e   : > { %4845 = vmatpush3.bf16.xpose.msra.mxu1 %v1958_v30 }
 0x41f   : > { %4856 = vmatprep.subr.bf16.mxu1 %v5387_v6 }
 0x420   : > { %v2005_v43 = vpop.permute.xlu1 %2004 }
 0x421   : > { %v2010_v45 = vsel %vm1363_vm6, %v2005_v43, 0 }
 0x424   : > { %v2003_v46 = vpop.permute.xlu1 %2002 }
 0x425   : > { %4847 = vmatmul.mubr.msk.bf16.vlgmr.msra.gmra.mxu1 %vm1363_vm6, %v1951_v34 }
 0x426   : > { %v5196_v36 = vpop.eup %5195  ;;  %4858 = vmatprep.mubr.msk.bf16.mxu1 %vm5388_vm5, %v5387_v6 }
 0x427   : > { %v1639_v39 = vmul.f32 %v5196_v36, %v5777_v57 }
 0x429   : > { %v1643_v40 = vpack.c.bf16 %v1639_v39, %v1638_v38 }
 0x42b   : > { %4829 = vmatmul.mubr.msk.bf16.vlgmr.msra.gmra.mxu0 %vm1363_vm6, %v1643_v40 }
 0x42c   : > { %4839 = vmatpush3.bf16.xpose.msra.mxu0 %v1906_v41  ;;  %4840 = vmatprep.mubr.msk.bf16.mxu0 %vm5388_vm5, %v5387_v6 }
 0x42d   : > { %4850 = vmatprep.subr.bf16.mxu0 %v5387_v6 }
 0x433   : > { %4841 = vmatmul.mubr.msk.bf16.vlgmr.msra.gmra.mxu0 %vm1363_vm6, %v1899_v31 }
 0x434   : > { %4851 = vmatpush3.bf16.xpose.msra.mxu0 %v2010_v45  ;;  %4852 = vmatprep.mubr.msk.bf16.mxu0 %vm5388_vm5, %v5387_v6 }
 0x435   : > { %4862 = vmatprep.subr.bf16.mxu0 %v5387_v6 }
 0x43b   : > { %4853 = vmatmul.mubr.msk.bf16.vlgmr.msra.gmra.mxu0 %vm1363_vm6, %v2003_v46 }
 0x43c   : > { %4864 = vmatprep.mubr.msk.bf16.mxu0 %vm5388_vm5, %v5387_v6 }
 0x4ab   : > { %v5822_v47 = vpop.f32.mrf.mxu1 }
 0x4ad   : > { %v4812_v48 = vpop.f32.mrf.mxu1 }
 0x4af   : > { %v5824_v49 = vpop.f32.mrf.mxu1  ;;  %v5826_v50 = vpop.f32.mrf.mxu0 }
 0x4b1   : > { %v4813_v51 = vpop.f32.mrf.mxu1  ;;  %v4818_v52 = vpop.f32.mrf.mxu0 }
 0x4b3   : > { %v5828_v53 = vpop.f32.mrf.mxu0  ;;  %v5830_v54 = vpop.f32.mrf.mxu1 }
 0x4b5   : > { %v4819_v55 = vpop.f32.mrf.mxu0  ;;  %v4824_v56 = vpop.f32.mrf.mxu1 }
 0x4b7   : > { %v5832_v57 = vpop.f32.mrf.mxu1 }
 0x4b9   : > { %v4825_v58 = vpop.f32.mrf.mxu1 }
 0x4bb   : > { %v1890_v59 = vpop.f32.mrf.mxu1 }
 0x4bc   : > { %v2053_v60 = vsel %vm1363_vm6, %v1890_v59, -inf }
 0x4bd   : > { %2054 = vmax.xlane.f32.xlu0 %v2053_v60  ;;  %v4836_v61 = vpop.f32.mrf.mxu1 }
 0x4bf   : > { %v1893_v62 = vpop.f32.mrf.mxu1 }
 0x4c0   : > { %v2056_v63 = vsel %vm1363_vm6, %v1893_v62, -inf }
 0x4c1   : > { %2057 = vmax.xlane.f32.xlu1 %v2056_v63  ;;  %v4837_v0 = vpop.f32.mrf.mxu1 }
 0x4e5   : > { %v5836_v1 = vpop.f32.mrf.mxu1 }
 0x4e6   : > { %v2065_v18 = vsel %vm1363_vm6, %v5836_v1, -inf }
 0x4e7   : > { %v4848_v2 = vpop.f32.mrf.mxu1 }
 0x4e9   : > { %v1997_v3 = vpop.f32.mrf.mxu1 }
 0x4ea   : > { %v2068_v4 = vsel %vm1363_vm6, %v1997_v3, -inf }
 0x4eb   : > { %v5839_v5 = vpop.f32.mrf.mxu0  ;;  %2069 = vmax.xlane.f32.xlu1 %v2068_v4  ;;  %v4849_v7 = vpop.f32.mrf.mxu1 }
 0x4ed   : > { %v4830_v8 = vpop.f32.mrf.mxu0 }
 0x4ef   : > { %v5841_v9 = vpop.f32.mrf.mxu0 }
 0x4f1   : > { %v4831_v10 = vpop.f32.mrf.mxu0 }
 0x4f3   : > { %v1942_v11 = vpop.f32.mrf.mxu0 }
 0x4f4   : > { %v2059_v12 = vsel %vm1363_vm6, %v1942_v11, -inf }
 0x4f5   : > { %v4842_v13 = vpop.f32.mrf.mxu0  ;;  %2060 = vmax.xlane.f32.xlu0 %v2059_v12 }
 0x4f7   : > { %v1945_v14 = vpop.f32.mrf.mxu0 }
 0x4f8   : > { %v2062_v15 = vsel %vm1363_vm6, %v1945_v14, -inf }
 0x4f9   : > { %v4843_v16 = vpop.f32.mrf.mxu0  ;;  %2063 = vmax.xlane.f32.xlu0 %v2062_v15 }
 0x4fb   : > { %v2046_v17 = vpop.f32.mrf.mxu0 }
 0x4fc   : > { %2194 = vrot.lane.b32.xlu1 %v5702_v27, %s5391_s29  ;;  %v2071_v22 = vsel %vm1363_vm6, %v2046_v17, -inf }
 0x4fd   : > { %v4854_v19 = vpop.f32.mrf.mxu0  ;;  %2066 = vmax.xlane.f32.xlu0 %v2065_v18 }
 0x4ff   : > { %v5848_v21 = vpop.f32.mrf.mxu0 }
 0x500   : > { %2243 = vrot.lane.b32.xlu1 %v5705_v29, %s5391_s29  ;;  %v2074_v24 = vsel %vm1363_vm6, %v5848_v21, -inf }
 0x501   : > { %v4855_v23 = vpop.f32.mrf.mxu0  ;;  %2072 = vmax.xlane.f32.xlu0 %v2071_v22 }
 0x517   : > { %2145 = vrot.lane.b32.xlu0 %v5693_v20, %s5391_s29 }
 0x524   : > { %2075 = vmax.xlane.f32.xlu1 %v2074_v24 }
 0x535   : > { %2292 = vrot.lane.b32.xlu1 %v5712_v35, %s5391_s29  ;;  %s6510_s29 = scalar_lea.vmem %s6464_s17, %s5540_s0 }
 0x546   : > { %v2055_v25 = vpop.xlane.xlu0 %2054 }
 0x547   : > { %v2077_v26 = vsub.f32 %v1890_v59, %v2055_v25 }
 0x549   : > { %v2085_v28 = vmul.f32 1.442695, %v2077_v26 }
 0x54a   : > { %v2058_v30 = vpop.xlane.xlu1 %2057 }
 0x54b   : > { %5197 = vpow2.f32 %v2085_v28  ;;  %v2078_v31 = vsub.f32 %v1893_v62, %v2058_v30 }
 0x54d   : > { %v2087_v32 = vmul.f32 1.442695, %v2078_v31 }
 0x54f   : > { %5199 = vpow2.f32 %v2087_v32 }
 0x558   : > { %v5856_v34 = vpop.eup %5197 }
 0x559   : > { %v2101_v36 = vsel %vm1363_vm6, %v5856_v34, 0.0 }
 0x55a   : > { %2102 = vadd.xlane.f32.xlu0 %v2101_v36 }
 0x55c   : > { %v5860_v38 = vpop.eup %5199 }
 0x55d   : > { %v2104_v39 = vsel %vm1363_vm6, %v5860_v38, 0.0 }
 0x55e   : > { %2105 = vadd.xlane.f32.xlu1 %v2104_v39 }
 0x574   : > { %v2070_v40 = vpop.xlane.xlu1 %2069 }
 0x575   : > { %v2082_v48 = vsub.f32 %v1997_v3, %v2070_v40 }
 0x577   : > { %v2095_v56 = vmul.f32 1.442695, %v2082_v48 }
 0x578   : > { %v2195_v41 = vpop.permute.xlu1 %2194 }
 0x579   : > { %v2200_v43 = vsel %vm1650_vm7, %v2195_v41, 0 }
 0x57a   : > { %4863 = vmatpush3.bf16.msra.mxu0 %v2200_v43 }
 0x57b   : > { %4874 = vmatprep.subr.bf16.mxu0 %v5387_v6 }
 0x57c   : > { %v2244_v16 = vpop.permute.xlu1 %2243 }
 0x57d   : > { %v2249_v36 = vsel %vm1650_vm7, %v2244_v16, 0 }
 0x57e   : > { %v2061_v45 = vpop.xlane.xlu0 %2060 }
 0x57f   : > { %v2079_v46 = vsub.f32 %v1942_v11, %v2061_v45 }
 0x581   : > { %v2089_v51 = vmul.f32 1.442695, %v2079_v46 }
 0x582   : > { %v2064_v52 = vpop.xlane.xlu0 %2063 }
 0x583   : > { %5201 = vpow2.f32 %v2089_v51  ;;  %v2080_v55 = vsub.f32 %v1945_v14, %v2064_v52 }
 0x585   : > { %v2091_v58 = vmul.f32 1.442695, %v2080_v55 }
 0x586   : > { %v2067_v59 = vpop.xlane.xlu0 %2066 }
 0x587   : > { %5203 = vpow2.f32 %v2091_v58  ;;  %v2081_v60 = vsub.f32 %v5836_v1, %v2067_v59 }
 0x588   : > { %5205 = vpow2.f32 %v2095_v56 }
 0x589   : > { %v2093_v61 = vmul.f32 1.442695, %v2081_v60 }
 0x58a   : > { %v2073_v62 = vpop.xlane.xlu0 %2072 }
 0x58b   : > { %5207 = vpow2.f32 %v2093_v61  ;;  %v2083_v63 = vsub.f32 %v2046_v17, %v2073_v62 }
 0x58d   : > { %v2097_v0 = vmul.f32 1.442695, %v2083_v63 }
 0x58e   : > { %v2146_v2 = vpop.permute.xlu0 %2145 }
 0x58f   : > { %5209 = vpow2.f32 %v2097_v0  ;;  %v2151_v3 = vsel %vm1650_vm7, %v2146_v2, 0 }
 0x590   : > { %v5202_v4 = vpop.eup %5201  ;;  %4857 = vmatpush3.bf16.msra.mxu1 %v2151_v3 }
 0x591   : > { %v2107_v7 = vsel %vm1363_vm6, %v5202_v4, 0.0  ;;  %4868 = vmatprep.subr.bf16.mxu1 %v5387_v6 }
 0x592   : > { %2108 = vadd.xlane.f32.xlu0 %v2107_v7 }
 0x594   : > { %v5204_v8 = vpop.eup %5203 }
 0x595   : > { %v2110_v1 = vsel %vm1363_vm6, %v5204_v8, 0.0  ;;  %v5206_v10 = vpop.eup %5205 }
 0x596   : > { %2111 = vadd.xlane.f32.xlu1 %v2110_v1  ;;  %v2116_v13 = vsel %vm1363_vm6, %v5206_v10, 0.0 }
 0x598   : > { %v5208_v11 = vpop.eup %5207 }
 0x599   : > { %v2113_v12 = vsel %vm1363_vm6, %v5208_v11, 0.0 }
 0x59a   : > { %2114 = vadd.xlane.f32.xlu0 %v2113_v12  ;;  %2117 = vadd.xlane.f32.xlu1 %v2116_v13 }
 0x59c   : > { %v5873_v14 = vpop.eup %5209 }
 0x59d   : > { %v2119_v15 = vsel %vm1363_vm6, %v5873_v14, 0.0 }
 0x59e   : > { %2120 = vadd.xlane.f32.xlu0 %v2119_v15 }
 0x5ab   : > { %2394 = vrot.lane.b32.xlu1 %v5702_v27, %s5392_s1 }
 0x5ad   : > { %v2076_v17 = vpop.xlane.xlu1 %2075 }
 0x5ae   : > { %v2084_v18 = vsub.f32 %v5848_v21, %v2076_v17 }
 0x5b0   : > { %v2099_v19 = vmul.f32 1.442695, %v2084_v18 }
 0x5b1   : > { %v2293_v24 = vpop.permute.xlu1 %2292 }
 0x5b2   : > { %5211 = vpow2.f32 %v2099_v19  ;;  %v2298_v56 = vsel %vm1650_vm7, %v2293_v24, 0 }
 0x5b4   : > { %2343 = vrot.lane.b32.xlu0 %v5693_v20, %s5392_s1 }
 0x5b8   : > { %2341 = vrot.lane.b32.xlu0 %v5709_v33, %s5392_s1 }
 0x5bc   : > { %2392 = vrot.lane.b32.xlu0 %v5720_v37, %s5392_s1 }
 0x5bf   : > { %v5883_v22 = vpop.eup %5211 }
 0x5c0   : > { %2443 = vrot.lane.b32.xlu0 %v5729_v42, %s5392_s1  ;;  %v2122_v23 = vsel %vm1363_vm6, %v5883_v22, 0.0 }
 0x5cf   : > { %2123 = vadd.xlane.f32.xlu1 %v2122_v23 }
 0x5e0   : > { %2445 = vrot.lane.b32.xlu1 %v5705_v29, %s5392_s1 }
 0x5e3   : > { %v2103_v25 = vpop.xlane.xlu0 %2102 }
 0x5e4   : > { %2496 = vrot.lane.b32.xlu1 %v5712_v35, %s5392_s1  ;;  %5213 = vrcp.f32 %v2103_v25 }
 0x5e7   : > { %v2106_v21 = vpop.xlane.xlu1 %2105 }
 0x5e8   : > { %2494 = vrot.lane.b32.xlu1 %v5736_v44, %s5392_s1  ;;  %5215 = vrcp.f32 %v2106_v21 }
 0x5f1   : > { %v5214_v26 = vpop.eup %5213 }
 0x5f2   : > { %v2133_v30 = vmul.f32 %v5214_v26, %v5856_v34 }
 0x5f5   : > { %v5216_v28 = vpop.eup %5215 }
 0x5f6   : > { %v2134_v31 = vmul.f32 %v5216_v28, %v5860_v38 }
 0x5f8   : > { %v2141_v32 = vpack.c.bf16 %v2134_v31, %v2133_v30 }
 0x5fa   : > { %4859 = vmatmul.mubr.msk.bf16.vlgmr.msra.gmra.mxu1 %vm1363_vm6, %v2141_v32 }
 0x5fb   : > { %4869 = vmatpush3.bf16.msra.mxu1 %v2249_v36  ;;  %4870 = vmatprep.mubr.msk.bf16.mxu1 %vm5388_vm5, %v5387_v6 }
 0x5fc   : > { %4880 = vmatprep.subr.bf16.mxu1 %v5387_v6 }
 0x61b   : > { %v2109_v39 = vpop.xlane.xlu0 %2108 }
 0x61c   : > { %5217 = vrcp.f32 %v2109_v39 }
 0x61f   : > { %v2112_v40 = vpop.xlane.xlu1 %2111 }
 0x620   : > { %5219 = vrcp.f32 %v2112_v40 }
 0x623   : > { %v2115_v41 = vpop.xlane.xlu0 %2114  ;;  %v2118_v43 = vpop.xlane.xlu1 %2117 }
 0x624   : > { %5221 = vrcp.f32 %v2115_v41 }
 0x625   : > { %5223 = vrcp.f32 %v2118_v43 }
 0x627   : > { %v2121_v45 = vpop.xlane.xlu0 %2120  ;;  %v2395_v0 = vpop.permute.xlu1 %2394 }
 0x628   : > { %5225 = vrcp.f32 %v2121_v45  ;;  %v2400_v15 = vsel %vm1363_vm6, %v2395_v0, 0 }
 0x629   : > { %v5218_v34 = vpop.eup %5217 }
 0x62a   : > { %v2135_v46 = vmul.f32 %v5218_v34, %v5202_v4 }
 0x62b   : > { %v2344_v60 = vpop.permute.xlu0 %2343 }
 0x62c   : > { %v2349_v62 = vsel %vm1363_vm6, %v2344_v60, 0 }
 0x62d   : > { %v5220_v38 = vpop.eup %5219 }
 0x62e   : > { %v2136_v48 = vmul.f32 %v5220_v38, %v5204_v8 }
 0x62f   : > { %v2342_v63 = vpop.permute.xlu0 %2341 }
 0x630   : > { %v2142_v51 = vpack.c.bf16 %v2136_v48, %v2135_v46 }
 0x631   : > { %v5222_v52 = vpop.eup %5221 }
 0x632   : > { %v5224_v55 = vpop.eup %5223  ;;  %4865 = vmatmul.mubr.msk.bf16.vlgmr.msra.gmra.mxu0 %vm1363_vm6, %v2142_v51  ;;  %v2137_v58 = vmul.f32 %v5222_v52, %v5208_v11 }
 0x633   : > { %4875 = vmatpush3.bf16.msra.mxu0 %v2298_v56  ;;  %v2138_v59 = vmul.f32 %v5224_v55, %v5206_v10  ;;  %4876 = vmatprep.mubr.msk.bf16.mxu0 %vm5388_vm5, %v5387_v6  ;;  %v2393_v7 = vpop.permute.xlu0 %2392 }
 0x634   : > { %4886 = vmatprep.subr.bf16.mxu0 %v5387_v6 }
 0x635   : > { %v2143_v61 = vpack.c.bf16 %v2138_v59, %v2137_v58  ;;  %v5226_v8 = vpop.eup %5225 }
 0x636   : > { %v2139_v11 = vmul.f32 %v5226_v8, %v5873_v14 }
 0x637   : > { %4871 = vmatmul.mubr.msk.bf16.vlgmr.msra.gmra.mxu1 %vm1363_vm6, %v2143_v61  ;;  %v2444_v1 = vpop.permute.xlu0 %2443 }
 0x638   : > { %4881 = vmatpush3.bf16.xpose.msra.mxu1 %v2349_v62  ;;  %4882 = vmatprep.mubr.msk.bf16.mxu1 %vm5388_vm5, %v5387_v6 }
 0x639   : > { %4892 = vmatprep.subr.bf16.mxu1 %v5387_v6 }
 0x63f   : > { %4883 = vmatmul.mubr.msk.bf16.vlgmr.msra.gmra.mxu1 %vm1363_vm6, %v2342_v63 }
 0x640   : > { %4894 = vmatprep.mubr.msk.bf16.mxu1 %vm5388_vm5, %v5387_v6 }
 0x658   : > { %v2124_v2 = vpop.xlane.xlu1 %2123 }
 0x659   : > { %5227 = vrcp.f32 %v2124_v2 }
 0x65c   : > { %v2446_v3 = vpop.permute.xlu1 %2445 }
 0x65d   : > { %v2451_v4 = vsel %vm1363_vm6, %v2446_v3, 0 }
 0x65e   : > { %4893 = vmatpush3.bf16.xpose.msra.mxu1 %v2451_v4 }
 0x65f   : > { %4904 = vmatprep.subr.bf16.mxu1 %v5387_v6 }
 0x660   : > { %v2497_v16 = vpop.permute.xlu1 %2496 }
 0x661   : > { %v2502_v17 = vsel %vm1363_vm6, %v2497_v16, 0 }
 0x664   : > { %v2495_v14 = vpop.permute.xlu1 %2494 }
 0x665   : > { %4895 = vmatmul.mubr.msk.bf16.vlgmr.msra.gmra.mxu1 %vm1363_vm6, %v2444_v1 }
 0x666   : > { %v5228_v10 = vpop.eup %5227  ;;  %4906 = vmatprep.mubr.msk.bf16.mxu1 %vm5388_vm5, %v5387_v6 }
 0x667   : > { %v2140_v12 = vmul.f32 %v5228_v10, %v5883_v22 }
 0x669   : > { %v2144_v13 = vpack.c.bf16 %v2140_v12, %v2139_v11 }
 0x66b   : > { %4877 = vmatmul.mubr.msk.bf16.vlgmr.msra.gmra.mxu0 %vm1363_vm6, %v2144_v13 }
 0x66c   : > { %4887 = vmatpush3.bf16.xpose.msra.mxu0 %v2400_v15  ;;  %4888 = vmatprep.mubr.msk.bf16.mxu0 %vm5388_vm5, %v5387_v6 }
 0x66d   : > { %4898 = vmatprep.subr.bf16.mxu0 %v5387_v6 }
 0x673   : > { %4889 = vmatmul.mubr.msk.bf16.vlgmr.msra.gmra.mxu0 %vm1363_vm6, %v2393_v7 }
 0x674   : > { %4899 = vmatpush3.bf16.xpose.msra.mxu0 %v2502_v17  ;;  %4900 = vmatprep.mubr.msk.bf16.mxu0 %vm5388_vm5, %v5387_v6 }
 0x675   : > { %4910 = vmatprep.subr.bf16.mxu0 %v5387_v6 }
 0x67b   : > { %4901 = vmatmul.mubr.msk.bf16.vlgmr.msra.gmra.mxu0 %vm1363_vm6, %v2495_v14 }
 0x67c   : > { %4912 = vmatprep.mubr.msk.bf16.mxu0 %vm5388_vm5, %v5387_v6 }
 0x6ba   : > { %v5930_v18 = vpop.f32.mrf.mxu1 }
 0x6bc   : > { %v4860_v19 = vpop.f32.mrf.mxu1 }
 0x6be   : > { %v5932_v22 = vpop.f32.mrf.mxu1 }
 0x6bf   : > { %v5087_v23 = vpack.i.bf16 %v5932_v22, %v5930_v18 }
 0x6c0   : > { %v4861_v24 = vpop.f32.mrf.mxu1 }
 0x6f2   : > { %v5936_v25 = vpop.f32.mrf.mxu0 }
 0x6f4   : > { %v4866_v21 = vpop.f32.mrf.mxu0 }
 0x6f6   : > { %v5938_v26 = vpop.f32.mrf.mxu0 }
 0x6f7   : > { %v5092_v28 = vpack.i.bf16 %v5938_v26, %v5936_v25  ;;  %v5942_v30 = vpop.f32.mrf.mxu1 }
 0x6f8   : > { %v4867_v31 = vpop.f32.mrf.mxu0 }
 0x6f9   : > { %v4872_v32 = vpop.f32.mrf.mxu1 }
 0x6fb   : > { %v5944_v36 = vpop.f32.mrf.mxu1 }
 0x6fc   : > { %v5107_v39 = vpack.i.bf16 %v5944_v36, %v5942_v30 }
 0x6fd   : > { %v4873_v40 = vpop.f32.mrf.mxu1 }
 0x6ff   : > { %v2385_v41 = vpop.f32.mrf.mxu1 }
 0x700   : > { %v2545_v43 = vsel %vm1363_vm6, %v2385_v41, -inf }
 0x701   : > { %2546 = vmax.xlane.f32.xlu0 %v2545_v43  ;;  %v4884_v34 = vpop.f32.mrf.mxu1 }
 0x703   : > { %v2388_v38 = vpop.f32.mrf.mxu1 }
 0x704   : > { %v2548_v45 = vsel %vm1363_vm6, %v2388_v38, -inf }
 0x705   : > { %2549 = vmax.xlane.f32.xlu1 %v2548_v45  ;;  %v4885_v46 = vpop.f32.mrf.mxu1 }
 0x725   : > { %v5950_v48 = vpop.f32.mrf.mxu1 }
 0x726   : > { %v2557_v1 = vsel %vm1363_vm6, %v5950_v48, -inf }
 0x727   : > { %v4896_v51 = vpop.f32.mrf.mxu1 }
 0x729   : > { %v2490_v52 = vpop.f32.mrf.mxu1 }
 0x72a   : > { %v2560_v55 = vsel %vm1363_vm6, %v2490_v52, -inf }
 0x72b   : > { %v5953_v56 = vpop.f32.mrf.mxu0  ;;  %2561 = vmax.xlane.f32.xlu1 %v2560_v55  ;;  %v4897_v58 = vpop.f32.mrf.mxu1 }
 0x72d   : > { %v4878_v59 = vpop.f32.mrf.mxu0 }
 0x72f   : > { %v5955_v60 = vpop.f32.mrf.mxu0 }
 0x730   : > { %v5112_v61 = vpack.i.bf16 %v5955_v60, %v5953_v56 }
 0x731   : > { %v4879_v62 = vpop.f32.mrf.mxu0 }
 0x733   : > { %v2436_v63 = vpop.f32.mrf.mxu0 }
 0x734   : > { %v2551_v0 = vsel %vm1363_vm6, %v2436_v63, -inf }
 0x735   : > { %v4890_v2 = vpop.f32.mrf.mxu0  ;;  %2552 = vmax.xlane.f32.xlu0 %v2551_v0 }
 0x737   : > { %v2439_v3 = vpop.f32.mrf.mxu0 }
 0x738   : > { %v2554_v4 = vsel %vm1363_vm6, %v2439_v3, -inf }
 0x739   : > { %v4891_v7 = vpop.f32.mrf.mxu0  ;;  %2555 = vmax.xlane.f32.xlu0 %v2554_v4 }
 0x73b   : > { %v2538_v8 = vpop.f32.mrf.mxu0 }
 0x73c   : > { %2686 = vrot.lane.b32.xlu1 %v5702_v27, %s5393_s28  ;;  %v2563_v12 = vsel %vm1363_vm6, %v2538_v8, -inf }
 0x73d   : > { %v4902_v10 = vpop.f32.mrf.mxu0  ;;  %2558 = vmax.xlane.f32.xlu0 %v2557_v1 }
 0x73f   : > { %v5964_v11 = vpop.f32.mrf.mxu0 }
 0x740   : > { %2735 = vrot.lane.b32.xlu1 %v5705_v29, %s5393_s28  ;;  %v2566_v15 = vsel %vm1363_vm6, %v5964_v11, -inf }
 0x741   : > { %v4903_v13 = vpop.f32.mrf.mxu0  ;;  %2564 = vmax.xlane.f32.xlu0 %v2563_v12 }
 0x757   : > { %2637 = vrot.lane.b32.xlu0 %v5693_v20, %s5393_s28 }
 0x764   : > { %2567 = vmax.xlane.f32.xlu1 %v2566_v15 }
 0x775   : > { %2784 = vrot.lane.b32.xlu1 %v5712_v35, %s5393_s28  ;;  %s6511_s28 = sld [smem:[#allocation21_spill]] }
 0x78a   : > { %v2547_v16 = vpop.xlane.xlu0 %2546 }
 0x78b   : > { %v2569_v17 = vsub.f32 %v2385_v41, %v2547_v16 }
 0x78d   : > { %v2577_v14 = vmul.f32 1.442695, %v2569_v17 }
 0x78e   : > { %v2550_v19 = vpop.xlane.xlu1 %2549 }
 0x78f   : > { %5229 = vpow2.f32 %v2577_v14  ;;  %v2570_v24 = vsub.f32 %v2388_v38, %v2550_v19 }
 0x791   : > { %v2579_v21 = vmul.f32 1.442695, %v2570_v24 }
 0x793   : > { %5231 = vpow2.f32 %v2579_v21 }
 0x79c   : > { %v5972_v31 = vpop.eup %5229 }
 0x79d   : > { %v2593_v32 = vsel %vm1363_vm6, %v5972_v31, 0.0 }
 0x79e   : > { %2594 = vadd.xlane.f32.xlu0 %v2593_v32 }
 0x7a0   : > { %v5976_v40 = vpop.eup %5231 }
 0x7a1   : > { %v2596_v43 = vsel %vm1363_vm6, %v5976_v40, 0.0 }
 0x7a2   : > { %2597 = vadd.xlane.f32.xlu1 %v2596_v43 }
 0x7b4   : > { %v2562_v34 = vpop.xlane.xlu1 %2561 }
 0x7b5   : > { %v2574_v51 = vsub.f32 %v2490_v52, %v2562_v34 }
 0x7b7   : > { %v2587_v62 = vmul.f32 1.442695, %v2574_v51 }
 0x7b8   : > { %v2687_v41 = vpop.permute.xlu1 %2686 }
 0x7b9   : > { %v2692_v45 = vsel %vm1650_vm7, %v2687_v41, 0 }
 0x7ba   : > { %4911 = vmatpush3.bf16.msra.mxu0 %v2692_v45 }
 0x7bb   : > { %4922 = vmatprep.subr.bf16.mxu0 %v5387_v6 }
 0x7bc   : > { %v2736_v21 = vpop.permute.xlu1 %2735 }
 0x7be   : > { %v2553_v38 = vpop.xlane.xlu0 %2552 }
 0x7bf   : > { %v2571_v46 = vsub.f32 %v2436_v63, %v2553_v38 }
 0x7c1   : > { %v2581_v55 = vmul.f32 1.442695, %v2571_v46 }
 0x7c2   : > { %v2556_v58 = vpop.xlane.xlu0 %2555 }
 0x7c3   : > { %5233 = vpow2.f32 %v2581_v55  ;;  %v2572_v59 = vsub.f32 %v2439_v3, %v2556_v58  ;;  %v2741_v58 = vsel %vm1650_vm7, %v2736_v21, 0 }
 0x7c5   : > { %v2583_v0 = vmul.f32 1.442695, %v2572_v59 }
 0x7c6   : > { %v2559_v2 = vpop.xlane.xlu0 %2558 }
 0x7c7   : > { %5235 = vpow2.f32 %v2583_v0  ;;  %v2573_v4 = vsub.f32 %v5950_v48, %v2559_v2 }
 0x7c8   : > { %5237 = vpow2.f32 %v2587_v62 }
 0x7c9   : > { %v2585_v7 = vmul.f32 1.442695, %v2573_v4 }
 0x7ca   : > { %v2565_v1 = vpop.xlane.xlu0 %2564 }
 0x7cb   : > { %5239 = vpow2.f32 %v2585_v7  ;;  %v2575_v10 = vsub.f32 %v2538_v8, %v2565_v1 }
 0x7cd   : > { %v2589_v12 = vmul.f32 1.442695, %v2575_v10 }
 0x7ce   : > { %v2638_v13 = vpop.permute.xlu0 %2637 }
 0x7cf   : > { %5241 = vpow2.f32 %v2589_v12  ;;  %v2643_v52 = vsel %vm1650_vm7, %v2638_v13, 0 }
 0x7d0   : > { %v5234_v63 = vpop.eup %5233  ;;  %4905 = vmatpush3.bf16.msra.mxu1 %v2643_v52 }
 0x7d1   : > { %v2599_v3 = vsel %vm1363_vm6, %v5234_v63, 0.0  ;;  %4916 = vmatprep.subr.bf16.mxu1 %v5387_v6 }
 0x7d2   : > { %2600 = vadd.xlane.f32.xlu0 %v2599_v3 }
 0x7d4   : > { %v5236_v15 = vpop.eup %5235 }
 0x7d5   : > { %v2602_v48 = vsel %vm1363_vm6, %v5236_v15, 0.0  ;;  %v5238_v16 = vpop.eup %5237 }
 0x7d6   : > { %2603 = vadd.xlane.f32.xlu1 %v2602_v48  ;;  %v2608_v14 = vsel %vm1363_vm6, %v5238_v16, 0.0 }
 0x7d8   : > { %v5240_v17 = vpop.eup %5239 }
 0x7d9   : > { %v2605_v8 = vsel %vm1363_vm6, %v5240_v17, 0.0 }
 0x7da   : > { %2606 = vadd.xlane.f32.xlu0 %v2605_v8  ;;  %2609 = vadd.xlane.f32.xlu1 %v2608_v14 }
 0x7dc   : > { %v5989_v19 = vpop.eup %5241 }
 0x7dd   : > { %v2611_v24 = vsel %vm1363_vm6, %v5989_v19, 0.0 }
 0x7de   : > { %2612 = vadd.xlane.f32.xlu0 %v2611_v24 }
 0x7eb   : > { %2886 = vrot.lane.b32.xlu1 %v5702_v27, %s5394_s21 }
 0x7ed   : > { %v2568_v32 = vpop.xlane.xlu1 %2567 }
 0x7ee   : > { %v2576_v43 = vsub.f32 %v5964_v11, %v2568_v32 }
 0x7f0   : > { %v2591_v34 = vmul.f32 1.442695, %v2576_v43 }
 0x7f1   : > { %v2785_v38 = vpop.permute.xlu1 %2784 }
 0x7f2   : > { %5243 = vpow2.f32 %v2591_v34  ;;  %v2790_v13 = vsel %vm1650_vm7, %v2785_v38, 0 }
 0x7f4   : > { %2835 = vrot.lane.b32.xlu0 %v5693_v20, %s5394_s21 }
 0x7f8   : > { %2833 = vrot.lane.b32.xlu0 %v5709_v33, %s5394_s21 }
 0x7fc   : > { %2884 = vrot.lane.b32.xlu0 %v5720_v37, %s5394_s21 }
 0x7ff   : > { %v5999_v41 = vpop.eup %5243 }
 0x800   : > { %2935 = vrot.lane.b32.xlu0 %v5729_v42, %s5394_s21  ;;  %v2614_v45 = vsel %vm1363_vm6, %v5999_v41, 0.0 }
 0x80f   : > { %2615 = vadd.xlane.f32.xlu1 %v2614_v45 }
 0x820   : > { %2937 = vrot.lane.b32.xlu1 %v5705_v29, %s5394_s21 }
 0x824   : > { %2988 = vrot.lane.b32.xlu1 %v5712_v35, %s5394_s21 }
 0x827   : > { %v2595_v11 = vpop.xlane.xlu0 %2594 }
 0x828   : > { %2986 = vrot.lane.b32.xlu1 %v5736_v44, %s5394_s21  ;;  %5245 = vrcp.f32 %v2595_v11  ;;  %s6512_s21 = scalar_lea.vmem %s6511_s28, %s5540_s0 }
 0x82b   : > { %v2598_v33 = vpop.xlane.xlu1 %2597 }
 0x82c   : > { %5247 = vrcp.f32 %v2598_v33 }
 0x835   : > { %v5246_v37 = vpop.eup %5245 }
 0x836   : > { %v2625_v42 = vmul.f32 %v5246_v37, %v5972_v31 }
 0x839   : > { %v5248_v46 = vpop.eup %5247 }
 0x83a   : > { %v2626_v51 = vmul.f32 %v5248_v46, %v5976_v40 }
 0x83c   : > { %v2633_v55 = vpack.c.bf16 %v2626_v51, %v2625_v42 }
 0x83e   : > { %4907 = vmatmul.mubr.msk.bf16.vlgmr.msra.gmra.mxu1 %vm1363_vm6, %v2633_v55 }
 0x83f   : > { %4917 = vmatpush3.bf16.msra.mxu1 %v2741_v58  ;;  %4918 = vmatprep.mubr.msk.bf16.mxu1 %vm5388_vm5, %v5387_v6 }
 0x840   : > { %4928 = vmatprep.subr.bf16.mxu1 %v5387_v6 }
 0x85b   : > { %v2601_v44 = vpop.xlane.xlu0 %2600 }
 0x85c   : > { %5249 = vrcp.f32 %v2601_v44 }
 0x85f   : > { %v2604_v59 = vpop.xlane.xlu1 %2603 }
 0x860   : > { %5251 = vrcp.f32 %v2604_v59 }
 0x863   : > { %v2607_v62 = vpop.xlane.xlu0 %2606  ;;  %v2610_v0 = vpop.xlane.xlu1 %2609 }
 0x864   : > { %5253 = vrcp.f32 %v2607_v62 }
 0x865   : > { %5255 = vrcp.f32 %v2610_v0 }
 0x867   : > { %v2613_v2 = vpop.xlane.xlu0 %2612 }
 0x868   : > { %5257 = vrcp.f32 %v2613_v2 }
 0x869   : > { %v5250_v31 = vpop.eup %5249 }
 0x86a   : > { %v2627_v4 = vmul.f32 %v5250_v31, %v5234_v63 }
 0x86b   : > { %v2836_v48 = vpop.permute.xlu0 %2835 }
 0x86c   : > { %v2841_v63 = vsel %vm1363_vm6, %v2836_v48, 0 }
 0x86d   : > { %v5252_v40 = vpop.eup %5251 }
 0x86e   : > { %v2628_v7 = vmul.f32 %v5252_v40, %v5236_v15 }
 0x86f   : > { %v2834_v15 = vpop.permute.xlu0 %2833 }
 0x870   : > { %v2634_v1 = vpack.c.bf16 %v2628_v7, %v2627_v4 }
 0x871   : > { %v5254_v10 = vpop.eup %5253 }
 0x872   : > { %v5256_v12 = vpop.eup %5255  ;;  %4913 = vmatmul.mubr.msk.bf16.vlgmr.msra.gmra.mxu0 %vm1363_vm6, %v2634_v1  ;;  %v2629_v52 = vmul.f32 %v5254_v10, %v5240_v17 }
 0x873   : > { %4923 = vmatpush3.bf16.msra.mxu0 %v2790_v13  ;;  %v2630_v3 = vmul.f32 %v5256_v12, %v5238_v16  ;;  %4924 = vmatprep.mubr.msk.bf16.mxu0 %vm5388_vm5, %v5387_v6  ;;  %v2887_v16 = vpop.permute.xlu1 %2886  ;;  %v2885_v21 = vpop.permute.xlu0 %2884 }
 0x874   : > { %4934 = vmatprep.subr.bf16.mxu0 %v5387_v6  ;;  %v2892_v33 = vsel %vm1363_vm6, %v2887_v16, 0 }
 0x875   : > { %v2635_v8 = vpack.c.bf16 %v2630_v3, %v2629_v52  ;;  %v5258_v32 = vpop.eup %5257 }
 0x876   : > { %v2631_v45 = vmul.f32 %v5258_v32, %v5989_v19 }
 0x877   : > { %4919 = vmatmul.mubr.msk.bf16.vlgmr.msra.gmra.mxu1 %vm1363_vm6, %v2635_v8  ;;  %v2936_v43 = vpop.permute.xlu0 %2935 }
 0x878   : > { %4929 = vmatpush3.bf16.xpose.msra.mxu1 %v2841_v63  ;;  %4930 = vmatprep.mubr.msk.bf16.mxu1 %vm5388_vm5, %v5387_v6 }
 0x879   : > { %4940 = vmatprep.subr.bf16.mxu1 %v5387_v6 }
 0x87f   : > { %4931 = vmatmul.mubr.msk.bf16.vlgmr.msra.gmra.mxu1 %vm1363_vm6, %v2834_v15 }
 0x880   : > { %4942 = vmatprep.mubr.msk.bf16.mxu1 %vm5388_vm5, %v5387_v6 }
 0x898   : > { %v2616_v17 = vpop.xlane.xlu1 %2615 }
 0x899   : > { %5259 = vrcp.f32 %v2616_v17 }
 0x89c   : > { %v2938_v14 = vpop.permute.xlu1 %2937 }
 0x89d   : > { %v2943_v24 = vsel %vm1363_vm6, %v2938_v14, 0 }
 0x89e   : > { %4941 = vmatpush3.bf16.xpose.msra.mxu1 %v2943_v24 }
 0x89f   : > { %4952 = vmatprep.subr.bf16.mxu1 %v5387_v6 }
 0x8a0   : > { %v2989_v37 = vpop.permute.xlu1 %2988 }
 0x8a1   : > { %v2994_v46 = vsel %vm1363_vm6, %v2989_v37, 0 }
 0x8a4   : > { %v2987_v19 = vpop.permute.xlu1 %2986 }
 0x8a5   : > { %4943 = vmatmul.mubr.msk.bf16.vlgmr.msra.gmra.mxu1 %vm1363_vm6, %v2936_v43 }
 0x8a6   : > { %v5260_v34 = vpop.eup %5259  ;;  %4954 = vmatprep.mubr.msk.bf16.mxu1 %vm5388_vm5, %v5387_v6 }
 0x8a7   : > { %v2632_v38 = vmul.f32 %v5260_v34, %v5999_v41 }
 0x8a9   : > { %v2636_v11 = vpack.c.bf16 %v2632_v38, %v2631_v45 }
 0x8ab   : > { %4925 = vmatmul.mubr.msk.bf16.vlgmr.msra.gmra.mxu0 %vm1363_vm6, %v2636_v11 }
 0x8ac   : > { %4935 = vmatpush3.bf16.xpose.msra.mxu0 %v2892_v33  ;;  %4936 = vmatprep.mubr.msk.bf16.mxu0 %vm5388_vm5, %v5387_v6 }
 0x8ad   : > { %4946 = vmatprep.subr.bf16.mxu0 %v5387_v6 }
 0x8b3   : > { %4937 = vmatmul.mubr.msk.bf16.vlgmr.msra.gmra.mxu0 %vm1363_vm6, %v2885_v21 }
 0x8b4   : > { %4947 = vmatpush3.bf16.xpose.msra.mxu0 %v2994_v46  ;;  %4948 = vmatprep.mubr.msk.bf16.mxu0 %vm5388_vm5, %v5387_v6 }
 0x8b5   : > { %4958 = vmatprep.subr.bf16.mxu0 %v5387_v6 }
 0x8bb   : > { %4949 = vmatmul.mubr.msk.bf16.vlgmr.msra.gmra.mxu0 %vm1363_vm6, %v2987_v19 }
 0x8bc   : > { %4960 = vmatprep.mubr.msk.bf16.mxu0 %vm5388_vm5, %v5387_v6 }
 0x8fe   : > { %v6046_v41 = vpop.f32.mrf.mxu1 }
 0x900   : > { %v4908_v42 = vpop.f32.mrf.mxu1 }
 0x902   : > { %v6048_v51 = vpop.f32.mrf.mxu1 }
 0x903   : > { %v5097_v55 = vpack.i.bf16 %v6048_v51, %v6046_v41 }
 0x904   : > { %v4909_v58 = vpop.f32.mrf.mxu1 }
 0x932   : > { %v6052_v44 = vpop.f32.mrf.mxu0 }
 0x934   : > { %v4914_v59 = vpop.f32.mrf.mxu0 }
 0x936   : > { %v6054_v62 = vpop.f32.mrf.mxu0 }
 0x937   : > { %v5102_v0 = vpack.i.bf16 %v6054_v62, %v6052_v44  ;;  %v6058_v31 = vpop.f32.mrf.mxu1 }
 0x938   : > { %v4915_v40 = vpop.f32.mrf.mxu0 }
 0x939   : > { %v4920_v2 = vpop.f32.mrf.mxu1 }
 0x93b   : > { %v6060_v4 = vpop.f32.mrf.mxu1 }
 0x93c   : > { %v5122_v7 = vpack.i.bf16 %v6060_v4, %v6058_v31 }
 0x93d   : > { %v4921_v1 = vpop.f32.mrf.mxu1 }
 0x93f   : > { %v2877_v10 = vpop.f32.mrf.mxu1 }
 0x940   : > { %v3037_v12 = vsel %vm1363_vm6, %v2877_v10, -inf }
 0x941   : > { %3038 = vmax.xlane.f32.xlu0 %v3037_v12  ;;  %v4932_v13 = vpop.f32.mrf.mxu1 }
 0x943   : > { %v2880_v52 = vpop.f32.mrf.mxu1 }
 0x944   : > { %v3040_v3 = vsel %vm1363_vm6, %v2880_v52, -inf }
 0x945   : > { %3041 = vmax.xlane.f32.xlu1 %v3040_v3  ;;  %v4933_v48 = vpop.f32.mrf.mxu1 }
 0x965   : > { %v2979_v8 = vpop.f32.mrf.mxu1 }
 0x966   : > { %v3049_v19 = vsel %vm1363_vm6, %v2979_v8, -inf }
 0x967   : > { %v4944_v63 = vpop.f32.mrf.mxu1 }
 0x969   : > { %v2982_v15 = vpop.f32.mrf.mxu1 }
 0x96a   : > { %v3052_v16 = vsel %vm1363_vm6, %v2982_v15, -inf }
 0x96b   : > { %v6067_v17 = vpop.f32.mrf.mxu0  ;;  %3053 = vmax.xlane.f32.xlu1 %v3052_v16  ;;  %v4945_v14 = vpop.f32.mrf.mxu1 }
 0x96d   : > { %v4926_v24 = vpop.f32.mrf.mxu0 }
 0x96f   : > { %v6069_v21 = vpop.f32.mrf.mxu0 }
 0x970   : > { %v5132_v32 = vpack.i.bf16 %v6069_v21, %v6067_v17 }
 0x971   : > { %v4927_v43 = vpop.f32.mrf.mxu0 }
 0x973   : > { %v2928_v34 = vpop.f32.mrf.mxu0 }
 0x974   : > { %v3043_v45 = vsel %vm1363_vm6, %v2928_v34, -inf }
 0x975   : > { %v4938_v38 = vpop.f32.mrf.mxu0  ;;  %3044 = vmax.xlane.f32.xlu0 %v3043_v45 }
 0x977   : > { %v2931_v11 = vpop.f32.mrf.mxu0 }
 0x978   : > { %v3046_v33 = vsel %vm1363_vm6, %v2931_v11, -inf }
 0x979   : > { %v4939_v37 = vpop.f32.mrf.mxu0  ;;  %3047 = vmax.xlane.f32.xlu0 %v3046_v33 }
 0x97b   : > { %v3030_v46 = vpop.f32.mrf.mxu0 }
 0x97c   : > { %v3055_v59 = vsel %vm1363_vm6, %v3030_v46, -inf }
 0x97d   : > { %v4950_v42 = vpop.f32.mrf.mxu0  ;;  %3050 = vmax.xlane.f32.xlu0 %v3049_v19 }
 0x97f   : > { %v6076_v58 = vpop.f32.mrf.mxu0 }
 0x980   : > { %v3058_v40 = vsel %vm1363_vm6, %v6076_v58, -inf }
 0x981   : > { %v4951_v2 = vpop.f32.mrf.mxu0  ;;  %3056 = vmax.xlane.f32.xlu0 %v3055_v59  ;;  %3059 = vmax.xlane.f32.xlu1 %v3058_v40 }
 0x9ca   : > { %v3039_v1 = vpop.xlane.xlu0 %3038 }
 0x9cb   : > { %v3061_v12 = vsub.f32 %v2877_v10, %v3039_v1 }
 0x9cd   : > { %v3069_v13 = vmul.f32 1.442695, %v3061_v12 }
 0x9ce   : > { %v3042_v3 = vpop.xlane.xlu1 %3041 }
 0x9cf   : > { %5261 = vpow2.f32 %v3069_v13  ;;  %v3062_v48 = vsub.f32 %v2880_v52, %v3042_v3 }
 0x9d1   : > { %v3071_v63 = vmul.f32 1.442695, %v3062_v48 }
 0x9d3   : > { %5263 = vpow2.f32 %v3071_v63 }
 0x9dc   : > { %v6081_v16 = vpop.eup %5261 }
 0x9dd   : > { %v3085_v14 = vsel %vm1363_vm6, %v6081_v16, 0.0 }
 0x9de   : > { %3086 = vadd.xlane.f32.xlu0 %v3085_v14 }
 0x9e0   : > { %v6085_v24 = vpop.eup %5263 }
 0x9e1   : > { %v3088_v43 = vsel %vm1363_vm6, %v6085_v24, 0.0 }
 0x9e2   : > { %3089 = vadd.xlane.f32.xlu1 %v3088_v43 }
 0x9f4   : > { %v3054_v45 = vpop.xlane.xlu1 %3053 }
 0x9f5   : > { %v3066_v33 = vsub.f32 %v2982_v15, %v3054_v45 }
 0x9f7   : > { %v3079_v42 = vmul.f32 1.442695, %v3066_v33 }
 0x9fe   : > { %v3045_v10 = vpop.xlane.xlu0 %3044 }
 0x9ff   : > { %v3063_v38 = vsub.f32 %v2928_v34, %v3045_v10 }
 0xa01   : > { %v3073_v37 = vmul.f32 1.442695, %v3063_v38 }
 0xa02   : > { %v3048_v52 = vpop.xlane.xlu0 %3047 }
 0xa03   : > { %5265 = vpow2.f32 %v3073_v37  ;;  %v3064_v19 = vsub.f32 %v2931_v11, %v3048_v52 }
 0xa05   : > { %v3075_v59 = vmul.f32 1.442695, %v3064_v19 }
 0xa06   : > { %v3051_v40 = vpop.xlane.xlu0 %3050 }
 0xa07   : > { %5267 = vpow2.f32 %v3075_v59  ;;  %v3065_v2 = vsub.f32 %v2979_v8, %v3051_v40 }
 0xa08   : > { %5269 = vpow2.f32 %v3079_v42 }
 0xa09   : > { %v3077_v1 = vmul.f32 1.442695, %v3065_v2 }
 0xa0a   : > { %v3057_v12 = vpop.xlane.xlu0 %3056  ;;  %v3060_v10 = vpop.xlane.xlu1 %3059 }
 0xa0b   : > { %5271 = vpow2.f32 %v3077_v1  ;;  %v3067_v13 = vsub.f32 %v3030_v46, %v3057_v12  ;;  %v3068_v38 = vsub.f32 %v6076_v58, %v3060_v10 }
 0xa0d   : > { %v3081_v3 = vmul.f32 1.442695, %v3067_v13  ;;  %v3083_v33 = vmul.f32 1.442695, %v3068_v38 }
 0xa0f   : > { %5273 = vpow2.f32 %v3081_v3 }
 0xa10   : > { %v6089_v48 = vpop.eup %5265  ;;  %5275 = vpow2.f32 %v3083_v33 }
 0xa11   : > { %v3091_v15 = vsel %vm1363_vm6, %v6089_v48, 0.0 }
 0xa12   : > { %3092 = vadd.xlane.f32.xlu0 %v3091_v15 }
 0xa14   : > { %v5268_v34 = vpop.eup %5267 }
 0xa15   : > { %v3094_v11 = vsel %vm1363_vm6, %v5268_v34, 0.0  ;;  %v6094_v63 = vpop.eup %5269 }
 0xa16   : > { %3095 = vadd.xlane.f32.xlu1 %v3094_v11  ;;  %v3100_v46 = vsel %vm1363_vm6, %v6094_v63, 0.0 }
 0xa18   : > { %v6096_v8 = vpop.eup %5271 }
 0xa19   : > { %v3097_v14 = vsel %vm1363_vm6, %v6096_v8, 0.0 }
 0xa1a   : > { %3098 = vadd.xlane.f32.xlu0 %v3097_v14  ;;  %3101 = vadd.xlane.f32.xlu1 %v3100_v46 }
 0xa1c   : > { %v6102_v43 = vpop.eup %5273 }
 0xa1d   : > { %v3103_v45 = vsel %vm1363_vm6, %v6102_v43, 0.0 }
 0xa1e   : > { %3104 = vadd.xlane.f32.xlu0 %v3103_v45 }
 0xa2b   : > { %3178 = vrot.lane.b32.xlu1 %v5702_v27, %s5395_s6 }
 0xa2f   : > { %3227 = vrot.lane.b32.xlu1 %v5705_v29, %s5395_s6 }
 0xa34   : > { %3129 = vrot.lane.b32.xlu0 %v5693_v20, %s5395_s6  ;;  %v5276_v20 = vpop.eup %5275 }
 0xa35   : > { %v3106_v27 = vsel %vm1363_vm6, %v5276_v20, 0.0 }
 0xa38   : > { %5088 = vrot.lane.b32.xlu0 %v5087_v23, %s5396_s4 }
 0xa3c   : > { %5098 = vrot.lane.b32.xlu0 %v5097_v55, %s5397_s2 }
 0xa40   : > { %5108 = vrot.lane.b32.xlu0 %v5107_v39, %s5396_s4 }
 0xa53   : > { %3107 = vadd.xlane.f32.xlu1 %v3106_v27 }
 0xa64   : > { %3276 = vrot.lane.b32.xlu1 %v5712_v35, %s5395_s6 }
 0xa67   : > { %v3087_v29 = vpop.xlane.xlu0 %3086 }
 0xa68   : > { %5093 = vrot.lane.b32.xlu1 %v5092_v28, %s5396_s4 }
 0xa6b   : > { %v3090_v18 = vpop.xlane.xlu1 %3089 }
 0xa6c   : > { %5103 = vrot.lane.b32.xlu1 %v5102_v0, %s5397_s2  ;;  %5277 = vrcp.f32 %v3090_v18 }
 0xa6d   : > { %5279 = vrcp.f32 %v3087_v29 }
 0xa70   : > { %5113 = vrot.lane.b32.xlu1 %v5112_v61, %s5396_s4  ;;  %s6513_s4 = scalar_lea.vmem %s6462_s15, %s5540_s0 }
 0xa79   : > { %v5278_v26 = vpop.eup %5277 }
 0xa7a   : > { %v5280_v39 = vpop.eup %5279  ;;  %v3118_v56 = vmul.f32 %v5278_v26, %v6085_v24 }
 0xa7b   : > { %v3117_v51 = vmul.f32 %v5280_v39, %v6081_v16 }
 0xa7d   : > { %v3125_v62 = vpack.c.bf16 %v3118_v56, %v3117_v51 }
 0xa9b   : > { %v3093_v22 = vpop.xlane.xlu0 %3092 }
 0xa9c   : > { %5281 = vrcp.f32 %v3093_v22 }
 0xa9f   : > { %v3096_v35 = vpop.xlane.xlu1 %3095 }
 0xaa0   : > { %5283 = vrcp.f32 %v3096_v35 }
 0xaa3   : > { %v3099_v23 = vpop.xlane.xlu0 %3098  ;;  %v3102_v25 = vpop.xlane.xlu1 %3101 }
 0xaa4   : > { %5285 = vrcp.f32 %v3099_v23 }
 0xaa5   : > { %5287 = vrcp.f32 %v3102_v25 }
 0xaa7   : > { %v3105_v28 = vpop.xlane.xlu0 %3104  ;;  %v3179_v30 = vpop.permute.xlu1 %3178 }
 0xaa8   : > { %v3184_v36 = vsel %vm1650_vm7, %v3179_v30, 0  ;;  %5289 = vrcp.f32 %v3105_v28 }
 0xaa9   : > { %4959 = vmatpush3.bf16.msra.mxu0 %v3184_v36  ;;  %v5282_v60 = vpop.eup %5281 }
 0xaaa   : > { %4970 = vmatprep.subr.bf16.mxu0 %v5387_v6  ;;  %v3119_v0 = vmul.f32 %v5282_v60, %v6089_v48 }
 0xaab   : > { %v3130_v61 = vpop.permute.xlu0 %3129  ;;  %v3228_v44 = vpop.permute.xlu1 %3227 }
 0xaac   : > { %v3135_v41 = vsel %vm1650_vm7, %v3130_v61, 0  ;;  %v3233_v37 = vsel %vm1650_vm7, %v3228_v44, 0 }
 0xaad   : > { %v5284_v55 = vpop.eup %5283  ;;  %4953 = vmatpush3.bf16.msra.mxu1 %v3135_v41 }
 0xaae   : > { %4964 = vmatprep.subr.bf16.mxu1 %v5387_v6  ;;  %v3120_v58 = vmul.f32 %v5284_v55, %v5268_v34  ;;  %v5154_v34 = vld [vmem:[%s5564_s3] sm:$0xff]  }
 0xaaf   : > { %v5089_v30 = vpop.permute.xlu0 %5088 }
 0xab0   : > { %4955 = vmatmul.mubr.msk.bf16.vlgmr.msra.gmra.mxu1 %vm1363_vm6, %v3125_v62  ;;  %v3126_v24 = vpack.c.bf16 %v3120_v58, %v3119_v0  ;;  %v5090_v56 = vunpack.i.l.bf16 %v5089_v30 }
 0xab1   : > { %v5286_v52 = vpop.eup %5285  ;;  %4965 = vmatpush3.bf16.msra.mxu1 %v3233_v37  ;;  %4966 = vmatprep.mubr.msk.bf16.mxu1 %vm5388_vm5, %v5387_v6 }
 0xab2   : > { %v5288_v16 = vpop.eup %5287  ;;  %4961 = vmatmul.mubr.msk.bf16.vlgmr.msra.gmra.mxu0 %vm1363_vm6, %v3126_v24  ;;  %v3121_v19 = vmul.f32 %v5286_v52, %v6096_v8  ;;  %v3421_v62 = vsel %vm1363_vm6, %v5822_v47, %v5090_v56  ;;  %v5325_v56 = vld [vmem:[#allocation2] sm:$0xff] }
 0xab3   : > { %v3122_v42 = vmul.f32 %v5288_v16, %v6094_v63  ;;  %4972 = vmatprep.mubr.msk.bf16.mxu0 %vm5388_vm5, %v5387_v6  ;;  %v5153_v6 = vld [vmem:[%s5564_s3 + $0x8] sm:$0xff]   ;;  %v5099_v39 = vpop.permute.xlu0 %5098 }
 0xab4   : > { %4976 = vmatprep.subr.bf16.mxu1 %v5153_v6  ;;  %v5101_v60 = vunpack.i.h.bf16 %v5099_v39  ;;  %v5100_v61 = vunpack.i.l.bf16 %v5099_v39 }
 0xab5   : > { %v3127_v59 = vpack.c.bf16 %v3122_v42, %v3121_v19  ;;  %v5290_v12 = vpop.eup %5289 }
 0xab6   : > { %v3123_v3 = vmul.f32 %v5290_v12, %v6102_v43  ;;  %v3430_v37 = vsel %vm3429_vm8, %v3421_v62, %v5100_v61  ;;  %v5328_v62 = vld [vmem:[#allocation2 + $0x18] sm:$0xff] }
 0xab7   : > { %v5109_v4 = vpop.permute.xlu0 %5108 }
 0xab8   : > { %4967 = vmatmul.mubr.msk.bf16.vlgmr.msra.gmra.mxu1 %vm1363_vm6, %v3127_v59 }
 0xab9   : > { %4977 = vmatpush3.bf16.msra.mxu1 %v5153_v6 }
 0xaba   : > { %4978 = vmatprep.subr.bf16.mxu1 %v5154_v34 }
 0xabd   : > { %4979 = vmatpush3.bf16.msra.mxu1 %v5154_v34 }
 0xadc   : > { %v3108_v40 = vpop.xlane.xlu1 %3107 }
 0xadd   : > { %5291 = vrcp.f32 %v3108_v40 }
 0xae0   : > { %v3277_v2 = vpop.permute.xlu1 %3276 }
 0xae1   : > { %v3282_v1 = vsel %vm1650_vm7, %v3277_v2, 0 }
 0xae2   : > { %4971 = vmatpush3.bf16.msra.mxu0 %v3282_v1 }
 0xae4   : > { %v5094_v36 = vpop.permute.xlu1 %5093 }
 0xae5   : > { %v5096_v41 = vunpack.i.h.bf16 %v5094_v36  ;;  %v5095_v17 = vunpack.i.l.bf16 %v5094_v36 }
 0xae7   : > { %v3424_v52 = vsel %vm1363_vm6, %v5828_v53, %v5096_v41  ;;  %v3423_v16 = vsel %vm1363_vm6, %v5826_v50, %v5095_v17  ;;  %v5326_v41 = vld [vmem:[#allocation2 + $0x10] sm:$0xff] }
 0xae8   : > { %v5104_v31 = vpop.permute.xlu1 %5103 }
 0xae9   : > { %v5105_v51 = vunpack.i.l.bf16 %v5104_v31 }
 0xaea   : > { %v5292_v13 = vpop.eup %5291 }
 0xaeb   : > { %v3124_v48 = vmul.f32 %v5292_v13, %v5276_v20  ;;  %v3432_v47 = vsel %vm3429_vm8, %v3423_v16, %v5105_v51  ;;  %v5111_v13 = vunpack.i.h.bf16 %v5109_v4 }
 0xaec   : > { %v5114_v21 = vpop.permute.xlu1 %5113 }
 0xaed   : > { %v3128_v15 = vpack.c.bf16 %v3124_v48, %v3123_v3  ;;  %v5110_v3 = vunpack.i.l.bf16 %v5109_v4 }
 0xaef   : > { %4973 = vmatmul.mubr.msk.bf16.vlgmr.msra.gmra.mxu0 %vm1363_vm6, %v3128_v15 }
 0xb70   : > { %v3171_v11 = vpop.f32.mrf.mxu1 }
 0xb72   : > { %v4956_v63 = vpop.f32.mrf.mxu1  ;;  %v3220_v8 = vpop.f32.mrf.mxu0 }
 0xb73   : > { %v3425_v63 = vsel %vm1363_vm6, %v5830_v54, %v5110_v3 }
 0xb74   : > { %v3174_v14 = vpop.f32.mrf.mxu1  ;;  %v4962_v46 = vpop.f32.mrf.mxu0 }
 0xb75   : > { %v5117_v45 = vpack.i.bf16 %v3174_v14, %v3171_v11  ;;  %v3426_v11 = vsel %vm1363_vm6, %v5832_v57, %v5111_v13  ;;  %v5115_v57 = vunpack.i.l.bf16 %v5114_v21 }
 0xb76   : > { %v4957_v10 = vpop.f32.mrf.mxu1  ;;  %v3223_v38 = vpop.f32.mrf.mxu0 }
 0xb77   : > { %v5127_v33 = vpack.i.bf16 %v3223_v38, %v3220_v8  ;;  %5118 = vrot.lane.b32.xlu0 %v5117_v45, %s5398_s12 }
 0xb78   : > { %v4963_v43 = vpop.f32.mrf.mxu0  ;;  %v3269_v20 = vpop.f32.mrf.mxu1 }
 0xb79   : > { %5128 = vrot.lane.b32.xlu1 %v5127_v33, %s5398_s12 }
 0xb7a   : > { %v4968_v27 = vpop.f32.mrf.mxu1 }
 0xb7b   : > { %5123 = vrot.lane.b32.xlu0 %v5122_v7, %s5397_s2  ;;  %v5091_v7 = vunpack.i.h.bf16 %v5089_v30 }
 0xb7c   : > { %v3272_v29 = vpop.f32.mrf.mxu1 }
 0xb7d   : > { %v5137_v18 = vpack.i.bf16 %v3272_v29, %v3269_v20  ;;  %5133 = vrot.lane.b32.xlu1 %v5132_v32, %s5397_s2  ;;  %v5106_v32 = vunpack.i.h.bf16 %v5104_v31  ;;  %v3422_v44 = vsel %vm1363_vm6, %v5824_v49, %v5091_v7  ;;  %v5116_v20 = vunpack.i.h.bf16 %v5114_v21 }
 0xb7e   : > { %v4969_v22 = vpop.f32.mrf.mxu1  ;;  %v3431_v24 = vsel %vm3429_vm8, %v3422_v44, %v5101_v60 }
 0xb7f   : > { %5138 = vrot.lane.b32.xlu0 %v5137_v18, %s5398_s12  ;;  %v3433_v2 = vsel %vm3429_vm8, %v3424_v52, %v5106_v32  ;;  %v3428_v18 = vsel %vm1363_vm6, %v5841_v9, %v5116_v20  ;;  %v3427_v22 = vsel %vm1363_vm6, %v5839_v5, %v5115_v57  ;;  %v4549_v9 = vld [vmem:[%s6509_s23] ss:$0 sm:$0xff] }
 0xbaf   : > { %v3318_v35 = vpop.f32.mrf.mxu0 }
 0xbb1   : > { %v4974_v23 = vpop.f32.mrf.mxu0 }
 0xbb3   : > { %v3321_v25 = vpop.f32.mrf.mxu0 }
 0xbb4   : > { %v5142_v26 = vpack.i.bf16 %v3321_v25, %v3318_v35 }
 0xbb5   : > { %v4975_v28 = vpop.f32.mrf.mxu0 }
 0xbb6   : > { %5143 = vrot.lane.b32.xlu1 %v5142_v26, %s5398_s12 }
 0xbe9   : > { %v5119_v55 = vpop.permute.xlu0 %5118 }
 0xbea   : > { %v5121_v0 = vunpack.i.h.bf16 %v5119_v55  ;;  %v5120_v58 = vunpack.i.l.bf16 %v5119_v55  ;;  %v5327_v55 = vld [vmem:[#allocation2 + $0x8] sm:$0xff] }
 0xbeb   : > { %v5129_v19 = vpop.permute.xlu1 %5128 }
 0xbec   : > { %v3440_v42 = vsel %vm3438_vm9, %v3431_v24, %v5121_v0  ;;  %v3439_v49 = vsel %vm3438_vm9, %v3430_v37, %v5120_v58  ;;  %v5131_v59 = vunpack.i.h.bf16 %v5129_v19  ;;  %v5130_v40 = vunpack.i.l.bf16 %v5129_v19 }
 0xbed   : > { %v3447_v1 = vpack.c.bf16 %v3440_v42, %v3439_v49  ;;  %v5124_v12 = vpop.permute.xlu0 %5123 }
 0xbee   : > { %v3441_v53 = vsel %vm3438_vm9, %v3432_v47, %v5130_v40  ;;  %v3442_v48 = vsel %vm3438_vm9, %v3433_v2, %v5131_v59  ;;  %v5126_v15 = vunpack.i.h.bf16 %v5124_v12  ;;  %v5125_v6 = vunpack.i.l.bf16 %v5124_v12  ;;  %v5329_v59 = vld [vmem:[#allocation2 + $0x20] sm:$0xff]  ;;  %v5330_v2 = vld [vmem:[#allocation2 + $0x30] sm:$0xff] }
 0xbef   : > { %v3448_v50 = vpack.c.bf16 %v3442_v48, %v3441_v53  ;;  %4980 = vmatprep.mubr.msk.bf16.mxu1 %vm1189_vm4, %v3447_v1  ;;  %v5134_v43 = vpop.permute.xlu1 %5133  ;;  %v5331_v53 = vld [vmem:[#allocation2 + $0x28] sm:$0xff] }
 0xbf0   : > { %v3435_v46 = vsel %vm3429_vm8, %v3426_v11, %v5126_v15  ;;  %v3434_v45 = vsel %vm3429_vm8, %v3425_v63, %v5125_v6  ;;  %v5136_v27 = vunpack.i.h.bf16 %v5134_v43  ;;  %v5135_v29 = vunpack.i.l.bf16 %v5134_v43 }
 0xbf1   : > { %4981 = vmatmul.mubr.msk.bf16.vlgmr.msra.gmra.mxu1 %vm1189_vm4, %v3448_v50  ;;  %v5139_v34 = vpop.permute.xlu0 %5138  ;;  %v5332_v50 = vld [vmem:[#allocation2 + $0x38] sm:$0xff] }
 0xbf2   : > { %v5141_v8 = vunpack.i.h.bf16 %v5139_v34  ;;  %v5140_v14 = vunpack.i.l.bf16 %v5139_v34  ;;  %v3436_v25 = vsel %vm3429_vm8, %v3427_v22, %v5135_v29  ;;  %v3437_v26 = vsel %vm3429_vm8, %v3428_v18, %v5136_v27 }
 0xbf4   : > { %v3444_v10 = vsel %vm3438_vm9, %v3435_v46, %v5141_v8  ;;  %v3443_v38 = vsel %vm3438_vm9, %v3434_v45, %v5140_v14 }
 0xbf5   : > { %v3449_v33 = vpack.c.bf16 %v3444_v10, %v3443_v38 }
 0xbf7   : > { %4984 = vmatprep.mubr.msk.bf16.mxu1 %vm1189_vm4, %v3449_v33 }
 0xc28   : > { %v5144_v54 = vpop.permute.xlu1 %5143 }
 0xc29   : > { %v5146_v35 = vunpack.i.h.bf16 %v5144_v54  ;;  %v5145_v23 = vunpack.i.l.bf16 %v5144_v54 }
 0xc2b   : > { %v3445_v28 = vsel %vm3438_vm9, %v3436_v25, %v5145_v23  ;;  %v3446_v30 = vsel %vm3438_vm9, %v3437_v26, %v5146_v35 }
 0xc2c   : > { %v3450_v36 = vpack.c.bf16 %v3446_v30, %v3445_v28  ;;  %v5155_v28 = vld [vmem:[%s5573_s24 + $0x8] sm:$0xff]   ;;  %v5156_v30 = vld [vmem:[%s5573_s24] sm:$0xff]  }
 0xc2d   : > { %4988 = vmatprep.subr.bf16.mxu0 %v5155_v28 }
 0xc2e   : > { %4985 = vmatmul.mubr.msk.bf16.gmra.mxu1 %vm1189_vm4, %v3450_v36  ;;  %4989 = vmatpush3.bf16.msra.mxu0 %v5155_v28 }
 0xc2f   : > { %4990 = vmatprep.subr.bf16.mxu0 %v5156_v30 }
 0xc32   : > { %4991 = vmatpush3.bf16.msra.mxu0 %v5156_v30 }
 0xcb1   : > { %v4982_v39 = vpop.f32.mrf.mxu1 }
 0xcb2   : > { %v3529_v31 = vadd.f32 %v4982_v39, %v4549_v9 }
 0xcb3   : > { %v3520_v5 = vpop.f32.mrf.mxu1 }
 0xcb4   : > { %v3521_v4 = vadd.f32 %v4549_v9, %v3520_v5  ;;  %v3553_v17 = vadd.f32 %v5326_v41, %v3529_v31 }
 0xcb5   : > { %v4983_v7 = vpop.f32.mrf.mxu1 }
 0xcb6   : > { %v3551_v60 = vadd.f32 %v5325_v56, %v3521_v4  ;;  %v3532_v21 = vadd.f32 %v4983_v7, %v4549_v9  ;;  %v3567_v37 = vsel %vm1189_vm4, %v3553_v17, 0.0 }
 0xcb7   : > { %v3523_v61 = vpop.f32.mrf.mxu1 }
 0xcb8   : > { %v3524_v32 = vadd.f32 %v4549_v9, %v3523_v61  ;;  %v3561_v51 = vsel %vm1189_vm4, %v3551_v60, 0.0  ;;  %v3554_v0 = vadd.f32 %v5328_v62, %v3532_v21 }
 0xcb9   : > { %3562 = vadd.xlane.f32.xlu0 %v3561_v51 }
 0xcba   : > { %v3552_v44 = vadd.f32 %v5327_v55, %v3524_v32  ;;  %v3570_v24 = vsel %vm1189_vm4, %v3554_v0, 0.0 }
 0xcbc   : > { %v3564_v58 = vsel %vm1189_vm4, %v3552_v44, 0.0 }
 0xcbd   : > { %3565 = vadd.xlane.f32.xlu1 %v3564_v58  ;;  %3568 = vadd.xlane.f32.xlu0 %v3567_v37  ;;  %v5157_v37 = vld [vmem:[%s5583_s20 + $0x38] sm:$0xff]  }
 0xcbe   : > { %5000 = vmatprep.subr.bf16.mxu1 %v5157_v37 }
 0xcbf   : > { %5001 = vmatpush3.bf16.msra.mxu1 %v5157_v37 }
 0xcc1   : > { %3571 = vadd.xlane.f32.xlu0 %v3570_v24  ;;  %v5158_v24 = vld [vmem:[%s5583_s20 + $0x30] sm:$0xff]  }
 0xcc2   : > { %5002 = vmatprep.subr.bf16.mxu1 %v5158_v24 }
 0xcc3   : > { %5003 = vmatpush3.bf16.msra.mxu1 %v5158_v24 }
 0xcee   : > { %v4986_v52 = vpop.f32.mrf.mxu1 }
 0xcef   : > { %v3545_v19 = vadd.f32 %v4986_v52, %v4549_v9  ;;  %v5159_v52 = vld [vmem:[%s5583_s20 + $0x28] sm:$0xff]  }
 0xcf0   : > { %v3536_v16 = vpop.f32.mrf.mxu1  ;;  %5004 = vmatprep.subr.bf16.mxu1 %v5159_v52 }
 0xcf1   : > { %v3537_v42 = vadd.f32 %v4549_v9, %v3536_v16  ;;  %v3557_v1 = vadd.f32 %v5330_v2, %v3545_v19  ;;  %v5160_v16 = vld [vmem:[%s5583_s20 + $0x20] sm:$0xff]   ;;  %5005 = vmatpush3.bf16.msra.mxu1 %v5159_v52  ;;  %v5161_v19 = vld [vmem:[%s5583_s20 + $0x18] sm:$0xff]  }
 0xcf2   : > { %v4987_v49 = vpop.f32.mrf.mxu1  ;;  %5006 = vmatprep.subr.bf16.mxu1 %v5160_v16 }
 0xcf3   : > { %v3555_v40 = vadd.f32 %v5329_v59, %v3537_v42  ;;  %v3548_v12 = vadd.f32 %v4987_v49, %v4549_v9  ;;  %v3579_v34 = vsel %vm1189_vm4, %v3557_v1, 0.0 }
 0xcf4   : > { %v3539_v47 = vpop.f32.mrf.mxu1 }
 0xcf5   : > { %v3540_v13 = vadd.f32 %v4549_v9, %v3539_v47  ;;  %v3573_v3 = vsel %vm1189_vm4, %v3555_v40, 0.0  ;;  %v3558_v15 = vadd.f32 %v5332_v50, %v3548_v12  ;;  %5007 = vmatpush3.bf16.msra.mxu1 %v5160_v16 }
 0xcf6   : > { %3574 = vadd.xlane.f32.xlu0 %v3573_v3  ;;  %5008 = vmatprep.subr.bf16.mxu1 %v5161_v19 }
 0xcf7   : > { %v3556_v48 = vadd.f32 %v5331_v53, %v3540_v13  ;;  %v3582_v11 = vsel %vm1189_vm4, %v3558_v15, 0.0 }
 0xcf9   : > { %v3576_v6 = vsel %vm1189_vm4, %v3556_v48, 0.0  ;;  %5009 = vmatpush3.bf16.msra.mxu1 %v5161_v19  ;;  %v5162_v19 = vld [vmem:[%s5583_s20 + $0x10] sm:$0xff]  }
 0xcfa   : > { %3577 = vadd.xlane.f32.xlu1 %v3576_v6  ;;  %3580 = vadd.xlane.f32.xlu0 %v3579_v34  ;;  %v4556_v6 = vld [vmem:[%s930_s25] ss:$0 sm:$0xff] }
 0xcfb   : > { %5010 = vmatprep.subr.bf16.mxu1 %v5162_v19 }
 0xcfd   : > { %5011 = vmatpush3.bf16.msra.mxu1 %v5162_v19 }
 0xcfe   : > { %3583 = vadd.xlane.f32.xlu1 %v3582_v11 }
 0xd42   : > { %v3563_v63 = vpop.xlane.xlu0 %3562 }
 0xd43   : > { %v3586_v8 = vmul.f32 0.03125, %v3563_v63 }
 0xd45   : > { %v6211_v14 = vsub.f32 %v3551_v60, %v3586_v8 }
 0xd46   : > { %v3566_v46 = vpop.xlane.xlu1 %3565  ;;  %v3569_v45 = vpop.xlane.xlu0 %3568 }
 0xd47   : > { %v3587_v10 = vmul.f32 0.03125, %v3566_v46  ;;  %v3588_v38 = vmul.f32 0.03125, %v3569_v45  ;;  %v3602_v33 = vmul.f32 %v6211_v14, %v6211_v14  ;;  %v4557_v45 = vld [vmem:[%s6510_s29] ss:$0 sm:$0xff] }
 0xd49   : > { %v6215_v43 = vsub.f32 %v3552_v44, %v3587_v10  ;;  %v6217_v20 = vsub.f32 %v3553_v17, %v3588_v38  ;;  %v3610_v57 = vsel %vm1189_vm4, %v3602_v33, 0.0 }
 0xd4a   : > { %3611 = vadd.xlane.f32.xlu0 %v3610_v57  ;;  %v3572_v27 = vpop.xlane.xlu0 %3571 }
 0xd4b   : > { %v3589_v29 = vmul.f32 0.03125, %v3572_v27  ;;  %v3603_v54 = vmul.f32 %v6215_v43, %v6215_v43  ;;  %v3604_v18 = vmul.f32 %v6217_v20, %v6217_v20 }
 0xd4d   : > { %v6224_v22 = vsub.f32 %v3554_v0, %v3589_v29  ;;  %v3613_v35 = vsel %vm1189_vm4, %v3603_v54, 0.0  ;;  %v3616_v23 = vsel %vm1189_vm4, %v3604_v18, 0.0 }
 0xd4e   : > { %3614 = vadd.xlane.f32.xlu1 %v3613_v35  ;;  %3617 = vadd.xlane.f32.xlu0 %v3616_v23 }
 0xd4f   : > { %v3605_v25 = vmul.f32 %v6224_v22, %v6224_v22 }
 0xd51   : > { %v3619_v26 = vsel %vm1189_vm4, %v3605_v25, 0.0 }
 0xd52   : > { %3620 = vadd.xlane.f32.xlu1 %v3619_v26 }
 0xd7f   : > { %v3575_v36 = vpop.xlane.xlu0 %3574 }
 0xd80   : > { %v3590_v39 = vmul.f32 0.03125, %v3575_v36 }
 0xd82   : > { %v6233_v9 = vsub.f32 %v3555_v40, %v3590_v39 }
 0xd83   : > { %v3578_v5 = vpop.xlane.xlu1 %3577  ;;  %v3581_v31 = vpop.xlane.xlu0 %3580 }
 0xd84   : > { %v3591_v4 = vmul.f32 0.03125, %v3578_v5  ;;  %v3592_v7 = vmul.f32 0.03125, %v3581_v31  ;;  %v3606_v56 = vmul.f32 %v6233_v9, %v6233_v9 }
 0xd86   : > { %v6237_v60 = vsub.f32 %v3556_v48, %v3591_v4  ;;  %v6239_v61 = vsub.f32 %v3557_v1, %v3592_v7  ;;  %v3622_v41 = vsel %vm1189_vm4, %v3606_v56, 0.0 }
 0xd87   : > { %v3584_v17 = vpop.xlane.xlu1 %3583  ;;  %3623 = vadd.xlane.f32.xlu0 %v3622_v41 }
 0xd88   : > { %v3593_v21 = vmul.f32 0.03125, %v3584_v17  ;;  %v3607_v32 = vmul.f32 %v6237_v60, %v6237_v60  ;;  %v3608_v51 = vmul.f32 %v6239_v61, %v6239_v61 }
 0xd8a   : > { %v6246_v55 = vsub.f32 %v3558_v15, %v3593_v21  ;;  %v3625_v44 = vsel %vm1189_vm4, %v3607_v32, 0.0  ;;  %v3628_v62 = vsel %vm1189_vm4, %v3608_v51, 0.0 }
 0xd8b   : > { %3626 = vadd.xlane.f32.xlu1 %v3625_v44  ;;  %3629 = vadd.xlane.f32.xlu0 %v3628_v62 }
 0xd8c   : > { %v3609_v0 = vmul.f32 %v6246_v55, %v6246_v55 }
 0xd8e   : > { %v3631_v58 = vsel %vm1189_vm4, %v3609_v0, 0.0 }
 0xd8f   : > { %3632 = vadd.xlane.f32.xlu1 %v3631_v58 }
 0xdd3   : > { %v3612_v42 = vpop.xlane.xlu0 %3611 }
 0xdd4   : > { %v3634_v49 = vmul.f32 0.03125, %v3612_v42  ;;  %v5164_v42 = vld [vmem:[%s5583_s20] sm:$0xff]  }
 0xdd6   : > { %v3642_v59 = vadd.f32 1e-05, %v3634_v49 }
 0xdd7   : > { %v3615_v40 = vpop.xlane.xlu1 %3614  ;;  %v3618_v47 = vpop.xlane.xlu0 %3617 }
 0xdd8   : > { %5293 = vrsqrt.f32 %v3642_v59  ;;  %v3635_v2 = vmul.f32 0.03125, %v3615_v40  ;;  %v3636_v1 = vmul.f32 0.03125, %v3618_v47  ;;  %v4558_v40 = vld [vmem:[%s6512_s21] ss:$0 sm:$0xff] }
 0xdda   : > { %v3643_v12 = vadd.f32 1e-05, %v3635_v2  ;;  %v3644_v13 = vadd.f32 1e-05, %v3636_v1 }
 0xddb   : > { %v3621_v3 = vpop.xlane.xlu1 %3620 }
 0xddc   : > { %5295 = vrsqrt.f32 %v3643_v12  ;;  %v3637_v53 = vmul.f32 0.03125, %v3621_v3 }
 0xddd   : > { %5297 = vrsqrt.f32 %v3644_v13 }
 0xdde   : > { %v3645_v48 = vadd.f32 1e-05, %v3637_v53 }
 0xde0   : > { %5299 = vrsqrt.f32 %v3645_v48 }
 0xde5   : > { %v5294_v50 = vpop.eup %5293 }
 0xde6   : > { %v3658_v15 = vmul.f32 %v5294_v50, %v6211_v14 }
 0xde8   : > { %v3672_v8 = vmul.f32 %v4556_v6, %v3658_v15 }
 0xde9   : > { %v5296_v34 = vpop.eup %5295 }
 0xdea   : > { %v5298_v11 = vpop.eup %5297  ;;  %v3659_v63 = vmul.f32 %v5296_v34, %v6215_v43  ;;  %v6272_v33 = vadd.f32 %v4557_v45, %v3672_v8 }
 0xdeb   : > { %v3660_v46 = vmul.f32 %v5298_v11, %v6217_v20 }
 0xdec   : > { %v3673_v10 = vmul.f32 %v4556_v6, %v3659_v63 }
 0xded   : > { %v5300_v38 = vpop.eup %5299  ;;  %v3674_v27 = vmul.f32 %v4556_v6, %v3660_v46 }
 0xdee   : > { %v3661_v14 = vmul.f32 %v5300_v38, %v6224_v22  ;;  %v6274_v57 = vadd.f32 %v4557_v45, %v3673_v10 }
 0xdef   : > { %v6279_v20 = vadd.f32 %v4557_v45, %v3674_v27 }
 0xdf0   : > { %v3694_v43 = vpack.c.bf16 %v6274_v57, %v6272_v33  ;;  %v3675_v29 = vmul.f32 %v4556_v6, %v3661_v14 }
 0xdf2   : > { %4992 = vmatprep.mubr.msk.bf16.mxu0 %vm1189_vm4, %v3694_v43  ;;  %v6281_v54 = vadd.f32 %v4557_v45, %v3675_v29 }
 0xdf4   : > { %v3695_v18 = vpack.c.bf16 %v6281_v54, %v6279_v20 }
 0xdf6   : > { %4993 = vmatmul.mubr.msk.bf16.vlgmr.msra.gmra.mxu0 %vm1189_vm4, %v3695_v18 }
 0xe10   : > { %v3624_v22 = vpop.xlane.xlu0 %3623 }
 0xe11   : > { %v3638_v35 = vmul.f32 0.03125, %v3624_v22 }
 0xe13   : > { %v3646_v23 = vadd.f32 1e-05, %v3638_v35 }
 0xe14   : > { %v3627_v25 = vpop.xlane.xlu1 %3626  ;;  %v3630_v26 = vpop.xlane.xlu0 %3629 }
 0xe15   : > { %5301 = vrsqrt.f32 %v3646_v23  ;;  %v3639_v28 = vmul.f32 0.03125, %v3627_v25  ;;  %v3640_v30 = vmul.f32 0.03125, %v3630_v26  ;;  %v4565_v23 = vld [vmem:[%s6513_s4] ss:$0 sm:$0xff] }
 0xe17   : > { %v3647_v36 = vadd.f32 1e-05, %v3639_v28  ;;  %v3648_v39 = vadd.f32 1e-05, %v3640_v30 }
 0xe18   : > { %v3633_v5 = vpop.xlane.xlu1 %3632 }
 0xe19   : > { %5303 = vrsqrt.f32 %v3647_v36  ;;  %v3641_v31 = vmul.f32 0.03125, %v3633_v5 }
 0xe1a   : > { %5305 = vrsqrt.f32 %v3648_v39 }
 0xe1b   : > { %v3649_v4 = vadd.f32 1e-05, %v3641_v31 }
 0xe1d   : > { %5307 = vrsqrt.f32 %v3649_v4 }
 0xe22   : > { %v5302_v7 = vpop.eup %5301 }
 0xe23   : > { %v3662_v56 = vmul.f32 %v5302_v7, %v6233_v9 }
 0xe25   : > { %v3676_v32 = vmul.f32 %v4556_v6, %v3662_v56 }
 0xe26   : > { %v5304_v41 = vpop.eup %5303 }
 0xe27   : > { %v5306_v17 = vpop.eup %5305  ;;  %v3663_v21 = vmul.f32 %v5304_v41, %v6237_v60  ;;  %v6289_v0 = vadd.f32 %v4557_v45, %v3676_v32 }
 0xe28   : > { %v3664_v51 = vmul.f32 %v5306_v17, %v6239_v61 }
 0xe29   : > { %v3677_v44 = vmul.f32 %v4556_v6, %v3663_v21 }
 0xe2a   : > { %v5308_v62 = vpop.eup %5307  ;;  %v3678_v24 = vmul.f32 %v4556_v6, %v3664_v51 }
 0xe2b   : > { %v6291_v58 = vadd.f32 %v4557_v45, %v3677_v44  ;;  %v3665_v37 = vmul.f32 %v5308_v62, %v6246_v55  ;;  %v5163_v55 = vld [vmem:[%s5583_s20 + $0x8] sm:$0xff]  }
 0xe2c   : > { %v6297_v60 = vadd.f32 %v4557_v45, %v3678_v24  ;;  %5012 = vmatprep.subr.bf16.mxu1 %v5163_v55 }
 0xe2d   : > { %v3696_v9 = vpack.c.bf16 %v6291_v58, %v6289_v0  ;;  %v3679_v52 = vmul.f32 %v4556_v6, %v3665_v37  ;;  %5013 = vmatpush3.bf16.msra.mxu1 %v5163_v55 }
 0xe2e   : > { %5014 = vmatprep.subr.bf16.mxu1 %v5164_v42 }
 0xe2f   : > { %4996 = vmatprep.mubr.msk.bf16.mxu0 %vm1189_vm4, %v3696_v9  ;;  %v6299_v61 = vadd.f32 %v4557_v45, %v3679_v52 }
 0xe31   : > { %v3697_v16 = vpack.c.bf16 %v6299_v61, %v6297_v60  ;;  %5015 = vmatpush3.bf16.msra.mxu1 %v5164_v42 }
 0xe33   : > { %4997 = vmatmul.mubr.msk.bf16.gmra.mxu0 %vm1189_vm4, %v3697_v16 }
 0xeb6   : > { %v4994_v49 = vpop.f32.mrf.mxu0 }
 0xeb7   : > { %v3776_v12 = vadd.f32 %v4994_v49, %v4558_v40 }
 0xeb8   : > { %v3767_v59 = vpop.f32.mrf.mxu0 }
 0xeb9   : > { %v3768_v2 = vadd.f32 %v4558_v40, %v3767_v59  ;;  %v3800_v15 = vmax.f32 %v3776_v12, 0.0 }
 0xeba   : > { %v4995_v47 = vpop.f32.mrf.mxu0 }
 0xebb   : > { %v3779_v1 = vadd.f32 %v4995_v47, %v4558_v40  ;;  %v3798_v48 = vmax.f32 %v3768_v2, 0.0 }
 0xebc   : > { %v3770_v13 = vpop.f32.mrf.mxu0 }
 0xebd   : > { %v3771_v3 = vadd.f32 %v4558_v40, %v3770_v13  ;;  %v3801_v53 = vmax.f32 %v3779_v1, 0.0 }
 0xebf   : > { %v3799_v50 = vmax.f32 %v3771_v3, 0.0  ;;  %v3807_v34 = vpack.c.bf16 %v3801_v53, %v3800_v15 }
 0xec1   : > { %v3806_v6 = vpack.c.bf16 %v3799_v50, %v3798_v48 }
 0xec3   : > { %5016 = vmatprep.mubr.bf16.mxu1 %v3806_v6 }
 0xec4   : > { %5017 = vmatmul.mubr.bf16.vlgmr.msra.gmra.mxu1 %v3807_v34 }
 0xef3   : > { %v4998_v11 = vpop.f32.mrf.mxu0 }
 0xef4   : > { %v3792_v10 = vadd.f32 %v4998_v11, %v4558_v40 }
 0xef5   : > { %v3783_v63 = vpop.f32.mrf.mxu0 }
 0xef6   : > { %v3784_v46 = vadd.f32 %v4558_v40, %v3783_v63  ;;  %v3804_v18 = vmax.f32 %v3792_v10, 0.0 }
 0xef7   : > { %v4999_v8 = vpop.f32.mrf.mxu0 }
 0xef8   : > { %v3795_v45 = vadd.f32 %v4999_v8, %v4558_v40  ;;  %v3802_v43 = vmax.f32 %v3784_v46, 0.0 }
 0xef9   : > { %v3786_v38 = vpop.f32.mrf.mxu0 }
 0xefa   : > { %v3787_v14 = vadd.f32 %v4558_v40, %v3786_v38  ;;  %v3805_v27 = vmax.f32 %v3795_v45, 0.0 }
 0xefc   : > { %v3803_v29 = vmax.f32 %v3787_v14, 0.0  ;;  %v3809_v35 = vpack.c.bf16 %v3805_v27, %v3804_v18 }
 0xefe   : > { %v3808_v22 = vpack.c.bf16 %v3803_v29, %v3802_v43 }
 0xf00   : > { %5020 = vmatprep.mubr.bf16.mxu1 %v3808_v22 }
 0xf01   : > { %5021 = vmatmul.mubr.bf16.gmra.mxu1 %v3809_v35 }
 0xf84   : > { %v5018_v25 = vpop.f32.mrf.mxu1 }
 0xf85   : > { %v3924_v26 = vadd.f32 %v5018_v25, %v4565_v23 }
 0xf86   : > { %v3915_v28 = vpop.f32.mrf.mxu1 }
 0xf87   : > { %v3948_v30 = vadd.f32 %v3924_v26, %v6279_v20  ;;  %v3916_v36 = vadd.f32 %v4565_v23, %v3915_v28 }
 0xf88   : > { %v5019_v39 = vpop.f32.mrf.mxu1 }
 0xf89   : > { %v3946_v5 = vadd.f32 %v3916_v36, %v6272_v33  ;;  %v3927_v31 = vadd.f32 %v5019_v39, %v4565_v23  ;;  %v3962_v4 = vsel %vm1189_vm4, %v3948_v30, 0.0 }
 0xf8a   : > { %3963 = vadd.xlane.f32.xlu0 %v3962_v4  ;;  %v3918_v7 = vpop.f32.mrf.mxu1 }
 0xf8b   : > { %v3949_v56 = vadd.f32 %v3927_v31, %v6281_v54  ;;  %v3919_v41 = vadd.f32 %v4565_v23, %v3918_v7  ;;  %v3956_v32 = vsel %vm1189_vm4, %v3946_v5, 0.0 }
 0xf8d   : > { %v3947_v17 = vadd.f32 %v3919_v41, %v6274_v57  ;;  %v3965_v21 = vsel %vm1189_vm4, %v3949_v56, 0.0 }
 0xf8e   : > { %3966 = vadd.xlane.f32.xlu1 %v3965_v21  ;;  %3957 = vadd.xlane.f32.xlu0 %v3956_v32 }
 0xf8f   : > { %v3959_v20 = vsel %vm1189_vm4, %v3947_v17, 0.0 }
 0xf92   : > { %3960 = vadd.xlane.f32.xlu1 %v3959_v20 }
 0xfc1   : > { %v5022_v33 = vpop.f32.mrf.mxu1 }
 0xfc2   : > { %v3940_v44 = vadd.f32 %v5022_v33, %v4565_v23 }
 0xfc3   : > { %v3931_v51 = vpop.f32.mrf.mxu1 }
 0xfc4   : > { %v3932_v62 = vadd.f32 %v4565_v23, %v3931_v51  ;;  %v3952_v9 = vadd.f32 %v3940_v44, %v6297_v60 }
 0xfc5   : > { %v5023_v37 = vpop.f32.mrf.mxu1 }
 0xfc6   : > { %v3950_v24 = vadd.f32 %v3932_v62, %v6289_v0  ;;  %v3943_v57 = vadd.f32 %v5023_v37, %v4565_v23  ;;  %v3974_v49 = vsel %vm1189_vm4, %v3952_v9, 0.0 }
 0xfc7   : > { %v3934_v54 = vpop.f32.mrf.mxu1 }
 0xfc8   : > { %v3935_v52 = vadd.f32 %v4565_v23, %v3934_v54  ;;  %v3968_v16 = vsel %vm1189_vm4, %v3950_v24, 0.0  ;;  %v3953_v55 = vadd.f32 %v3943_v57, %v6299_v61 }
 0xfc9   : > { %3969 = vadd.xlane.f32.xlu0 %v3968_v16 }
 0xfca   : > { %v3951_v19 = vadd.f32 %v3935_v52, %v6291_v58  ;;  %v3977_v0 = vsel %vm1189_vm4, %v3953_v55, 0.0 }
 0xfcc   : > { %v3971_v42 = vsel %vm1189_vm4, %v3951_v19, 0.0 }
 0xfcd   : > { %3972 = vadd.xlane.f32.xlu1 %v3971_v42  ;;  %3975 = vadd.xlane.f32.xlu0 %v3974_v49 }
 0xfd1   : > { %3978 = vadd.xlane.f32.xlu1 %v3977_v0 }
0x1013   : > { %v3964_v59 = vpop.xlane.xlu0 %3963 }
0x1014   : > { %v3982_v60 = vmul.f32 0.03125, %v3964_v59 }
0x1016   : > { %v6333_v40 = vsub.f32 %v3948_v30, %v3982_v60 }
0x1017   : > { %v3967_v47 = vpop.xlane.xlu1 %3966  ;;  %v3958_v2 = vpop.xlane.xlu0 %3957 }
0x1018   : > { %v3983_v1 = vmul.f32 0.03125, %v3967_v47  ;;  %v3980_v12 = vmul.f32 0.03125, %v3958_v2  ;;  %v3998_v58 = vmul.f32 %v6333_v40, %v6333_v40 }
0x101a   : > { %v6337_v61 = vsub.f32 %v3949_v56, %v3983_v1  ;;  %v6339_v13 = vsub.f32 %v3946_v5, %v3980_v12  ;;  %v4010_v3 = vsel %vm1189_vm4, %v3998_v58, 0.0 }
0x101b   : > { %v3961_v53 = vpop.xlane.xlu1 %3960  ;;  %4011 = vadd.xlane.f32.xlu0 %v4010_v3 }
0x101c   : > { %v3981_v48 = vmul.f32 0.03125, %v3961_v53  ;;  %v3999_v50 = vmul.f32 %v6337_v61, %v6337_v61  ;;  %v3996_v15 = vmul.f32 %v6339_v13, %v6339_v13 }
0x101e   : > { %v6346_v6 = vsub.f32 %v3947_v17, %v3981_v48  ;;  %v4013_v34 = vsel %vm1189_vm4, %v3999_v50, 0.0  ;;  %v4004_v11 = vsel %vm1189_vm4, %v3996_v15, 0.0 }
0x101f   : > { %4014 = vadd.xlane.f32.xlu1 %v4013_v34  ;;  %4005 = vadd.xlane.f32.xlu0 %v4004_v11 }
0x1020   : > { %v3997_v63 = vmul.f32 %v6346_v6, %v6346_v6 }
0x1022   : > { %v4007_v8 = vsel %vm1189_vm4, %v3997_v63, 0.0 }
0x1023   : > { %4008 = vadd.xlane.f32.xlu1 %v4007_v8 }
0x1052   : > { %v3970_v46 = vpop.xlane.xlu0 %3969 }
0x1053   : > { %v3984_v45 = vmul.f32 0.03125, %v3970_v46 }
0x1055   : > { %v6353_v10 = vsub.f32 %v3950_v24, %v3984_v45  ;;  %v4574_v24 = vld [vmem:[%s936_s8] ss:$0 sm:$0xff]  ;;  %s6514_s8 = sld [smem:[#allocation7_spill]] }
0x1056   : > { %v3973_v38 = vpop.xlane.xlu1 %3972  ;;  %v3976_v14 = vpop.xlane.xlu0 %3975 }
0x1057   : > { %v3985_v27 = vmul.f32 0.03125, %v3973_v38  ;;  %v3986_v43 = vmul.f32 0.03125, %v3976_v14  ;;  %v4000_v29 = vmul.f32 %v6353_v10, %v6353_v10 }
0x1059   : > { %v6357_v18 = vsub.f32 %v3951_v19, %v3985_v27  ;;  %v6359_v22 = vsub.f32 %v3952_v9, %v3986_v43  ;;  %v4016_v35 = vsel %vm1189_vm4, %v4000_v29, 0.0  ;;  %v4575_v9 = vld [vmem:[%s939_s22] ss:$0 sm:$0xff] }
0x105a   : > { %v3979_v23 = vpop.xlane.xlu1 %3978  ;;  %4017 = vadd.xlane.f32.xlu0 %v4016_v35 }
0x105b   : > { %v3987_v25 = vmul.f32 0.03125, %v3979_v23  ;;  %v4001_v26 = vmul.f32 %v6357_v18, %v6357_v18  ;;  %v4002_v28 = vmul.f32 %v6359_v22, %v6359_v22  ;;  %p4576_p6 = scmp.ne.s32.totalorder %s6514_s8, 1 }
0x105c   : > { %s6515_s23 = sld [smem:[#allocation22_spill]] (!%p4576_p6) }
0x105d   : > { %v6366_v30 = vsub.f32 %v3953_v55, %v3987_v25  ;;  %v4019_v36 = vsel %vm1189_vm4, %v4001_v26, 0.0  ;;  %v4022_v39 = vsel %vm1189_vm4, %v4002_v28, 0.0  ;;  %s6516_s29 = sld [smem:[#allocation23_spill]] (!%p4576_p6) }
0x105e   : > { %4020 = vadd.xlane.f32.xlu1 %v4019_v36  ;;  %4023 = vadd.xlane.f32.xlu0 %v4022_v39 }
0x105f   : > { %v4003_v5 = vmul.f32 %v6366_v30, %v6366_v30 }
0x1061   : > { %v4025_v31 = vsel %vm1189_vm4, %v4003_v5, 0.0 }
0x1062   : > { %4026 = vadd.xlane.f32.xlu1 %v4025_v31 }
0x10a4   : > { %v4012_v4 = vpop.xlane.xlu0 %4011 }
0x10a5   : > { %v4030_v7 = vmul.f32 0.03125, %v4012_v4 }
0x10a7   : > { %v4038_v56 = vadd.f32 1e-05, %v4030_v7 }
0x10a8   : > { %v4015_v41 = vpop.xlane.xlu1 %4014  ;;  %v4006_v17 = vpop.xlane.xlu0 %4005 }
0x10a9   : > { %5309 = vrsqrt.f32 %v4038_v56  ;;  %v4031_v21 = vmul.f32 0.03125, %v4015_v41  ;;  %v4028_v32 = vmul.f32 0.03125, %v4006_v17 }
0x10ab   : > { %v4039_v20 = vadd.f32 1e-05, %v4031_v21  ;;  %v4036_v33 = vadd.f32 1e-05, %v4028_v32 }
0x10ac   : > { %v4009_v51 = vpop.xlane.xlu1 %4008 }
0x10ad   : > { %5311 = vrsqrt.f32 %v4039_v20  ;;  %v4029_v44 = vmul.f32 0.03125, %v4009_v51 }
0x10ae   : > { %5313 = vrsqrt.f32 %v4036_v33 }
0x10af   : > { %v4037_v62 = vadd.f32 1e-05, %v4029_v44 }
0x10b1   : > { %5315 = vrsqrt.f32 %v4037_v62 }
0x10b6   : > { %v5310_v37 = vpop.eup %5309 }
0x10b7   : > { %v4054_v54 = vmul.f32 %v5310_v37, %v6333_v40 }
0x10b9   : > { %v4068_v57 = vmul.f32 %v4574_v24, %v4054_v54 }
0x10ba   : > { %v5312_v52 = vpop.eup %5311 }
0x10bb   : > { %v5314_v16 = vpop.eup %5313  ;;  %v6384_v19 = vadd.f32 %v4575_v9, %v4068_v57  ;;  %v4055_v55 = vmul.f32 %v5312_v52, %v6337_v61 }
0x10bc   : > { %v4052_v42 = vmul.f32 %v5314_v16, %v6339_v13 }
0x10bd   : > { %4090 = vst.msk [vmem:[#allocation2 + $0x10] sm:$0xff] %vm1189_vm4, %v6384_v19  ;;  %v4069_v49 = vmul.f32 %v4574_v24, %v4055_v55 }
0x10be   : > { %v5316_v0 = vpop.eup %5315  ;;  %v4066_v59 = vmul.f32 %v4574_v24, %v4052_v42 }
0x10bf   : > { %v6390_v60 = vadd.f32 %v4575_v9, %v4069_v49  ;;  %v4053_v40 = vmul.f32 %v5316_v0, %v6346_v6 }
0x10c0   : > { %v4080_v47 = vadd.f32 %v4575_v9, %v4066_v59 }
0x10c1   : > { %4091 = vst.msk [vmem:[#allocation2 + $0x18] sm:$0xff] %vm1189_vm4, %v6390_v60  ;;  %v4067_v2 = vmul.f32 %v4574_v24, %v4053_v40 }
0x10c2   : > { %4088 = vst.msk [vmem:[#allocation2] sm:$0xff] %vm1189_vm4, %v4080_v47 }
0x10c3   : > { %v4081_v1 = vadd.f32 %v4575_v9, %v4067_v2 }
0x10c5   : > { %4089 = vst.msk [vmem:[#allocation2 + $0x8] sm:$0xff] %vm1189_vm4, %v4081_v1 }
0x10e3   : > { %v4018_v12 = vpop.xlane.xlu0 %4017 }
0x10e4   : > { %v4032_v58 = vmul.f32 0.03125, %v4018_v12 }
0x10e6   : > { %v4040_v61 = vadd.f32 1e-05, %v4032_v58 }
0x10e7   : > { %v4021_v13 = vpop.xlane.xlu1 %4020  ;;  %v4024_v3 = vpop.xlane.xlu0 %4023 }
0x10e8   : > { %5317 = vrsqrt.f32 %v4040_v61  ;;  %v4033_v53 = vmul.f32 0.03125, %v4021_v13  ;;  %v4034_v48 = vmul.f32 0.03125, %v4024_v3 }
0x10ea   : > { %v4041_v50 = vadd.f32 1e-05, %v4033_v53  ;;  %v4042_v15 = vadd.f32 1e-05, %v4034_v48 }
0x10eb   : > { %v4027_v6 = vpop.xlane.xlu1 %4026 }
0x10ec   : > { %5319 = vrsqrt.f32 %v4041_v50  ;;  %v4035_v34 = vmul.f32 0.03125, %v4027_v6 }
0x10ed   : > { %5321 = vrsqrt.f32 %v4042_v15 }
0x10ee   : > { %v4043_v11 = vadd.f32 1e-05, %v4035_v34 }
0x10f0   : > { %5323 = vrsqrt.f32 %v4043_v11 }
0x10f5   : > { %v5318_v63 = vpop.eup %5317 }
0x10f6   : > { %v4056_v8 = vmul.f32 %v5318_v63, %v6353_v10 }
0x10f8   : > { %v4070_v46 = vmul.f32 %v4574_v24, %v4056_v8 }
0x10f9   : > { %v5320_v45 = vpop.eup %5319 }
0x10fa   : > { %v5322_v38 = vpop.eup %5321  ;;  %v4084_v14 = vadd.f32 %v4575_v9, %v4070_v46  ;;  %v4057_v27 = vmul.f32 %v5320_v45, %v6357_v18 }
0x10fb   : > { %v4058_v43 = vmul.f32 %v5322_v38, %v6359_v22 }
0x10fc   : > { %4092 = vst.msk [vmem:[#allocation2 + $0x20] sm:$0xff] %vm1189_vm4, %v4084_v14  ;;  %v4071_v29 = vmul.f32 %v4574_v24, %v4057_v27 }
0x10fd   : > { %v5324_v35 = vpop.eup %5323  ;;  %v4072_v23 = vmul.f32 %v4574_v24, %v4058_v43 }
0x10fe   : > { %v4085_v25 = vadd.f32 %v4575_v9, %v4071_v29  ;;  %v4059_v26 = vmul.f32 %v5324_v35, %v6366_v30 }
0x10ff   : > { %v4086_v28 = vadd.f32 %v4575_v9, %v4072_v23 }
0x1100   : > { %4093 = vst.msk [vmem:[#allocation2 + $0x28] sm:$0xff] %vm1189_vm4, %v4085_v25  ;;  %v4073_v10 = vmul.f32 %v4574_v24, %v4059_v26  ;;  %4099 = sbr.rel (%p4576_p6) target bundleno = 4570 (0x11da), region = 116 }
0x1101   : > { %4094 = vst.msk [vmem:[#allocation2 + $0x30] sm:$0xff] %vm1189_vm4, %v4086_v28 }
0x1102   : > { %v4087_v36 = vadd.f32 %v4575_v9, %v4073_v10 }
0x1104   : > { %4095 = vst.msk [vmem:[#allocation2 + $0x38] sm:$0xff] %vm1189_vm4, %v4087_v36 }
0x1105   : > { %v5333_v18 = vld [vmem:[%s6515_s23 + $0x8] sm:$0xff]   ;;  %v4100_v22 = vmax.f32 %v4080_v47, 0.0  ;;  %v5334_v30 = vld [vmem:[%s6515_s23] sm:$0xff]   ;;  %v4101_v39 = vmax.f32 %v4081_v1, 0.0  ;;  %v4104_v5 = vmax.f32 %v4084_v14, 0.0  ;;  %v4105_v31 = vmax.f32 %v4085_v25, 0.0 }
0x1106   : > { %5024 = vmatprep.subr.bf16.mxu0 %v5333_v18  ;;  %5036 = vmatprep.subr.bf16.mxu1 %v5333_v18  ;;  %v4102_v4 = vmax.f32 %v6384_v19, 0.0  ;;  %v4103_v7 = vmax.f32 %v6390_v60, 0.0  ;;  %v4106_v41 = vmax.f32 %v4086_v28, 0.0  ;;  %v4107_v17 = vmax.f32 %v4087_v36, 0.0  ;;  %v4577_v44 = vld [vmem:[%s6516_s29] ss:$0 sm:$0xff] }
0x1107   : > { %5025 = vmatpush3.bf16.msra.mxu0 %v5333_v18  ;;  %5038 = vmatpush3.bf16.msra.mxu1 %v5333_v18  ;;  %v4108_v56 = vpack.c.bf16 %v4101_v39, %v4100_v22  ;;  %v4110_v21 = vpack.c.bf16 %v4105_v31, %v4104_v5 }
0x1108   : > { %5026 = vmatprep.subr.bf16.mxu0 %v5334_v30  ;;  %5037 = vmatprep.subr.bf16.mxu1 %v5334_v30  ;;  %v4109_v32 = vpack.c.bf16 %v4103_v7, %v4102_v4  ;;  %v4111_v20 = vpack.c.bf16 %v4107_v17, %v4106_v41 }
0x1109   : > { %5028 = vmatprep.mubr.msk.bf16.mxu0 %vm1189_vm4, %v4108_v56  ;;  %5032 = vmatprep.mubr.msk.bf16.mxu1 %vm1189_vm4, %v4110_v21 }
0x110b   : > { %5027 = vmatpush3.bf16.msra.mxu0 %v5334_v30  ;;  %5039 = vmatpush3.bf16.msra.mxu1 %v5334_v30 }
0x110e   : > { %5029 = vmatmul.mubr.msk.bf16.vlgmr.msra.gmra.mxu0 %vm1189_vm4, %v4109_v32  ;;  %5033 = vmatmul.mubr.msk.bf16.vlgmr.msra.gmra.mxu1 %vm1189_vm4, %v4111_v20 }
0x11ce   : > { %v5030_v33 = vpop.f32.mrf.mxu0  ;;  %v5034_v51 = vpop.f32.mrf.mxu1 }
0x11cf   : > { %v4190_v9 = vadd.f32 %v5030_v33, %v4577_v44  ;;  %v4206_v57 = vadd.f32 %v5034_v51, %v4577_v44 }
0x11d0   : > { %v4181_v62 = vpop.f32.mrf.mxu0  ;;  %v4197_v37 = vpop.f32.mrf.mxu1 }
0x11d1   : > { %v4182_v19 = vadd.f32 %v4577_v44, %v4181_v62  ;;  %v4198_v55 = vadd.f32 %v4577_v44, %v4197_v37 }
0x11d2   : > { %v5031_v24 = vpop.f32.mrf.mxu0  ;;  %v5035_v54 = vpop.f32.mrf.mxu1 }
0x11d3   : > { %v4193_v52 = vadd.f32 %v5031_v24, %v4577_v44  ;;  %v4209_v16 = vadd.f32 %v5035_v54, %v4577_v44 }
0x11d4   : > { %v4184_v42 = vpop.f32.mrf.mxu0  ;;  %v4200_v49 = vpop.f32.mrf.mxu1 }
0x11d5   : > { %v4621_v0 = vpack.c.bf16 %v4193_v52, %v4190_v9  ;;  %v4631_v59 = vpack.c.bf16 %v4209_v16, %v4206_v57  ;;  %v4185_v60 = vadd.f32 %v4577_v44, %v4184_v42  ;;  %v4201_v40 = vadd.f32 %v4577_v44, %v4200_v49 }
0x11d7   : > { %4633 = vst [vmem:[#allocation4 + $0x8] sm:$0xff] %v4621_v0   ;;  %4635 = vst [vmem:[#allocation4 + $0x18] sm:$0xff] %v4631_v59   ;;  %v4616_v47 = vpack.c.bf16 %v4185_v60, %v4182_v19  ;;  %v4626_v2 = vpack.c.bf16 %v4201_v40, %v4198_v55 }
0x11d9   : > { %4617 = vst [vmem:[#allocation4] sm:$0xff] %v4616_v47   ;;  %4634 = vst [vmem:[#allocation4 + $0x10] sm:$0xff] %v4626_v2  }
0x11da PF: > { %s6517_s25 = sld [smem:[#allocation9_spill]]  ;;  %s5399_s21 = smov [#allocation4]  }
0x11db   : > { %s4262_s20 = sshll.u32 %s5399_s21, 4  ;;  %s4263_s20 = int_to_ptr.vmem [resolvable:$true] %s4262_s20 }
0x11dc   : > { %s5335_s6 = scalar_lea.vmem %s4263_s20, 512  ;;  %p5342_p11 = scmp.lt.s32.totalorder %s4263_s20, %s4263_s20 }
0x11dd   : > { %p5336_p8 = scmp.ne.s32.totalorder %s4263_s20, %s5335_s6  ;;  %p5343_p12 = scmp.lt.s32.totalorder %s5335_s6, %s5335_s6 }
0x11df   : > { %p5344_p13 = por %p5343_p12, %p5342_p11 }
0x11e0   : > { %s6518_s1 = sadd.s32 4294967295, %s6517_s25  }
0x11e1   : > { %p6423_p7 = scmp.eq.s32.totalorder %s6518_s1, 1 }
0x11e3   : > { %p5337_p9 = pnand %p5336_p8, %p6423_p7 }
0x11e5   : > { %p5338_p10 = pneg %p5337_p9 }
0x11e7   : > { %p5345_p0 = pnand %p5344_p13, %p5338_p10 }
0x11e9   : > { %5348 = shalt.err (!%p5345_p0)
}
0x11ea   : > { %s5400_s4 = smov 64   ;;  %s5401_s2 = smov 4  }
0x11eb   : > { %s6520_s5 = sld [smem:[#allocation24_spill]] }
0x11f1   : > { %5043 = dma.vmem_to_hbm [thread:$0]  (%p6423_p7), %s4263_s20, 512, %s6520_s5, [#allocation5], %s5400_s4, %s5400_s4, %s5401_s2  }
0x11f2   : > { %5372 = dma.done.wait (%p6423_p7), [#allocation5], 512  }
0x11f3   : > { %5374 = vsyncadd (%p6423_p7), [#allocation5], 4294966784 }
0x11f4 PF: > { %s6521_s8 = sld [smem:[#allocation9_spill]] }
0x11f5   : > { %s6522_s3 = sld [smem:[#allocation8_spill]] }
0x11f6   : > { %s6523_s28 = sld [smem:[#allocation10_spill]] }
0x11fa   : > { %s33_s29 = sadd.s32 1, %s6521_s8  }
0x11fb   : > { %p30_p1 = scmp.ge.s32.totalorder %s33_s29, 4  }
0x11fd   :  { %32 = sbr.rel (!%p30_p1) target bundleno = 17 (0x11), region = 189 }
0x1202   :  { %4278 = vsyncpa [#allocation5], 1 }
0x1203   :  { %4280 = vsyncpa [#allocation5 + $0x1], 1 }

</bundles_post_ra>
